<compile_context>
chip_gen: v7x
topology: tpu7x:2x2x1
jax: 0.10.0
libtpu: 0.0.40
codegen_flags: <defaults>
</compile_context>

<pallas_src>
import functools

import jax
import jax.numpy as jnp
from jax.experimental import pallas as pl
from jax.experimental.pallas import tpu as pltpu


LANE = 128      # all padded feature dims are multiples of the lane width
SUBLANE = 8     # batch-tile alignment for f32 tiles


def _round_up(n, m):
    return ((n + m - 1) // m) * m


def _cdiv(a, b):
    return -(-a // b)


def _detect_tpu():
    """Best-effort chip detection: (num_tensorcores_per_device, has_bf16_vpu).

    Falls back to the universally-safe choice (1 TC, f32 epilogues) if the
    device kind can't be parsed.
    """
    try:
        kind = jax.devices()[0].device_kind.lower()
    except Exception:  # pragma: no cover - non-TPU / odd backends
        return 1, False
    lite = ("lite" in kind) or ("v5e" in kind) or ("v6e" in kind)
    megacore = ("v4" in kind) or (("v5" in kind) and not lite) or ("7" in kind)
    bf16_vpu = ("v6" in kind) or ("7" in kind)
    return (2 if megacore else 1), bf16_vpu


def vae_forward_kernel(
    x_ref,        # (TILE_B, Dp)   f32   streamed per grid step
    w_enc1_ref,   # (Dp, Hp)       bf16  resident
    b_enc1_ref,   # (1, Hp)        f32   resident
    w_mulv_ref,   # (Hp, 2*Lp)     bf16  resident (fused mu | logvar)
    b_mulv_ref,   # (1, 2*Lp)      f32   resident
    eps_ref,      # (TILE_B, Lp)   f32   streamed per grid step
    w_dec1_ref,   # (Lp, Hp)       bf16  resident
    b_dec1_ref,   # (1, Hp)        f32   resident
    w_dec2_ref,   # (Hp, Dp)       bf16  resident
    b_dec2_ref,   # (1, Dp)        f32   resident
    out_ref,      # (TILE_B, Dp)   f32   streamed per grid step
    *,
    latent_pad,       # Lp (static)
    bf16_epilogue,    # static: bf16 bias+ReLU epilogues (v6e/v7x) vs f32 (v5e)
):
    f32, bf16 = jnp.float32, jnp.bfloat16

    x = x_ref[...].astype(bf16)

    # ---- Encoder: Linear -> ReLU ----
    if bf16_epilogue:
        h = jnp.dot(x, w_enc1_ref[...], preferred_element_type=bf16)
        h = jnp.maximum(h + b_enc1_ref[...].astype(bf16), 0.0)
    else:
        h = jnp.dot(x, w_enc1_ref[...], preferred_element_type=f32)
        h = jnp.maximum(h + b_enc1_ref[...], 0.0).astype(bf16)

    # ---- Fused mu | logvar projection: single wide MXU pass, lane-aligned
    # slices.  (For tighter f32 parity this LHS could stay f32; bf16 drift is
    # well inside the checked tolerance.)
    y = jnp.dot(h, w_mulv_ref[...], preferred_element_type=f32) + b_mulv_ref[...]
    mu = y[:, :latent_pad]
    logvar = y[:, latent_pad:]

    # ---- Sampling layer (reparameterization trick) — f32 on all chips ----
    z = (mu + jnp.exp(0.5 * logvar) * eps_ref[...]).astype(bf16)

    # ---- Decoder: Linear -> ReLU -> Linear -> sigmoid ----
    if bf16_epilogue:
        hd = jnp.dot(z, w_dec1_ref[...], preferred_element_type=bf16)
        hd = jnp.maximum(hd + b_dec1_ref[...].astype(bf16), 0.0)
    else:
        hd = jnp.dot(z, w_dec1_ref[...], preferred_element_type=f32)
        hd = jnp.maximum(hd + b_dec1_ref[...], 0.0).astype(bf16)

    logits = jnp.dot(hd, w_dec2_ref[...], preferred_element_type=f32) + b_dec2_ref[...]

    # sigmoid(x) = 1 / (1 + exp(-x)): exp + approx reciprocal both live on the
    # EUP slot (otherwise idle), keeping the VALU free.
    out_ref[...] = pl.reciprocal(1.0 + jnp.exp(-logits), approx=True)


def init_params(key, data_size, hidden_size, latent_size):
    """Module-shaped f32 parameters, stored (in, out) so the kernel computes x @ W + b."""
    ks = jax.random.split(key, 5)

    def linear(k, fan_in, fan_out):
        w = jax.random.normal(k, (fan_in, fan_out), jnp.float32) * (1.0 / jnp.sqrt(fan_in))
        b = jnp.zeros((1, fan_out), jnp.float32)
        return w, b

    w_enc1, b_enc1 = linear(ks[0], data_size, hidden_size)
    w_mu, b_mu = linear(ks[1], hidden_size, latent_size)
    w_lv, b_lv = linear(ks[2], hidden_size, latent_size)
    w_dec1, b_dec1 = linear(ks[3], latent_size, hidden_size)
    w_dec2, b_dec2 = linear(ks[4], hidden_size, data_size)

    return {
        "w_enc1": w_enc1, "b_enc1": b_enc1,
        "w_mu": w_mu, "b_mu": b_mu,
        "w_lv": w_lv, "b_lv": b_lv,
        "w_dec1": w_dec1, "b_dec1": b_dec1,
        "w_dec2": w_dec2, "b_dec2": b_dec2,
    }


def pack_params(params, matmul_dtype=jnp.bfloat16):
    """Zero-pad feature dims to multiples of 128, fuse mu/logvar weights, and
    cast matmul weights to bf16 (biases stay f32 for the f32-capable epilogues)."""
    D, H = params["w_enc1"].shape
    L = params["w_mu"].shape[1]
    Dp, Hp, Lp = _round_up(D, LANE), _round_up(H, LANE), _round_up(L, LANE)

    def pad2(a, rows, cols):
        return jnp.pad(a, ((0, rows - a.shape[0]), (0, cols - a.shape[1])))

    w_mulv = jnp.concatenate(
        [pad2(params["w_mu"], Hp, Lp), pad2(params["w_lv"], Hp, Lp)], axis=1)
    b_mulv = jnp.concatenate(
        [pad2(params["b_mu"], 1, Lp), pad2(params["b_lv"], 1, Lp)], axis=1)

    return {
        "w_enc1": pad2(params["w_enc1"], Dp, Hp).astype(matmul_dtype),
        "b_enc1": pad2(params["b_enc1"], 1, Hp),
        "w_mulv": w_mulv.astype(matmul_dtype),
        "b_mulv": b_mulv,
        "w_dec1": pad2(params["w_dec1"], Lp, Hp).astype(matmul_dtype),
        "b_dec1": pad2(params["b_dec1"], 1, Hp),
        "w_dec2": pad2(params["w_dec2"], Hp, Dp).astype(matmul_dtype),
        "b_dec2": pad2(params["b_dec2"], 1, Dp),
    }


def vae_forward(x, packed, eps, *, num_tc=None, bf16_epilogue=None, max_tile_b=512):
    B, D = x.shape
    L = eps.shape[1]
    Dp, Hp = packed["w_enc1"].shape
    Lp = packed["w_dec1"].shape[0]
    assert L <= Lp

    # Chip-aware defaults: one big grid step per TensorCore; bf16 epilogues
    # only where a bf16 VPU exists (v6e/v7x).
    det_tc, det_bf16 = _detect_tpu()
    if num_tc is None:
        num_tc = det_tc
    if bf16_epilogue is None:
        bf16_epilogue = det_bf16

    per_core = _cdiv(B, num_tc)
    tile_b = min(_round_up(per_core, SUBLANE), max_tile_b)
    n_steps = num_tc * _cdiv(per_core, tile_b)        # multiple of num_tc -> even split
    Bp = tile_b * n_steps
    grid = (n_steps,)

    # Pad activations to lane-dense / tile-aligned shapes (no-op pads are free).
    xp = jnp.pad(x, ((0, Bp - B), (0, Dp - D)))
    epsp = jnp.pad(eps, ((0, Bp - B), (0, Lp - L)))

    # VMEM budget: resident weights (single-buffered) + double-buffered
    # streamed tiles + f32 intermediates, with generous margin.  Keeps scaled
    # sizes honest against v7x's 64 MiB physical VMEM.
    weights_bytes = sum(int(v.size) * v.dtype.itemsize for v in packed.values())
    streamed_bytes = 2 * tile_b * (2 * Dp + Lp) * 4           # x, out, eps (x2 buffers)
    interm_bytes = tile_b * (2 * Hp + 2 * Lp + Dp) * 4        # h, y, hd, logits
    budget = 2 * weights_bytes + streamed_bytes + 2 * interm_bytes
    vmem_limit = int(min(max(4 * budget, 16 << 20), 64 << 20))

    # Advisory cost estimate so XLA can schedule surrounding ops around us.
    flops = 2 * Bp * (Dp * Hp + Hp * (2 * Lp) + Lp * Hp + Hp * Dp)
    transcendentals = Bp * (Lp + 2 * Dp)                      # reparam exp + sigmoid exp/recip
    bytes_accessed = int(xp.size * 4 + epsp.size * 4 + Bp * Dp * 4 + weights_bytes)

    args = (
        xp,
        packed["w_enc1"], packed["b_enc1"],
        packed["w_mulv"], packed["b_mulv"],
        epsp,
        packed["w_dec1"], packed["b_dec1"],
        packed["w_dec2"], packed["b_dec2"],
    )

    def make_call(single_buffer_weights):
        if single_buffer_weights and hasattr(pl, "Buffered"):
            def resident(shape):
                # Constant block index -> weight DMA'd once, stays resident;
                # single-buffered so it doesn't pay the default 2x VMEM.
                return pl.BlockSpec(shape, lambda i: (0, 0),
                                    pipeline_mode=pl.Buffered(buffer_count=1))
        else:
            def resident(shape):
                return pl.BlockSpec(shape, lambda i: (0, 0))

        def streamed(cols):
            return pl.BlockSpec((tile_b, cols), lambda i: (i, 0))

        return pl.pallas_call(
            functools.partial(vae_forward_kernel, latent_pad=Lp,
                              bf16_epilogue=bf16_epilogue),
            out_shape=jax.ShapeDtypeStruct((Bp, Dp), jnp.float32),
            grid=grid,
            in_specs=[
                streamed(Dp),                       # x tile
                resident((Dp, Hp)), resident((1, Hp)),
                resident((Hp, 2 * Lp)), resident((1, 2 * Lp)),
                streamed(Lp),                       # eps tile
                resident((Lp, Hp)), resident((1, Hp)),
                resident((Hp, Dp)), resident((1, Dp)),
            ],
            out_specs=streamed(Dp),
            compiler_params=pltpu.CompilerParams(
                dimension_semantics=("parallel",),  # megacore-shard batch steps
                vmem_limit_bytes=vmem_limit,
            ),
            cost_estimate=pl.CostEstimate(
                flops=flops,
                transcendentals=transcendentals,
                bytes_accessed=bytes_accessed,
            ),
        )

    try:
        out = make_call(True)(*args)
    except Exception:
        # Fallback if this JAX/Mosaic build rejects pipeline_mode=pl.Buffered(1):
        # default double-buffered weights are correct, just a larger VMEM footprint.
        out = make_call(False)(*args)

    return out[:B, :D]   # strip batch + lane padding


def vae_reference(x, params, eps):
    """Pure-JAX f32 reference matching the PyTorch module semantics."""
    h = jnp.maximum(x @ params["w_enc1"] + params["b_enc1"], 0.0)
    mu = h @ params["w_mu"] + params["b_mu"]
    logvar = h @ params["w_lv"] + params["b_lv"]
    z = mu + jnp.exp(0.5 * logvar) * eps
    hd = jnp.maximum(z @ params["w_dec1"] + params["b_dec1"], 0.0)
    return jax.nn.sigmoid(hd @ params["w_dec2"] + params["b_dec2"])


if __name__ == "__main__":
    data_size, hidden_size, latent_size = 64, 32, 16
    batch = 256          # >= 128 so the batch grid + weight residency do real work

    key = jax.random.PRNGKey(0)
    k_params, k_x, k_eps = jax.random.split(key, 3)

    params = init_params(k_params, data_size, hidden_size, latent_size)
    packed = pack_params(params)
    Lp = packed["w_dec1"].shape[0]

    x = jax.random.uniform(k_x, (batch, data_size), jnp.float32)      # [0,1]-style data
    # Draw eps directly at the lane-padded width (no wrapper pad / over-fetch);
    # the padded-lane noise is annihilated by the zero-padded decoder rows.
    eps_p = jax.random.normal(k_eps, (batch, Lp), jnp.float32)

    recon = vae_forward(x, packed, eps_p)
    jax.block_until_ready(recon)

    assert recon.shape == (batch, data_size)
    assert bool(jnp.all(jnp.isfinite(recon)))
    # approx reciprocal may overshoot the open (0,1) sigmoid range by ~1e-4
    assert bool(jnp.all((recon >= -1e-3) & (recon <= 1.0 + 1e-3)))

    # Correctness vs f32 reference (bf16 matmul path -> loose tolerance).
    ref = vae_reference(x, params, eps_p[:, :latent_size])
    max_err = float(jnp.max(jnp.abs(recon - ref)))
    assert max_err < 5e-2, f"max abs error vs reference too large: {max_err}"

    print("KERNEL_OK")
</pallas_src>

<mosaic_0001>
module attributes {stable_mosaic.version = 11 : i64} {
  func.func @vae_forward_kernel(%arg0: i32, %arg1: memref<256x128xf32, #tpu.memory_space<vmem>>, %arg2: memref<128x128xbf16, #tpu.memory_space<vmem>>, %arg3: memref<1x128xf32, #tpu.memory_space<vmem>>, %arg4: memref<128x256xbf16, #tpu.memory_space<vmem>>, %arg5: memref<1x256xf32, #tpu.memory_space<vmem>>, %arg6: memref<256x128xf32, #tpu.memory_space<vmem>>, %arg7: memref<128x128xbf16, #tpu.memory_space<vmem>>, %arg8: memref<1x128xf32, #tpu.memory_space<vmem>>, %arg9: memref<128x128xbf16, #tpu.memory_space<vmem>>, %arg10: memref<1x128xf32, #tpu.memory_space<vmem>>, %arg11: memref<256x128xf32, #tpu.memory_space<vmem>>) attributes {dimension_semantics = [#tpu.dimension_semantics<parallel>], iteration_bounds = array<i64: 1>, scalar_prefetch = 0 : i64, scratch_operands = 0 : i64, tpu.core_type = #tpu.core_type<tc>, window_params = [{transform_indices = @transform_0, window_bounds = array<i64: 256, 128>}, {pipeline_mode = #tpu.pipeline_mode<synchronous>, transform_indices = @transform_1, window_bounds = array<i64: 128, 128>}, {pipeline_mode = #tpu.pipeline_mode<synchronous>, transform_indices = @transform_2, window_bounds = array<i64: 1, 128>}, {pipeline_mode = #tpu.pipeline_mode<synchronous>, transform_indices = @transform_3, window_bounds = array<i64: 128, 256>}, {pipeline_mode = #tpu.pipeline_mode<synchronous>, transform_indices = @transform_4, window_bounds = array<i64: 1, 256>}, {transform_indices = @transform_5, window_bounds = array<i64: 256, 128>}, {pipeline_mode = #tpu.pipeline_mode<synchronous>, transform_indices = @transform_6, window_bounds = array<i64: 128, 128>}, {pipeline_mode = #tpu.pipeline_mode<synchronous>, transform_indices = @transform_7, window_bounds = array<i64: 1, 128>}, {pipeline_mode = #tpu.pipeline_mode<synchronous>, transform_indices = @transform_8, window_bounds = array<i64: 128, 128>}, {pipeline_mode = #tpu.pipeline_mode<synchronous>, transform_indices = @transform_9, window_bounds = array<i64: 1, 128>}, {transform_indices = @transform_10, window_bounds = array<i64: 256, 128>}]} {
    %c0 = arith.constant 0 : index
    %c0_0 = arith.constant 0 : index
    %0 = vector.load %arg1[%c0, %c0_0] : memref<256x128xf32, #tpu.memory_space<vmem>>, vector<256x128xf32>
    %1 = arith.truncf %0 : vector<256x128xf32> to vector<256x128xbf16>
    %c0_1 = arith.constant 0 : index
    %c0_2 = arith.constant 0 : index
    %2 = vector.load %arg2[%c0_1, %c0_2] : memref<128x128xbf16, #tpu.memory_space<vmem>>, vector<128x128xbf16>
    %cst = arith.constant dense<0.000000e+00> : vector<256x128xf32>
    %3 = tpu.matmul %1, %2, %cst {dimension_numbers = #tpu.dot_dimension_numbers<[1], [0], [0], [1], [0, 0, 1, 1], [], []>} : vector<256x128xbf16>, vector<128x128xbf16>, vector<256x128xf32> -> vector<256x128xf32>
    %c0_3 = arith.constant 0 : index
    %c0_4 = arith.constant 0 : index
    %4 = vector.load %arg3[%c0_3, %c0_4] : memref<1x128xf32, #tpu.memory_space<vmem>>, vector<1x128xf32>
    %5 = vector.broadcast %4 : vector<1x128xf32> to vector<256x128xf32>
    %6 = arith.addf %3, %5 : vector<256x128xf32>
    %cst_5 = arith.constant 0.000000e+00 : f32
    %7 = vector.broadcast %cst_5 : f32 to vector<256x128xf32>
    %8 = arith.maximumf %6, %7 : vector<256x128xf32>
    %9 = arith.truncf %8 : vector<256x128xf32> to vector<256x128xbf16>
    %c0_6 = arith.constant 0 : index
    %c0_7 = arith.constant 0 : index
    %10 = vector.load %arg4[%c0_6, %c0_7] : memref<128x256xbf16, #tpu.memory_space<vmem>>, vector<128x256xbf16>
    %cst_8 = arith.constant dense<0.000000e+00> : vector<256x256xf32>
    %11 = tpu.matmul %9, %10, %cst_8 {dimension_numbers = #tpu.dot_dimension_numbers<[1], [0], [0], [1], [0, 0, 1, 1], [], []>} : vector<256x128xbf16>, vector<128x256xbf16>, vector<256x256xf32> -> vector<256x256xf32>
    %c0_9 = arith.constant 0 : index
    %c0_10 = arith.constant 0 : index
    %12 = vector.load %arg5[%c0_9, %c0_10] : memref<1x256xf32, #tpu.memory_space<vmem>>, vector<1x256xf32>
    %13 = vector.broadcast %12 : vector<1x256xf32> to vector<256x256xf32>
    %14 = arith.addf %11, %13 : vector<256x256xf32>
    %15 = vector.extract_strided_slice %14 {offsets = [0, 0], sizes = [256, 128], strides = [1, 1]} : vector<256x256xf32> to vector<256x128xf32>
    %16 = vector.extract_strided_slice %14 {offsets = [0, 128], sizes = [256, 128], strides = [1, 1]} : vector<256x256xf32> to vector<256x128xf32>
    %cst_11 = arith.constant 5.000000e-01 : f32
    %17 = vector.broadcast %cst_11 : f32 to vector<256x128xf32>
    %18 = arith.mulf %17, %16 : vector<256x128xf32>
    %19 = math.exp %18 : vector<256x128xf32>
    %c0_12 = arith.constant 0 : index
    %c0_13 = arith.constant 0 : index
    %20 = vector.load %arg6[%c0_12, %c0_13] : memref<256x128xf32, #tpu.memory_space<vmem>>, vector<256x128xf32>
    %21 = arith.mulf %19, %20 : vector<256x128xf32>
    %22 = arith.addf %15, %21 : vector<256x128xf32>
    %23 = arith.truncf %22 : vector<256x128xf32> to vector<256x128xbf16>
    %c0_14 = arith.constant 0 : index
    %c0_15 = arith.constant 0 : index
    %24 = vector.load %arg7[%c0_14, %c0_15] : memref<128x128xbf16, #tpu.memory_space<vmem>>, vector<128x128xbf16>
    %cst_16 = arith.constant dense<0.000000e+00> : vector<256x128xf32>
    %25 = tpu.matmul %23, %24, %cst_16 {dimension_numbers = #tpu.dot_dimension_numbers<[1], [0], [0], [1], [0, 0, 1, 1], [], []>} : vector<256x128xbf16>, vector<128x128xbf16>, vector<256x128xf32> -> vector<256x128xf32>
    %c0_17 = arith.constant 0 : index
    %c0_18 = arith.constant 0 : index
    %26 = vector.load %arg8[%c0_17, %c0_18] : memref<1x128xf32, #tpu.memory_space<vmem>>, vector<1x128xf32>
    %27 = vector.broadcast %26 : vector<1x128xf32> to vector<256x128xf32>
    %28 = arith.addf %25, %27 : vector<256x128xf32>
    %cst_19 = arith.constant 0.000000e+00 : f32
    %29 = vector.broadcast %cst_19 : f32 to vector<256x128xf32>
    %30 = arith.maximumf %28, %29 : vector<256x128xf32>
    %31 = arith.truncf %30 : vector<256x128xf32> to vector<256x128xbf16>
    %c0_20 = arith.constant 0 : index
    %c0_21 = arith.constant 0 : index
    %32 = vector.load %arg9[%c0_20, %c0_21] : memref<128x128xbf16, #tpu.memory_space<vmem>>, vector<128x128xbf16>
    %cst_22 = arith.constant dense<0.000000e+00> : vector<256x128xf32>
    %33 = tpu.matmul %31, %32, %cst_22 {dimension_numbers = #tpu.dot_dimension_numbers<[1], [0], [0], [1], [0, 0, 1, 1], [], []>} : vector<256x128xbf16>, vector<128x128xbf16>, vector<256x128xf32> -> vector<256x128xf32>
    %c0_23 = arith.constant 0 : index
    %c0_24 = arith.constant 0 : index
    %34 = vector.load %arg10[%c0_23, %c0_24] : memref<1x128xf32, #tpu.memory_space<vmem>>, vector<1x128xf32>
    %35 = vector.broadcast %34 : vector<1x128xf32> to vector<256x128xf32>
    %36 = arith.addf %33, %35 : vector<256x128xf32>
    %cst_25 = arith.constant 0.000000e+00 : f32
    %37 = vector.broadcast %cst_25 : f32 to vector<256x128xf32>
    %38 = arith.subf %37, %36 : vector<256x128xf32>
    %39 = math.exp %38 : vector<256x128xf32>
    %cst_26 = arith.constant 1.000000e+00 : f32
    %40 = vector.broadcast %cst_26 : f32 to vector<256x128xf32>
    %41 = arith.addf %40, %39 : vector<256x128xf32>
    %42 = tpu.reciprocal %41 {approx = true} : vector<256x128xf32> -> vector<256x128xf32>
    %c0_27 = arith.constant 0 : index
    %c0_28 = arith.constant 0 : index
    %43 = vector.load %arg11[%c0_27, %c0_28] : memref<256x128xf32, #tpu.memory_space<vmem>>, vector<256x128xf32>
    tpu.vector_store %arg11[%c0_27, %c0_28], %42 {strides = array<i32>} : memref<256x128xf32, #tpu.memory_space<vmem>>, vector<256x128xf32>,
    return
  }
  func.func @transform_0(%arg0: i32) -> (i32, i32) {
    %c0_i32 = arith.constant 0 : i32
    %c0_i32_0 = arith.constant 0 : i32
    return %arg0, %c0_i32 : i32, i32
  }
  func.func @transform_1(%arg0: i32) -> (i32, i32) {
    %c0_i32 = arith.constant 0 : i32
    %c0_i32_0 = arith.constant 0 : i32
    %c0_i32_1 = arith.constant 0 : i32
    return %c0_i32, %c0_i32_0 : i32, i32
  }
  func.func @transform_2(%arg0: i32) -> (i32, i32) {
    %c0_i32 = arith.constant 0 : i32
    %c0_i32_0 = arith.constant 0 : i32
    %c0_i32_1 = arith.constant 0 : i32
    return %c0_i32, %c0_i32_0 : i32, i32
  }
  func.func @transform_3(%arg0: i32) -> (i32, i32) {
    %c0_i32 = arith.constant 0 : i32
    %c0_i32_0 = arith.constant 0 : i32
    %c0_i32_1 = arith.constant 0 : i32
    return %c0_i32, %c0_i32_0 : i32, i32
  }
  func.func @transform_4(%arg0: i32) -> (i32, i32) {
    %c0_i32 = arith.constant 0 : i32
    %c0_i32_0 = arith.constant 0 : i32
    %c0_i32_1 = arith.constant 0 : i32
    return %c0_i32, %c0_i32_0 : i32, i32
  }
  func.func @transform_5(%arg0: i32) -> (i32, i32) {
    %c0_i32 = arith.constant 0 : i32
    %c0_i32_0 = arith.constant 0 : i32
    return %arg0, %c0_i32 : i32, i32
  }
  func.func @transform_6(%arg0: i32) -> (i32, i32) {
    %c0_i32 = arith.constant 0 : i32
    %c0_i32_0 = arith.constant 0 : i32
    %c0_i32_1 = arith.constant 0 : i32
    return %c0_i32, %c0_i32_0 : i32, i32
  }
  func.func @transform_7(%arg0: i32) -> (i32, i32) {
    %c0_i32 = arith.constant 0 : i32
    %c0_i32_0 = arith.constant 0 : i32
    %c0_i32_1 = arith.constant 0 : i32
    return %c0_i32, %c0_i32_0 : i32, i32
  }
  func.func @transform_8(%arg0: i32) -> (i32, i32) {
    %c0_i32 = arith.constant 0 : i32
    %c0_i32_0 = arith.constant 0 : i32
    %c0_i32_1 = arith.constant 0 : i32
    return %c0_i32, %c0_i32_0 : i32, i32
  }
  func.func @transform_9(%arg0: i32) -> (i32, i32) {
    %c0_i32 = arith.constant 0 : i32
    %c0_i32_0 = arith.constant 0 : i32
    %c0_i32_1 = arith.constant 0 : i32
    return %c0_i32, %c0_i32_0 : i32, i32
  }
  func.func @transform_10(%arg0: i32) -> (i32, i32) {
    %c0_i32 = arith.constant 0 : i32
    %c0_i32_0 = arith.constant 0 : i32
    return %arg0, %c0_i32 : i32, i32
  }
}

module attributes {stable_mosaic.version = 11 : i64} {
  func.func @vae_forward_kernel(%arg0: i32, %arg1: memref<256x128xf32, #tpu.memory_space<vmem>>, %arg2: memref<128x128xbf16, #tpu.memory_space<vmem>>, %arg3: memref<1x128xf32, #tpu.memory_space<vmem>>, %arg4: memref<128x256xbf16, #tpu.memory_space<vmem>>, %arg5: memref<1x256xf32, #tpu.memory_space<vmem>>, %arg6: memref<256x128xf32, #tpu.memory_space<vmem>>, %arg7: memref<128x128xbf16, #tpu.memory_space<vmem>>, %arg8: memref<1x128xf32, #tpu.memory_space<vmem>>, %arg9: memref<128x128xbf16, #tpu.memory_space<vmem>>, %arg10: memref<1x128xf32, #tpu.memory_space<vmem>>, %arg11: memref<256x128xf32, #tpu.memory_space<vmem>>) attributes {dimension_semantics = [#tpu.dimension_semantics<parallel>], iteration_bounds = array<i64: 1>, scalar_prefetch = 0 : i64, scratch_operands = 0 : i64, tpu.core_type = #tpu.core_type<tc>, window_params = [{transform_indices = @transform_0, window_bounds = array<i64: 256, 128>}, {pipeline_mode = #tpu.pipeline_mode<synchronous>, transform_indices = @transform_1, window_bounds = array<i64: 128, 128>}, {pipeline_mode = #tpu.pipeline_mode<synchronous>, transform_indices = @transform_2, window_bounds = array<i64: 1, 128>}, {pipeline_mode = #tpu.pipeline_mode<synchronous>, transform_indices = @transform_3, window_bounds = array<i64: 128, 256>}, {pipeline_mode = #tpu.pipeline_mode<synchronous>, transform_indices = @transform_4, window_bounds = array<i64: 1, 256>}, {transform_indices = @transform_5, window_bounds = array<i64: 256, 128>}, {pipeline_mode = #tpu.pipeline_mode<synchronous>, transform_indices = @transform_6, window_bounds = array<i64: 128, 128>}, {pipeline_mode = #tpu.pipeline_mode<synchronous>, transform_indices = @transform_7, window_bounds = array<i64: 1, 128>}, {pipeline_mode = #tpu.pipeline_mode<synchronous>, transform_indices = @transform_8, window_bounds = array<i64: 128, 128>}, {pipeline_mode = #tpu.pipeline_mode<synchronous>, transform_indices = @transform_9, window_bounds = array<i64: 1, 128>}, {transform_indices = @transform_10, window_bounds = array<i64: 256, 128>}]} {
    %c0 = arith.constant 0 : index
    %c0_0 = arith.constant 0 : index
    %0 = vector.load %arg1[%c0, %c0_0] : memref<256x128xf32, #tpu.memory_space<vmem>>, vector<256x128xf32>
    %1 = arith.truncf %0 : vector<256x128xf32> to vector<256x128xbf16>
    %c0_1 = arith.constant 0 : index
    %c0_2 = arith.constant 0 : index
    %2 = vector.load %arg2[%c0_1, %c0_2] : memref<128x128xbf16, #tpu.memory_space<vmem>>, vector<128x128xbf16>
    %cst = arith.constant dense<0.000000e+00> : vector<256x128xf32>
    %3 = tpu.matmul %1, %2, %cst {dimension_numbers = #tpu.dot_dimension_numbers<[1], [0], [0], [1], [0, 0, 1, 1], [], []>} : vector<256x128xbf16>, vector<128x128xbf16>, vector<256x128xf32> -> vector<256x128xf32>
    %c0_3 = arith.constant 0 : index
    %c0_4 = arith.constant 0 : index
    %4 = vector.load %arg3[%c0_3, %c0_4] : memref<1x128xf32, #tpu.memory_space<vmem>>, vector<1x128xf32>
    %5 = vector.broadcast %4 : vector<1x128xf32> to vector<256x128xf32>
    %6 = arith.addf %3, %5 : vector<256x128xf32>
    %cst_5 = arith.constant 0.000000e+00 : f32
    %7 = vector.broadcast %cst_5 : f32 to vector<256x128xf32>
    %8 = arith.maximumf %6, %7 : vector<256x128xf32>
    %9 = arith.truncf %8 : vector<256x128xf32> to vector<256x128xbf16>
    %c0_6 = arith.constant 0 : index
    %c0_7 = arith.constant 0 : index
    %10 = vector.load %arg4[%c0_6, %c0_7] : memref<128x256xbf16, #tpu.memory_space<vmem>>, vector<128x256xbf16>
    %cst_8 = arith.constant dense<0.000000e+00> : vector<256x256xf32>
    %11 = tpu.matmul %9, %10, %cst_8 {dimension_numbers = #tpu.dot_dimension_numbers<[1], [0], [0], [1], [0, 0, 1, 1], [], []>} : vector<256x128xbf16>, vector<128x256xbf16>, vector<256x256xf32> -> vector<256x256xf32>
    %c0_9 = arith.constant 0 : index
    %c0_10 = arith.constant 0 : index
    %12 = vector.load %arg5[%c0_9, %c0_10] : memref<1x256xf32, #tpu.memory_space<vmem>>, vector<1x256xf32>
    %13 = vector.broadcast %12 : vector<1x256xf32> to vector<256x256xf32>
    %14 = arith.addf %11, %13 : vector<256x256xf32>
    %15 = vector.extract_strided_slice %14 {offsets = [0, 0], sizes = [256, 128], strides = [1, 1]} : vector<256x256xf32> to vector<256x128xf32>
    %16 = vector.extract_strided_slice %14 {offsets = [0, 128], sizes = [256, 128], strides = [1, 1]} : vector<256x256xf32> to vector<256x128xf32>
    %cst_11 = arith.constant 5.000000e-01 : f32
    %17 = vector.broadcast %cst_11 : f32 to vector<256x128xf32>
    %18 = arith.mulf %17, %16 : vector<256x128xf32>
    %19 = math.exp %18 : vector<256x128xf32>
    %c0_12 = arith.constant 0 : index
    %c0_13 = arith.constant 0 : index
    %20 = vector.load %arg6[%c0_12, %c0_13] : memref<256x128xf32, #tpu.memory_space<vmem>>, vector<256x128xf32>
    %21 = arith.mulf %19, %20 : vector<256x128xf32>
    %22 = arith.addf %15, %21 : vector<256x128xf32>
    %23 = arith.truncf %22 : vector<256x128xf32> to vector<256x128xbf16>
    %c0_14 = arith.constant 0 : index
    %c0_15 = arith.constant 0 : index
    %24 = vector.load %arg7[%c0_14, %c0_15] : memref<128x128xbf16, #tpu.memory_space<vmem>>, vector<128x128xbf16>
    %cst_16 = arith.constant dense<0.000000e+00> : vector<256x128xf32>
    %25 = tpu.matmul %23, %24, %cst_16 {dimension_numbers = #tpu.dot_dimension_numbers<[1], [0], [0], [1], [0, 0, 1, 1], [], []>} : vector<256x128xbf16>, vector<128x128xbf16>, vector<256x128xf32> -> vector<256x128xf32>
    %c0_17 = arith.constant 0 : index
    %c0_18 = arith.constant 0 : index
    %26 = vector.load %arg8[%c0_17, %c0_18] : memref<1x128xf32, #tpu.memory_space<vmem>>, vector<1x128xf32>
    %27 = vector.broadcast %26 : vector<1x128xf32> to vector<256x128xf32>
    %28 = arith.addf %25, %27 : vector<256x128xf32>
    %cst_19 = arith.constant 0.000000e+00 : f32
    %29 = vector.broadcast %cst_19 : f32 to vector<256x128xf32>
    %30 = arith.maximumf %28, %29 : vector<256x128xf32>
    %31 = arith.truncf %30 : vector<256x128xf32> to vector<256x128xbf16>
    %c0_20 = arith.constant 0 : index
    %c0_21 = arith.constant 0 : index
    %32 = vector.load %arg9[%c0_20, %c0_21] : memref<128x128xbf16, #tpu.memory_space<vmem>>, vector<128x128xbf16>
    %cst_22 = arith.constant dense<0.000000e+00> : vector<256x128xf32>
    %33 = tpu.matmul %31, %32, %cst_22 {dimension_numbers = #tpu.dot_dimension_numbers<[1], [0], [0], [1], [0, 0, 1, 1], [], []>} : vector<256x128xbf16>, vector<128x128xbf16>, vector<256x128xf32> -> vector<256x128xf32>
    %c0_23 = arith.constant 0 : index
    %c0_24 = arith.constant 0 : index
    %34 = vector.load %arg10[%c0_23, %c0_24] : memref<1x128xf32, #tpu.memory_space<vmem>>, vector<1x128xf32>
    %35 = vector.broadcast %34 : vector<1x128xf32> to vector<256x128xf32>
    %36 = arith.addf %33, %35 : vector<256x128xf32>
    %cst_25 = arith.constant 0.000000e+00 : f32
    %37 = vector.broadcast %cst_25 : f32 to vector<256x128xf32>
    %38 = arith.subf %37, %36 : vector<256x128xf32>
    %39 = math.exp %38 : vector<256x128xf32>
    %cst_26 = arith.constant 1.000000e+00 : f32
    %40 = vector.broadcast %cst_26 : f32 to vector<256x128xf32>
    %41 = arith.addf %40, %39 : vector<256x128xf32>
    %42 = tpu.reciprocal %41 {approx = true} : vector<256x128xf32> -> vector<256x128xf32>
    %c0_27 = arith.constant 0 : index
    %c0_28 = arith.constant 0 : index
    %43 = vector.load %arg11[%c0_27, %c0_28] : memref<256x128xf32, #tpu.memory_space<vmem>>, vector<256x128xf32>
    tpu.vector_store %arg11[%c0_27, %c0_28], %42 {strides = array<i32>} : memref<256x128xf32, #tpu.memory_space<vmem>>, vector<256x128xf32>,
    return
  }
  func.func @transform_0(%arg0: i32) -> (i32, i32) {
    %c0_i32 = arith.constant 0 : i32
    %c0_i32_0 = arith.constant 0 : i32
    return %arg0, %c0_i32 : i32, i32
  }
  func.func @transform_1(%arg0: i32) -> (i32, i32) {
    %c0_i32 = arith.constant 0 : i32
    %c0_i32_0 = arith.constant 0 : i32
    %c0_i32_1 = arith.constant 0 : i32
    return %c0_i32, %c0_i32_0 : i32, i32
  }
  func.func @transform_2(%arg0: i32) -> (i32, i32) {
    %c0_i32 = arith.constant 0 : i32
    %c0_i32_0 = arith.constant 0 : i32
    %c0_i32_1 = arith.constant 0 : i32
    return %c0_i32, %c0_i32_0 : i32, i32
  }
  func.func @transform_3(%arg0: i32) -> (i32, i32) {
    %c0_i32 = arith.constant 0 : i32
    %c0_i32_0 = arith.constant 0 : i32
    %c0_i32_1 = arith.constant 0 : i32
    return %c0_i32, %c0_i32_0 : i32, i32
  }
  func.func @transform_4(%arg0: i32) -> (i32, i32) {
    %c0_i32 = arith.constant 0 : i32
    %c0_i32_0 = arith.constant 0 : i32
    %c0_i32_1 = arith.constant 0 : i32
    return %c0_i32, %c0_i32_0 : i32, i32
  }
  func.func @transform_5(%arg0: i32) -> (i32, i32) {
    %c0_i32 = arith.constant 0 : i32
    %c0_i32_0 = arith.constant 0 : i32
    return %arg0, %c0_i32 : i32, i32
  }
  func.func @transform_6(%arg0: i32) -> (i32, i32) {
    %c0_i32 = arith.constant 0 : i32
    %c0_i32_0 = arith.constant 0 : i32
    %c0_i32_1 = arith.constant 0 : i32
    return %c0_i32, %c0_i32_0 : i32, i32
  }
  func.func @transform_7(%arg0: i32) -> (i32, i32) {
    %c0_i32 = arith.constant 0 : i32
    %c0_i32_0 = arith.constant 0 : i32
    %c0_i32_1 = arith.constant 0 : i32
    return %c0_i32, %c0_i32_0 : i32, i32
  }
  func.func @transform_8(%arg0: i32) -> (i32, i32) {
    %c0_i32 = arith.constant 0 : i32
    %c0_i32_0 = arith.constant 0 : i32
    %c0_i32_1 = arith.constant 0 : i32
    return %c0_i32, %c0_i32_0 : i32, i32
  }
  func.func @transform_9(%arg0: i32) -> (i32, i32) {
    %c0_i32 = arith.constant 0 : i32
    %c0_i32_0 = arith.constant 0 : i32
    %c0_i32_1 = arith.constant 0 : i32
    return %c0_i32, %c0_i32_0 : i32, i32
  }
  func.func @transform_10(%arg0: i32) -> (i32, i32) {
    %c0_i32 = arith.constant 0 : i32
    %c0_i32_0 = arith.constant 0 : i32
    return %arg0, %c0_i32 : i32, i32
  }
}

</mosaic_0001>

<bundles_post_ra>
// kernel: tpu_custom_call.1
= control target key start
LH: loop header
LB: loop body
LE: loop exit
PB: predicated region body
PF: predicated region fallthrough
CT: control target
= control target key end

     0   :  { %15 = vsyncpa [#allocation3], 0  ;;  %s2780_s0 = inlined_call_operand.hbm [shape: f32[256,128], index: 0, kind: input, shape index: {}]   ;;  %s2781_s1 = inlined_call_operand.hbm [shape: bf16[128,128], index: 1, kind: input, shape index: {}]   ;;  %s2782_s2 = inlined_call_operand.vmem [shape: f32[1,128], index: 2, kind: input, shape index: {}]   ;;  %s2783_s3 = inlined_call_operand.hbm [shape: bf16[128,256], index: 3, kind: input, shape index: {}]   ;;  %s2784_s4 = inlined_call_operand.vmem [shape: f32[1,256], index: 4, kind: input, shape index: {}]   ;;  %s2785_s5 = inlined_call_operand.hbm [shape: f32[256,128], index: 5, kind: input, shape index: {}]   ;;  %s2786_s6 = inlined_call_operand.hbm [shape: bf16[128,128], index: 6, kind: input, shape index: {}]   ;;  %s2787_s7 = inlined_call_operand.vmem [shape: f32[1,128], index: 7, kind: input, shape index: {}]   ;;  %s2788_s8 = inlined_call_operand.hbm [shape: bf16[128,128], index: 8, kind: input, shape index: {}]   ;;  %s2789_s9 = inlined_call_operand.vmem [shape: f32[1,128], index: 9, kind: input, shape index: {}]   ;;  %s2790_s10 = inlined_call_operand.hbm [shape: f32[256,128], index: 10, kind: output, shape index: {}]  }
   0x1   :  { %16 = vsyncpa [#allocation6], 0 }
   0x2   :  { %17 = vsyncpa [#allocation9], 0 }
   0x3   :  { %18 = vsyncpa [#allocation12], 0 }
   0x4   :  { %19 = vsyncpa [#allocation4], 0  ;;  %s2371_s13 = smov [#allocation5]   ;;  %s2207_s17 = scalar_lea.hbm %s2781_s1, 1024 }
   0x5   :  { %s37_s14 = sshll.u32 %s2371_s13, 4  ;;  %p2208_p0 = scmp.ne.s32.totalorder %s2781_s1, %s2207_s17  ;;  %s38_s14 = int_to_ptr.vmem [resolvable:$true] %s37_s14 }
   0x6   :  { %p2211_p1 = scmp.lt.u32.totalorder %s2207_s17, %s2781_s1 }
   0x8   :  { %p2213_p2 = pnand %p2211_p1, %p2208_p0 }
   0xa   :  { %2216 = shalt.err (!%p2213_p2)
}
   0xb   :  { %s2217_s22 = scalar_lea.vmem %s38_s14, 1024  ;;  %p2222_p4 = scmp.lt.s32.totalorder %s38_s14, %s38_s14 }
   0xc   :  { %p2218_p3 = scmp.ne.s32.totalorder %s38_s14, %s2217_s22  ;;  %p2223_p5 = scmp.lt.s32.totalorder %s2217_s22, %s2217_s22 }
   0xe   :  { %p2224_p6 = por %p2223_p5, %p2222_p4 }
  0x10   :  { %p2225_p7 = pnand %p2224_p6, %p2218_p3 }
  0x12   :  { %2228 = shalt.err (!%p2225_p7)
}
  0x13   :  { %s2372_s23 = smov 64   ;;  %s2373_s24 = smov 4  }
  0x14   :  { %43 = dma.hbm_to_vmem [thread:$0]  %s2781_s1, 1024, %s38_s14, [#allocation6], %s2372_s23, %s2372_s23, %s2373_s24  }
  0x15   :  { %s2374_s27 = smov [#allocation8]   ;;  %s2375_s29 = smov [#allocation2]  }
  0x16   :  { %s65_s28 = sshll.u32 %s2374_s27, 4  ;;  %s25_s30 = sshll.u32 %s2375_s29, 4  ;;  %s66_s28 = int_to_ptr.vmem [resolvable:$true] %s65_s28  ;;  %s26_s30 = int_to_ptr.vmem [resolvable:$true] %s25_s30 }
  0x17   :  { %s2229_s13 = scalar_lea.hbm %s2785_s5, 4096 }
  0x18   :  { %p2230_p8 = scmp.ne.s32.totalorder %s2785_s5, %s2229_s13  ;;  %p2233_p9 = scmp.lt.u32.totalorder %s2229_s13, %s2785_s5 }
  0x1a   :  { %p2235_p10 = pnand %p2233_p9, %p2230_p8 }
  0x1c   :  { %2238 = shalt.err (!%p2235_p10)
}
  0x1d   :  { %s2239_s1 = scalar_lea.vmem %s66_s28, 4096  ;;  %p2244_p12 = scmp.lt.s32.totalorder %s66_s28, %s66_s28 }
  0x1e   :  { %p2240_p11 = scmp.ne.s32.totalorder %s66_s28, %s2239_s1  ;;  %p2245_p13 = scmp.lt.s32.totalorder %s2239_s1, %s2239_s1 }
  0x20   :  { %p2246_p0 = por %p2245_p13, %p2244_p12 }
  0x22   :  { %p2247_p1 = pnand %p2246_p0, %p2240_p11 }
  0x24   :  { %2250 = shalt.err (!%p2247_p1)
}
  0x25   :  { %s2376_s14 = smov 128   ;;  %s2377_s19 = smov 8  }
  0x26   :  { %71 = dma.hbm_to_vmem [thread:$0]  %s2785_s5, 4096, %s66_s28, [#allocation9], %s2376_s14, %s2376_s14, %s2377_s19  }
  0x27   :  { %s2251_s26 = scalar_lea.hbm %s2780_s0, 4096 }
  0x28   :  { %p2252_p2 = scmp.ne.s32.totalorder %s2780_s0, %s2251_s26  ;;  %p2255_p3 = scmp.lt.u32.totalorder %s2251_s26, %s2780_s0 }
  0x2a   :  { %p2257_p4 = pnand %p2255_p3, %p2252_p2 }
  0x2c   :  { %2260 = shalt.err (!%p2257_p4)
}
  0x2d   :  { %s2261_s13 = scalar_lea.vmem %s26_s30, 4096  ;;  %p2266_p6 = scmp.lt.s32.totalorder %s26_s30, %s26_s30 }
  0x2e   :  { %p2262_p5 = scmp.ne.s32.totalorder %s26_s30, %s2261_s13  ;;  %p2267_p7 = scmp.lt.s32.totalorder %s2261_s13, %s2261_s13 }
  0x30   :  { %p2268_p8 = por %p2267_p7, %p2266_p6 }
  0x32   :  { %p2269_p9 = pnand %p2268_p8, %p2262_p5 }
  0x34   :  { %2272 = shalt.err (!%p2269_p9)
}
  0x35   :  { %31 = dma.hbm_to_vmem [thread:$0]  %s2780_s0, 4096, %s26_s30, [#allocation3], %s2376_s14, %s2376_s14, %s2377_s19  }
  0x36   :  { %s2378_s15 = smov [#allocation7]   ;;  %s2379_s17 = smov [#allocation10]  }
  0x37   :  { %s51_s16 = sshll.u32 %s2378_s15, 4  ;;  %s77_s18 = sshll.u32 %s2379_s17, 4  ;;  %s52_s16 = int_to_ptr.vmem [resolvable:$true] %s51_s16  ;;  %s78_s18 = int_to_ptr.vmem [resolvable:$true] %s77_s18 }
  0x38   :  { %s2273_s21 = scalar_lea.hbm %s2783_s3, 2048 }
  0x39   :  { %p2274_p10 = scmp.ne.s32.totalorder %s2783_s3, %s2273_s21  ;;  %p2277_p11 = scmp.lt.u32.totalorder %s2273_s21, %s2783_s3 }
  0x3b   :  { %p2279_p12 = pnand %p2277_p11, %p2274_p10 }
  0x3d   :  { %2282 = shalt.err (!%p2279_p12)
}
  0x3e   :  { %s2283_s0 = scalar_lea.vmem %s52_s16, 2048  ;;  %p2288_p0 = scmp.lt.s32.totalorder %s52_s16, %s52_s16 }
  0x3f   :  { %p2284_p13 = scmp.ne.s32.totalorder %s52_s16, %s2283_s0  ;;  %p2289_p1 = scmp.lt.s32.totalorder %s2283_s0, %s2283_s0 }
  0x41   :  { %p2290_p2 = por %p2289_p1, %p2288_p0 }
  0x43   :  { %p2291_p3 = pnand %p2290_p2, %p2284_p13 }
  0x45   :  { %2294 = shalt.err (!%p2291_p3)
}
  0x46   :  { %57 = dma.hbm_to_vmem [thread:$0]  %s2783_s3, 2048, %s52_s16, [#allocation6], %s2376_s14, %s2376_s14, %s2377_s19  }
  0x47   :  { %s2295_s13 = scalar_lea.hbm %s2786_s6, 1024 }
  0x48   :  { %p2296_p4 = scmp.ne.s32.totalorder %s2786_s6, %s2295_s13  ;;  %p2299_p5 = scmp.lt.u32.totalorder %s2295_s13, %s2786_s6 }
  0x4a   :  { %p2301_p6 = pnand %p2299_p5, %p2296_p4 }
  0x4c   :  { %2304 = shalt.err (!%p2301_p6)
}
  0x4d   :  { %s2305_s1 = scalar_lea.vmem %s78_s18, 1024  ;;  %p2310_p8 = scmp.lt.s32.totalorder %s78_s18, %s78_s18 }
  0x4e   :  { %p2306_p7 = scmp.ne.s32.totalorder %s78_s18, %s2305_s1  ;;  %p2311_p9 = scmp.lt.s32.totalorder %s2305_s1, %s2305_s1 }
  0x50   :  { %p2312_p10 = por %p2311_p9, %p2310_p8 }
  0x52   :  { %p2313_p11 = pnand %p2312_p10, %p2306_p7 }
  0x54   :  { %2316 = shalt.err (!%p2313_p11)
}
  0x55   :  { %83 = dma.hbm_to_vmem [thread:$0]  %s2786_s6, 1024, %s78_s18, [#allocation9], %s2372_s23, %s2372_s23, %s2373_s24  }
  0x56   :  { %s2380_s20 = smov [#allocation11]   ;;  %s2317_s26 = scalar_lea.hbm %s2788_s8, 1024 }
  0x57   :  { %s91_s21 = sshll.u32 %s2380_s20, 4  ;;  %p2318_p12 = scmp.ne.s32.totalorder %s2788_s8, %s2317_s26  ;;  %s92_s21 = int_to_ptr.vmem [resolvable:$true] %s91_s21 }
  0x58   :  { %p2321_p13 = scmp.lt.u32.totalorder %s2317_s26, %s2788_s8 }
  0x5a   :  { %p2323_p0 = pnand %p2321_p13, %p2318_p12 }
  0x5c   :  { %2326 = shalt.err (!%p2323_p0)
}
  0x5d   :  { %s2327_s11 = scalar_lea.vmem %s92_s21, 1024  ;;  %p2332_p2 = scmp.lt.s32.totalorder %s92_s21, %s92_s21 }
  0x5e   :  { %p2328_p1 = scmp.ne.s32.totalorder %s92_s21, %s2327_s11  ;;  %p2333_p3 = scmp.lt.s32.totalorder %s2327_s11, %s2327_s11 }
  0x60   :  { %p2334_p4 = por %p2333_p3, %p2332_p2 }
  0x62   :  { %p2335_p5 = pnand %p2334_p4, %p2328_p1 }
  0x64   :  { %2338 = shalt.err (!%p2335_p5)
}
  0x65   :  { %97 = dma.hbm_to_vmem [thread:$0]  %s2788_s8, 1024, %s92_s21, [#allocation12], %s2372_s23, %s2372_s23, %s2373_s24  }
  0x66   :  { %2361 = dma.done.wait [#allocation3], 4096  }
  0x67   :  { %2362 = vsyncadd [#allocation3], 4294963200 }
  0x68   :  { %2363 = dma.done.wait [#allocation6], 3072  }
  0x69   :  { %2364 = vsyncadd [#allocation6], 4294964224 }
  0x6a   :  { %2365 = dma.done.wait [#allocation9], 5120  }
  0x6b   :  { %2366 = vsyncadd [#allocation9], 4294962176 }
  0x6c   :  { %2367 = dma.done.wait [#allocation12], 1024  }
  0x6d   :  { %2368 = vsyncadd [#allocation12], 4294966272  ;;  %v1967_v0 = vld [vmem:[#allocation5] sm:$0xff]   ;;  %v1968_v1 = vld [vmem:[#allocation5 + $0x8] sm:$0xff]  }
  0x6e   :  { %1795 = vmatprep.subr.bf16.mxu0 %v1967_v0  ;;  %1939 = vmatprep.subr.bf16.mxu1 %v1967_v0  ;;  %v1969_v2 = vld [vmem:[#allocation5 + $0x10] sm:$0xff]   ;;  %v1970_v3 = vld [vmem:[#allocation5 + $0x18] sm:$0xff]   ;;  %v119_v4 = vld [vmem:[#allocation2] sm:$0xff] }
  0x6f   :  { %1796 = vmatpush3.bf16.msra.mxu0 %v1967_v0  ;;  %1947 = vmatpush3.bf16.msra.mxu1 %v1967_v0  ;;  %v120_v5 = vld [vmem:[#allocation2 + $0x8] sm:$0xff]  ;;  %v1971_v7 = vld [vmem:[#allocation5 + $0x20] sm:$0xff]   ;;  %v1973_v12 = vld [vmem:[#allocation5 + $0x30] sm:$0xff]  }
  0x70   :  { %1797 = vmatprep.subr.bf16.mxu0 %v1968_v1  ;;  %1940 = vmatprep.subr.bf16.mxu1 %v1968_v1  ;;  %v151_v6 = vpack.c.bf16 %v120_v5, %v119_v4  ;;  %v135_v8 = vld [vmem:[#allocation2 + $0x80] sm:$0xff]  ;;  %v136_v9 = vld [vmem:[#allocation2 + $0x88] sm:$0xff]  ;;  %v1974_v13 = vld [vmem:[#allocation5 + $0x38] sm:$0xff]  }
  0x71   :  { %v159_v10 = vpack.c.bf16 %v136_v9, %v135_v8  ;;  %v1972_v11 = vld [vmem:[#allocation5 + $0x28] sm:$0xff]   ;;  %v121_v14 = vld [vmem:[#allocation2 + $0x10] sm:$0xff]  ;;  %v122_v15 = vld [vmem:[#allocation2 + $0x18] sm:$0xff]  ;;  %v2381_v8 = vmov 0  }
  0x72   :  { %1811 = vmatprep.mubr.bf16.mxu0 %v151_v6  ;;  %v123_v16 = vld [vmem:[#allocation2 + $0x20] sm:$0xff]  ;;  %v124_v17 = vld [vmem:[#allocation2 + $0x28] sm:$0xff]  ;;  %v137_v18 = vld [vmem:[#allocation2 + $0x90] sm:$0xff]  ;;  %v152_v23 = vpack.c.bf16 %v122_v15, %v121_v14 }
  0x73   :  { %1798 = vmatpush3.bf16.msra.mxu0 %v1968_v1  ;;  %1948 = vmatpush3.bf16.msra.mxu1 %v1968_v1  ;;  %v138_v19 = vld [vmem:[#allocation2 + $0x98] sm:$0xff]  ;;  %v139_v20 = vld [vmem:[#allocation2 + $0xa0] sm:$0xff]  ;;  %v140_v21 = vld [vmem:[#allocation2 + $0xa8] sm:$0xff]  ;;  %v153_v25 = vpack.c.bf16 %v124_v17, %v123_v16 }
  0x74   :  { %1799 = vmatprep.subr.bf16.mxu0 %v1969_v2  ;;  %1941 = vmatprep.subr.bf16.mxu1 %v1969_v2  ;;  %v1977_v22 = vld [vmem:[#allocation7 + $0x4] ss:$8 sps:$4 sm:$0xff]   ;;  %v1975_v24 = vld [vmem:[#allocation7] ss:$8 sps:$4 sm:$0xff]   ;;  %v160_v26 = vpack.c.bf16 %v138_v19, %v137_v18  ;;  %v1980_v27 = vld [vmem:[#allocation7 + $0x14] ss:$8 sps:$4 sm:$0xff]   ;;  %v161_v28 = vpack.c.bf16 %v140_v21, %v139_v20 }
  0x75   :  { %1827 = vmatprep.mubr.bf16.mxu1 %v159_v10  ;;  %v125_v29 = vld [vmem:[#allocation2 + $0x30] sm:$0xff]  ;;  %v126_v30 = vld [vmem:[#allocation2 + $0x38] sm:$0xff]  ;;  %v127_v31 = vld [vmem:[#allocation2 + $0x40] sm:$0xff] }
  0x76   :  { %v128_v32 = vld [vmem:[#allocation2 + $0x48] sm:$0xff]  ;;  %v141_v33 = vld [vmem:[#allocation2 + $0xb0] sm:$0xff]  ;;  %v142_v34 = vld [vmem:[#allocation2 + $0xb8] sm:$0xff]  ;;  %v154_v39 = vpack.c.bf16 %v126_v30, %v125_v29 }
  0x77   :  { %1800 = vmatpush3.bf16.msra.mxu0 %v1969_v2  ;;  %1949 = vmatpush3.bf16.msra.mxu1 %v1969_v2  ;;  %v1978_v35 = vld [vmem:[#allocation7 + $0x10] ss:$8 sps:$4 sm:$0xff]   ;;  %v143_v36 = vld [vmem:[#allocation2 + $0xc0] sm:$0xff]  ;;  %v144_v37 = vld [vmem:[#allocation2 + $0xc8] sm:$0xff]  ;;  %v155_v40 = vpack.c.bf16 %v128_v32, %v127_v31  ;;  %v162_v41 = vpack.c.bf16 %v142_v34, %v141_v33 }
  0x78   :  { %1801 = vmatprep.subr.bf16.mxu0 %v1970_v3  ;;  %1942 = vmatprep.subr.bf16.mxu1 %v1970_v3  ;;  %v1983_v38 = vld [vmem:[#allocation7 + $0x24] ss:$8 sps:$4 sm:$0xff]   ;;  %v163_v42 = vpack.c.bf16 %v144_v37, %v143_v36  ;;  %v1981_v43 = vld [vmem:[#allocation7 + $0x20] ss:$8 sps:$4 sm:$0xff]   ;;  %v1986_v44 = vld [vmem:[#allocation7 + $0x34] ss:$8 sps:$4 sm:$0xff]  }
  0x79   :  { %v129_v45 = vld [vmem:[#allocation2 + $0x50] sm:$0xff]  ;;  %v130_v46 = vld [vmem:[#allocation2 + $0x58] sm:$0xff]  ;;  %v131_v47 = vld [vmem:[#allocation2 + $0x60] sm:$0xff] }
  0x7a   :  { %v132_v48 = vld [vmem:[#allocation2 + $0x68] sm:$0xff]  ;;  %v145_v49 = vld [vmem:[#allocation2 + $0xd0] sm:$0xff]  ;;  %v146_v50 = vld [vmem:[#allocation2 + $0xd8] sm:$0xff]  ;;  %v156_v55 = vpack.c.bf16 %v130_v46, %v129_v45 }
  0x7b   :  { %1802 = vmatpush3.bf16.msra.mxu0 %v1970_v3  ;;  %1950 = vmatpush3.bf16.msra.mxu1 %v1970_v3  ;;  %v1984_v51 = vld [vmem:[#allocation7 + $0x30] ss:$8 sps:$4 sm:$0xff]   ;;  %v147_v52 = vld [vmem:[#allocation2 + $0xe0] sm:$0xff]  ;;  %v148_v53 = vld [vmem:[#allocation2 + $0xe8] sm:$0xff]  ;;  %v157_v56 = vpack.c.bf16 %v132_v48, %v131_v47  ;;  %v164_v57 = vpack.c.bf16 %v146_v50, %v145_v49 }
  0x7c   :  { %1803 = vmatprep.subr.bf16.mxu0 %v1971_v7  ;;  %1943 = vmatprep.subr.bf16.mxu1 %v1971_v7  ;;  %v1989_v54 = vld [vmem:[#allocation7 + $0x44] ss:$8 sps:$4 sm:$0xff]   ;;  %v165_v58 = vpack.c.bf16 %v148_v53, %v147_v52  ;;  %v1987_v59 = vld [vmem:[#allocation7 + $0x40] ss:$8 sps:$4 sm:$0xff]   ;;  %v1992_v60 = vld [vmem:[#allocation7 + $0x54] ss:$8 sps:$4 sm:$0xff]  }
  0x7d   :  { %v133_v61 = vld [vmem:[#allocation2 + $0x70] sm:$0xff]  ;;  %v134_v62 = vld [vmem:[#allocation2 + $0x78] sm:$0xff]  ;;  %v1995_v4 = vld [vmem:[#allocation7 + $0x64] ss:$8 sps:$4 sm:$0xff]  }
  0x7e   :  { %v149_v63 = vld [vmem:[#allocation2 + $0xf0] sm:$0xff]  ;;  %v150_v0 = vld [vmem:[#allocation2 + $0xf8] sm:$0xff]  ;;  %v158_v2 = vpack.c.bf16 %v134_v62, %v133_v61  ;;  %v1993_v5 = vld [vmem:[#allocation7 + $0x60] ss:$8 sps:$4 sm:$0xff]  }
  0x7f   :  { %1804 = vmatpush3.bf16.msra.mxu0 %v1971_v7  ;;  %1951 = vmatpush3.bf16.msra.mxu1 %v1971_v7  ;;  %v1990_v1 = vld [vmem:[#allocation7 + $0x50] ss:$8 sps:$4 sm:$0xff]   ;;  %v166_v3 = vpack.c.bf16 %v150_v0, %v149_v63  ;;  %v1998_v6 = vld [vmem:[#allocation7 + $0x74] ss:$8 sps:$4 sm:$0xff]   ;;  %v2532_v9 = vld [vmem:[%s2782_s2] ss:$0 sm:$0xff] }
  0x80   :  { %1805 = vmatprep.subr.bf16.mxu0 %v1972_v11  ;;  %1944 = vmatprep.subr.bf16.mxu1 %v1972_v11  ;;  %v1996_v7 = vld [vmem:[#allocation7 + $0x70] ss:$8 sps:$4 sm:$0xff]  }
  0x83   :  { %1806 = vmatpush3.bf16.msra.mxu0 %v1972_v11  ;;  %1952 = vmatpush3.bf16.msra.mxu1 %v1972_v11 }
  0x84   :  { %1807 = vmatprep.subr.bf16.mxu0 %v1973_v12  ;;  %1945 = vmatprep.subr.bf16.mxu1 %v1973_v12 }
  0x87   :  { %1808 = vmatpush3.bf16.msra.mxu0 %v1973_v12  ;;  %1953 = vmatpush3.bf16.msra.mxu1 %v1973_v12 }
  0x88   :  { %1809 = vmatprep.subr.bf16.mxu0 %v1974_v13  ;;  %1946 = vmatprep.subr.bf16.mxu1 %v1974_v13 }
  0x8b   :  { %1810 = vmatpush3.bf16.msra.mxu0 %v1974_v13  ;;  %1954 = vmatpush3.bf16.msra.mxu1 %v1974_v13 }
  0x8c   :  { %555 = vmatprep.subr.bf16.mxu1 %v1977_v22 }
  0x8e   :  { %1812 = vmatmul.mubr.bf16.vlgmr.msra.gmra.mrb[0].mxu0 %v152_v23  ;;  %1828 = vmatmul.mubr.bf16.vlgmr.msra.gmra.mrb[0].mxu1 %v160_v26 }
  0x8f   :  { %1815 = vmatprep.mubr.bf16.mxu0 %v153_v25  ;;  %1831 = vmatprep.mubr.bf16.mxu1 %v161_v28 }
  0x90   :  { %556 = vmatpush1.bf16.msra.mxu1 %v1975_v24 }
  0x91   :  { %557 = vmatprep.subr.bf16.mxu1 %v1980_v27 }
  0x94   :  { %558 = vmatpush1.bf16.msra.mxu1 %v1978_v35 }
  0x95   :  { %559 = vmatprep.subr.bf16.mxu1 %v1983_v38 }
  0x96   :  { %1816 = vmatmul.mubr.bf16.gmra.mrb[4].mxu0 %v154_v39  ;;  %1832 = vmatmul.mubr.bf16.gmra.mrb[4].mxu1 %v162_v41 }
  0x97   :  { %1819 = vmatprep.mubr.bf16.mxu0 %v155_v40  ;;  %1835 = vmatprep.mubr.bf16.mxu1 %v163_v42 }
  0x98   :  { %560 = vmatpush1.bf16.msra.mxu1 %v1981_v43 }
  0x99   :  { %561 = vmatprep.subr.bf16.mxu1 %v1986_v44 }
  0x9c   :  { %562 = vmatpush1.bf16.msra.mxu1 %v1984_v51 }
  0x9d   :  { %563 = vmatprep.subr.bf16.mxu1 %v1989_v54 }
  0x9e   :  { %1820 = vmatmul.mubr.bf16.gmra.mrb[8].mxu0 %v156_v55  ;;  %1836 = vmatmul.mubr.bf16.gmra.mrb[8].mxu1 %v164_v57 }
  0x9f   :  { %1823 = vmatprep.mubr.bf16.mxu0 %v157_v56  ;;  %1839 = vmatprep.mubr.bf16.mxu1 %v165_v58 }
  0xa0   :  { %564 = vmatpush1.bf16.msra.mxu1 %v1987_v59 }
  0xa1   :  { %565 = vmatprep.subr.bf16.mxu1 %v1992_v60 }
  0xa4   :  { %566 = vmatpush1.bf16.msra.mxu1 %v1990_v1 }
  0xa5   :  { %567 = vmatprep.subr.bf16.mxu1 %v1995_v4 }
  0xa6   :  { %1824 = vmatmul.mubr.bf16.gmra.mrb[12].mxu0 %v158_v2  ;;  %1840 = vmatmul.mubr.bf16.gmra.mrb[12].mxu1 %v166_v3 }
  0xa7   :  { %587 = vmatprep.mubr.bf16.mxu1 %v2381_v8 }
  0xa8   :  { %568 = vmatpush1.bf16.msra.mxu1 %v1993_v5 }
  0xa9   :  { %569 = vmatprep.subr.bf16.mxu1 %v1998_v6 }
  0xac   :  { %570 = vmatpush1.bf16.msra.mxu1 %v1996_v7 }
 0x161   :  { %v1813_v10 = vpop.f32.mrb[0].mxu0  ;;  %v1829_v13 = vpop.f32.mrb[0].mxu1 }
 0x162   :  { %v281_v11 = vadd.f32 %v1813_v10, %v2532_v9  ;;  %v272_v12 = vpop.f32.mrb[1].mxu0  ;;  %v345_v16 = vadd.f32 %v1829_v13, %v2532_v9  ;;  %v336_v17 = vpop.f32.mrb[1].mxu1 }
 0x163   :  { %v273_v14 = vadd.f32 %v2532_v9, %v272_v12  ;;  %v1814_v15 = vpop.f32.mrb[2].mxu0  ;;  %v337_v20 = vadd.f32 %v2532_v9, %v336_v17  ;;  %v1830_v21 = vpop.f32.mrb[2].mxu1 }
 0x164   :  { %v284_v18 = vadd.f32 %v1814_v15, %v2532_v9  ;;  %v275_v19 = vpop.f32.mrb[3].mxu0  ;;  %v417_v23 = vmax.f32 %v345_v16, 0.0  ;;  %v348_v24 = vadd.f32 %v1830_v21, %v2532_v9  ;;  %v339_v25 = vpop.f32.mrb[3].mxu1  ;;  %v401_v26 = vmax.f32 %v281_v11, 0.0 }
 0x165   :  { %v276_v22 = vadd.f32 %v2532_v9, %v275_v19  ;;  %v415_v28 = vmax.f32 %v337_v20, 0.0  ;;  %v340_v29 = vadd.f32 %v2532_v9, %v339_v25  ;;  %v399_v30 = vmax.f32 %v273_v14, 0.0 }
 0x166   :  { %v402_v27 = vmax.f32 %v284_v18, 0.0  ;;  %v418_v32 = vmax.f32 %v348_v24, 0.0 }
 0x167   :  { %v400_v31 = vmax.f32 %v276_v22, 0.0  ;;  %v416_v34 = vmax.f32 %v340_v29, 0.0 }
 0x168   :  { %v432_v33 = vpack.c.bf16 %v402_v27, %v401_v26  ;;  %v2542_v37 = vpack.c.bf16 %v418_v32, %v417_v23 }
 0x169   :  { %v431_v35 = vpack.c.bf16 %v400_v31, %v399_v30  ;;  %v1817_v36 = vpop.f32.mrb[4].mxu0  ;;  %v2545_v40 = vpack.c.bf16 %v416_v34, %v415_v28  ;;  %v1833_v41 = vpop.f32.mrb[4].mxu1 }
 0x16a   :  { %v297_v38 = vadd.f32 %v1817_v36, %v2532_v9  ;;  %v288_v39 = vpop.f32.mrb[5].mxu0  ;;  %v361_v44 = vadd.f32 %v1833_v41, %v2532_v9  ;;  %v352_v45 = vpop.f32.mrb[5].mxu1 }
 0x16b   :  { %588 = vmatmul.mubr.bf16.vlgmr.msra.gmra.mrb[16].mxu1 %v431_v35  ;;  %v289_v42 = vadd.f32 %v2532_v9, %v288_v39  ;;  %v1818_v43 = vpop.f32.mrb[6].mxu0  ;;  %v353_v49 = vadd.f32 %v2532_v9, %v352_v45  ;;  %v1834_v50 = vpop.f32.mrb[6].mxu1 }
 0x16c   :  { %v405_v46 = vmax.f32 %v297_v38, 0.0  ;;  %v300_v47 = vadd.f32 %v1818_v43, %v2532_v9  ;;  %v291_v48 = vpop.f32.mrb[7].mxu0  ;;  %597 = vmatprep.mubr.bf16.mxu1 %v2381_v8  ;;  %v421_v53 = vmax.f32 %v361_v44, 0.0  ;;  %v364_v54 = vadd.f32 %v1834_v50, %v2532_v9  ;;  %v355_v55 = vpop.f32.mrb[7].mxu1 }
 0x16d   :  { %v403_v51 = vmax.f32 %v289_v42, 0.0  ;;  %v292_v52 = vadd.f32 %v2532_v9, %v291_v48  ;;  %v419_v57 = vmax.f32 %v353_v49, 0.0  ;;  %v356_v58 = vadd.f32 %v2532_v9, %v355_v55 }
 0x16e   :  { %v406_v56 = vmax.f32 %v300_v47, 0.0  ;;  %v422_v60 = vmax.f32 %v364_v54, 0.0 }
 0x16f   :  { %v404_v59 = vmax.f32 %v292_v52, 0.0  ;;  %v420_v62 = vmax.f32 %v356_v58, 0.0 }
 0x170   :  { %v2555_v61 = vpack.c.bf16 %v406_v56, %v405_v46  ;;  %v2557_v1 = vpack.c.bf16 %v422_v60, %v421_v53 }
 0x171   :  { %v433_v63 = vpack.c.bf16 %v404_v59, %v403_v51  ;;  %v1821_v0 = vpop.f32.mrb[8].mxu0  ;;  %v2560_v4 = vpack.c.bf16 %v420_v62, %v419_v57  ;;  %v1837_v5 = vpop.f32.mrb[8].mxu1 }
 0x172   :  { %v313_v2 = vadd.f32 %v1821_v0, %v2532_v9  ;;  %v304_v3 = vpop.f32.mrb[9].mxu0  ;;  %v377_v10 = vadd.f32 %v1837_v5, %v2532_v9  ;;  %v368_v11 = vpop.f32.mrb[9].mxu1  ;;  %v2004_v0 = vld [vmem:[#allocation10 + $0x28] sm:$0xff]  }
 0x173   :  { %598 = vmatmul.mubr.bf16.gmra.mrb[20].mxu1 %v432_v33  ;;  %v305_v6 = vadd.f32 %v2532_v9, %v304_v3  ;;  %v1822_v7 = vpop.f32.mrb[10].mxu0  ;;  %v369_v15 = vadd.f32 %v2532_v9, %v368_v11  ;;  %v1838_v16 = vpop.f32.mrb[10].mxu1  ;;  %v465_v3 = vlaneseq }
 0x174   :  { %607 = vmatprep.mubr.bf16.mxu1 %v2381_v8  ;;  %v409_v12 = vmax.f32 %v313_v2, 0.0  ;;  %v316_v13 = vadd.f32 %v1822_v7, %v2532_v9  ;;  %v307_v14 = vpop.f32.mrb[11].mxu0  ;;  %v425_v19 = vmax.f32 %v377_v10, 0.0  ;;  %v380_v20 = vadd.f32 %v1838_v16, %v2532_v9  ;;  %v371_v21 = vpop.f32.mrb[11].mxu1  ;;  %v2006_v2 = vld [vmem:[#allocation10 + $0x38] sm:$0xff]  }
 0x175   :  { %v407_v17 = vmax.f32 %v305_v6, 0.0  ;;  %v308_v18 = vadd.f32 %v2532_v9, %v307_v14  ;;  %v423_v23 = vmax.f32 %v369_v15, 0.0  ;;  %v372_v24 = vadd.f32 %v2532_v9, %v371_v21  ;;  %v463_v6 = vld [vmem:[%s2784_s4] sm:$0x3] }
 0x176   :  { %v410_v22 = vmax.f32 %v316_v13, 0.0  ;;  %v426_v26 = vmax.f32 %v380_v20, 0.0 }
 0x177   :  { %v408_v25 = vmax.f32 %v308_v18, 0.0  ;;  %v424_v28 = vmax.f32 %v372_v24, 0.0 }
 0x178   :  { %v436_v27 = vpack.c.bf16 %v410_v22, %v409_v12  ;;  %v2570_v31 = vpack.c.bf16 %v426_v26, %v425_v19 }
 0x179   :  { %v435_v29 = vpack.c.bf16 %v408_v25, %v407_v17  ;;  %v1825_v30 = vpop.f32.mrb[12].mxu0  ;;  %v443_v34 = vpack.c.bf16 %v424_v28, %v423_v23  ;;  %v1841_v35 = vpop.f32.mrb[12].mxu1 }
 0x17a   :  { %v329_v32 = vadd.f32 %v1825_v30, %v2532_v9  ;;  %v320_v33 = vpop.f32.mrb[13].mxu0  ;;  %v393_v39 = vadd.f32 %v1841_v35, %v2532_v9  ;;  %v384_v41 = vpop.f32.mrb[13].mxu1 }
 0x17b   :  { %608 = vmatmul.mubr.bf16.gmra.mrb[24].mxu1 %v433_v63  ;;  %v321_v36 = vadd.f32 %v2532_v9, %v320_v33  ;;  %v1826_v38 = vpop.f32.mrb[14].mxu0  ;;  %v385_v45 = vadd.f32 %v2532_v9, %v384_v41  ;;  %v1842_v46 = vpop.f32.mrb[14].mxu1  ;;  %v2003_v63 = vld [vmem:[#allocation10 + $0x20] sm:$0xff]  }
 0x17c   :  { %617 = vmatprep.mubr.bf16.mxu1 %v2381_v8  ;;  %v413_v42 = vmax.f32 %v329_v32, 0.0  ;;  %v332_v43 = vadd.f32 %v1826_v38, %v2532_v9  ;;  %v323_v44 = vpop.f32.mrb[15].mxu0  ;;  %v429_v49 = vmax.f32 %v393_v39, 0.0  ;;  %v396_v50 = vadd.f32 %v1842_v46, %v2532_v9  ;;  %v387_v51 = vpop.f32.mrb[15].mxu1  ;;  %v844_v32 = vld [vmem:[#allocation8] sm:$0xff]  ;;  %v845_v38 = vld [vmem:[#allocation8 + $0x8] sm:$0xff] }
 0x17d   :  { %v411_v47 = vmax.f32 %v321_v36, 0.0  ;;  %v324_v48 = vadd.f32 %v2532_v9, %v323_v44  ;;  %v427_v53 = vmax.f32 %v385_v45, 0.0  ;;  %v388_v54 = vadd.f32 %v2532_v9, %v387_v51  ;;  %v1999_v9 = vld [vmem:[#allocation10] sm:$0xff]  }
 0x17e   :  { %v414_v52 = vmax.f32 %v332_v43, 0.0  ;;  %v430_v56 = vmax.f32 %v396_v50, 0.0  ;;  %1843 = vmatprep.subr.bf16.mxu0 %v1999_v9  ;;  %v2007_v43 = vld [vmem:[#allocation11] sm:$0xff]  }
 0x17f   :  { %v412_v55 = vmax.f32 %v324_v48, 0.0  ;;  %v428_v58 = vmax.f32 %v388_v54, 0.0  ;;  %1844 = vmatpush3.bf16.msra.mxu0 %v1999_v9 }
 0x180   :  { %v438_v57 = vpack.c.bf16 %v414_v52, %v413_v42  ;;  %v446_v60 = vpack.c.bf16 %v430_v56, %v429_v49 }
 0x181   :  { %v437_v59 = vpack.c.bf16 %v412_v55, %v411_v47  ;;  %v445_v62 = vpack.c.bf16 %v428_v58, %v427_v53  ;;  %v846_v53 = vld [vmem:[#allocation8 + $0x10] sm:$0xff] }
 0x183   :  { %618 = vmatmul.mubr.bf16.gmra.mrb[28].mxu1 %v2555_v61  ;;  %v2000_v61 = vld [vmem:[#allocation10 + $0x8] sm:$0xff]  }
 0x184   :  { %627 = vmatprep.mubr.bf16.mxu1 %v2381_v8  ;;  %1845 = vmatprep.subr.bf16.mxu0 %v2000_v61 }
 0x185   :  { %1846 = vmatpush3.bf16.msra.mxu0 %v2000_v61 }
 0x18b   :  { %628 = vmatmul.mubr.bf16.gmra.mrb[32].mxu1 %v435_v29 }
 0x18c   :  { %637 = vmatprep.mubr.bf16.mxu1 %v2381_v8 }
 0x193   :  { %638 = vmatmul.mubr.bf16.gmra.mrb[36].mxu1 %v436_v27 }
 0x194   :  { %647 = vmatprep.mubr.bf16.mxu1 %v2381_v8 }
 0x19b   :  { %648 = vmatmul.mubr.bf16.gmra.mrb[40].mxu1 %v437_v59  ;;  %v847_v59 = vld [vmem:[#allocation8 + $0x18] sm:$0xff] }
 0x19c   :  { %657 = vmatprep.mubr.bf16.mxu1 %v2381_v8 }
 0x1a3   :  { %658 = vmatmul.mubr.bf16.gmra.mrb[44].mxu1 %v438_v57 }
 0x1a4   :  { %667 = vmatprep.mubr.bf16.mxu1 %v2381_v8 }
 0x1ab   :  { %668 = vmatmul.mubr.bf16.gmra.mrb[48].mxu1 %v2545_v40  ;;  %v2001_v40 = vld [vmem:[#allocation10 + $0x10] sm:$0xff]  }
 0x1ac   :  { %677 = vmatprep.mubr.bf16.mxu1 %v2381_v8  ;;  %1847 = vmatprep.subr.bf16.mxu0 %v2001_v40 }
 0x1ad   :  { %1848 = vmatpush3.bf16.msra.mxu0 %v2001_v40 }
 0x1b3   :  { %678 = vmatmul.mubr.bf16.gmra.mrb[52].mxu1 %v2542_v37  ;;  %v2002_v37 = vld [vmem:[#allocation10 + $0x18] sm:$0xff]  }
 0x1b4   :  { %687 = vmatprep.mubr.bf16.mxu1 %v2381_v8  ;;  %1849 = vmatprep.subr.bf16.mxu0 %v2002_v37 }
 0x1b5   :  { %1850 = vmatpush3.bf16.msra.mxu0 %v2002_v37 }
 0x1b6   :  { %1851 = vmatprep.subr.bf16.mxu0 %v2003_v63 }
 0x1b9   :  { %1852 = vmatpush3.bf16.msra.mxu0 %v2003_v63 }
 0x1ba   :  { %1853 = vmatprep.subr.bf16.mxu0 %v2004_v0 }
 0x1bb   :  { %688 = vmatmul.mubr.bf16.gmra.mrb[56].mxu1 %v2560_v4  ;;  %v466_v4 = vshrl.u32 %v465_v3, 7 }
 0x1bc   :  { %697 = vmatprep.mubr.bf16.mxu1 %v2381_v8 }
 0x1bd   :  { %1854 = vmatpush3.bf16.msra.mxu0 %v2004_v0  ;;  %v471_v5 = vsub.s32 1, %v466_v4  ;;  %v467_v23 = vsub.s32 0, %v466_v4 }
 0x1bf   :  { %v2602_v7 = vrot.slane %v463_v6, %v471_v5  ;;  %v2608_v29 = vrot.slane %v463_v6, %v467_v23 }
 0x1c3   :  { %698 = vmatmul.mubr.bf16.gmra.mrb[60].mxu1 %v2557_v1  ;;  %v2005_v1 = vld [vmem:[#allocation10 + $0x30] sm:$0xff]  }
 0x1c4   :  { %707 = vmatprep.mubr.bf16.mxu1 %v2381_v8  ;;  %1855 = vmatprep.subr.bf16.mxu0 %v2005_v1 }
 0x1c5   :  { %1856 = vmatpush3.bf16.msra.mxu0 %v2005_v1 }
 0x1c6   :  { %1857 = vmatprep.subr.bf16.mxu0 %v2006_v2 }
 0x1c9   :  { %1858 = vmatpush3.bf16.msra.mxu0 %v2006_v2 }
 0x1ca   :  { %1891 = vmatprep.subr.bf16.mxu0 %v2007_v43 }
 0x1cb   :  { %708 = vmatmul.mubr.bf16.gmra.mrb[64].mxu1 %v443_v34 }
 0x1cc   :  { %717 = vmatprep.mubr.bf16.mxu1 %v2381_v8 }
 0x1d3   :  { %718 = vmatmul.mubr.bf16.gmra.mrb[68].mxu1 %v2570_v31 }
 0x1d4   :  { %727 = vmatprep.mubr.bf16.mxu1 %v2381_v8 }
 0x1db   :  { %728 = vmatmul.mubr.bf16.gmra.mrb[72].mxu1 %v445_v62 }
 0x1dc   :  { %737 = vmatprep.mubr.bf16.mxu1 %v2381_v8 }
 0x1e3   :  { %738 = vmatmul.mubr.bf16.gmra.mrb[76].mxu1 %v446_v60 }
 0x23e   :  { %v589_v10 = vpop.f32.mrb[16].mxu1 }
 0x23f   :  { %v591_v11 = vpop.f32.mrb[17].mxu1  ;;  %v590_v39 = vadd.f32 %v589_v10, %v2608_v29 }
 0x240   :  { %v592_v12 = vadd.f32 %v591_v11, %v2602_v7  ;;  %v593_v13 = vpop.f32.mrb[18].mxu1 }
 0x241   :  { %v595_v14 = vpop.f32.mrb[19].mxu1  ;;  %v594_v47 = vadd.f32 %v593_v13, %v2608_v29 }
 0x242   :  { %v748_v15 = vmul.f32 0.5, %v592_v12  ;;  %v596_v8 = vadd.f32 %v595_v14, %v2602_v7  ;;  %v848_v12 = vld [vmem:[#allocation8 + $0x20] sm:$0xff] }
 0x244   :  { %v780_v16 = vmul.f32 1.442695, %v748_v15  ;;  %v749_v17 = vmul.f32 0.5, %v596_v8  ;;  %v2008_v15 = vld [vmem:[#allocation11 + $0x8] sm:$0xff]  }
 0x246   :  { %2015 = vpow2.f32 %v780_v16  ;;  %v782_v18 = vmul.f32 1.442695, %v749_v17  ;;  %v599_v19 = vpop.f32.mrb[20].mxu1 }
 0x247   :  { %v601_v20 = vpop.f32.mrb[21].mxu1  ;;  %v600_v9 = vadd.f32 %v599_v19, %v2608_v29 }
 0x248   :  { %2017 = vpow2.f32 %v782_v18  ;;  %v602_v21 = vadd.f32 %v601_v20, %v2602_v7  ;;  %v603_v22 = vpop.f32.mrb[22].mxu1  ;;  %v849_v18 = vld [vmem:[#allocation8 + $0x28] sm:$0xff] }
 0x249   :  { %v605_v24 = vpop.f32.mrb[23].mxu1  ;;  %v604_v1 = vadd.f32 %v603_v22, %v2608_v29 }
 0x24a   :  { %v750_v25 = vmul.f32 0.5, %v602_v21  ;;  %v606_v26 = vadd.f32 %v605_v24, %v2602_v7 }
 0x24c   :  { %v784_v27 = vmul.f32 1.442695, %v750_v25  ;;  %v751_v28 = vmul.f32 0.5, %v606_v26 }
 0x24e   :  { %2019 = vpow2.f32 %v784_v27  ;;  %v786_v30 = vmul.f32 1.442695, %v751_v28  ;;  %v609_v31 = vpop.f32.mrb[24].mxu1  ;;  %v2009_v28 = vld [vmem:[#allocation11 + $0x10] sm:$0xff]  }
 0x24f   :  { %v611_v33 = vpop.f32.mrb[25].mxu1  ;;  %v610_v19 = vadd.f32 %v609_v31, %v2608_v29 }
 0x250   :  { %v2016_v34 = vpop.eup %2015  ;;  %2021 = vpow2.f32 %v786_v30  ;;  %v612_v35 = vadd.f32 %v611_v33, %v2602_v7  ;;  %v613_v36 = vpop.f32.mrb[26].mxu1 }
 0x251   :  { %v615_v41 = vpop.f32.mrb[27].mxu1  ;;  %v876_v42 = vmul.f32 %v2016_v34, %v844_v32  ;;  %v614_v25 = vadd.f32 %v613_v36, %v2608_v29 }
 0x252   :  { %v2018_v44 = vpop.eup %2017  ;;  %v752_v45 = vmul.f32 0.5, %v612_v35  ;;  %v616_v46 = vadd.f32 %v615_v41, %v2602_v7  ;;  %v850_v35 = vld [vmem:[#allocation8 + $0x30] sm:$0xff]  ;;  %v2010_v41 = vld [vmem:[#allocation11 + $0x18] sm:$0xff]  }
 0x253   :  { %v877_v48 = vmul.f32 %v2018_v44, %v845_v38  ;;  %v908_v49 = vadd.f32 %v876_v42, %v590_v39  ;;  %v851_v44 = vld [vmem:[#allocation8 + $0x38] sm:$0xff] }
 0x254   :  { %v788_v50 = vmul.f32 1.442695, %v752_v45  ;;  %v753_v51 = vmul.f32 0.5, %v616_v46 }
 0x255   :  { %v909_v52 = vadd.f32 %v877_v48, %v594_v47 }
 0x256   :  { %2023 = vpow2.f32 %v788_v50  ;;  %v790_v54 = vmul.f32 1.442695, %v753_v51  ;;  %v2614_v55 = vpop.f32.mrb[28].mxu1 }
 0x257   :  { %v621_v56 = vpop.f32.mrb[29].mxu1  ;;  %v940_v57 = vpack.c.bf16 %v909_v52, %v908_v49  ;;  %v620_v45 = vadd.f32 %v2614_v55, %v2608_v29 }
 0x258   :  { %v2020_v58 = vpop.eup %2019  ;;  %2025 = vpow2.f32 %v790_v54  ;;  %v622_v60 = vadd.f32 %v621_v56, %v2602_v7  ;;  %v2617_v62 = vpop.f32.mrb[30].mxu1  ;;  %v2011_v54 = vld [vmem:[#allocation11 + $0x20] sm:$0xff]  }
 0x259   :  { %v878_v61 = vmul.f32 %v2020_v58, %v846_v53  ;;  %v625_v40 = vpop.f32.mrb[31].mxu1  ;;  %1859 = vmatprep.mubr.bf16.mxu0 %v940_v57  ;;  %v624_v51 = vadd.f32 %v2617_v62, %v2608_v29 }
 0x25a   :  { %v2022_v37 = vpop.eup %2021  ;;  %v754_v63 = vmul.f32 0.5, %v622_v60  ;;  %v626_v0 = vadd.f32 %v625_v40, %v2602_v7  ;;  %v852_v60 = vld [vmem:[#allocation8 + $0x40] sm:$0xff]  ;;  %v2012_v40 = vld [vmem:[#allocation11 + $0x28] sm:$0xff]  }
 0x25b   :  { %v879_v2 = vmul.f32 %v2022_v37, %v847_v59  ;;  %v910_v3 = vadd.f32 %v878_v61, %v600_v9 }
 0x25c   :  { %v792_v4 = vmul.f32 1.442695, %v754_v63  ;;  %v755_v5 = vmul.f32 0.5, %v626_v0  ;;  %v853_v0 = vld [vmem:[#allocation8 + $0x48] sm:$0xff] }
 0x25d   :  { %v911_v6 = vadd.f32 %v879_v2, %v604_v1 }
 0x25e   :  { %2027 = vpow2.f32 %v792_v4  ;;  %v794_v10 = vmul.f32 1.442695, %v755_v5  ;;  %v2622_v11 = vpop.f32.mrb[32].mxu1 }
 0x25f   :  { %v631_v13 = vpop.f32.mrb[33].mxu1  ;;  %v941_v14 = vpack.c.bf16 %v911_v6, %v910_v3  ;;  %v630_v1 = vadd.f32 %v2622_v11, %v2608_v29 }
 0x260   :  { %v2024_v8 = vpop.eup %2023  ;;  %2029 = vpow2.f32 %v794_v10  ;;  %v632_v16 = vadd.f32 %v631_v13, %v2602_v7  ;;  %v2625_v17 = vpop.f32.mrb[34].mxu1 }
 0x261   :  { %v635_v20 = vpop.f32.mrb[35].mxu1  ;;  %1860 = vmatmul.mubr.bf16.vlgmr.msra.gmra.mrb[16].mxu0 %v941_v14  ;;  %v880_v21 = vmul.f32 %v2024_v8, %v848_v12  ;;  %v634_v10 = vadd.f32 %v2625_v17, %v2608_v29 }
 0x262   :  { %v2026_v22 = vpop.eup %2025  ;;  %v756_v23 = vmul.f32 0.5, %v632_v16  ;;  %v636_v24 = vadd.f32 %v635_v20, %v2602_v7  ;;  %1892 = vmatpush3.bf16.msra.mxu0 %v2007_v43 }
 0x263   :  { %v881_v26 = vmul.f32 %v2026_v22, %v849_v18  ;;  %v912_v27 = vadd.f32 %v880_v21, %v610_v19  ;;  %1893 = vmatprep.subr.bf16.mxu0 %v2008_v15  ;;  %v854_v18 = vld [vmem:[#allocation8 + $0x50] sm:$0xff] }
 0x264   :  { %v796_v30 = vmul.f32 1.442695, %v756_v23  ;;  %v757_v32 = vmul.f32 0.5, %v636_v24  ;;  %v855_v24 = vld [vmem:[#allocation8 + $0x58] sm:$0xff] }
 0x265   :  { %v913_v33 = vadd.f32 %v881_v26, %v614_v25 }
 0x266   :  { %2031 = vpow2.f32 %v796_v30  ;;  %v798_v34 = vmul.f32 1.442695, %v757_v32  ;;  %v2630_v31 = vpop.f32.mrb[36].mxu1  ;;  %1894 = vmatpush3.bf16.msra.mxu0 %v2008_v15 }
 0x267   :  { %v641_v38 = vpop.f32.mrb[37].mxu1  ;;  %v942_v39 = vpack.c.bf16 %v913_v33, %v912_v27  ;;  %1895 = vmatprep.subr.bf16.mxu0 %v2009_v28  ;;  %v640_v17 = vadd.f32 %v2630_v31, %v2608_v29 }
 0x268   :  { %v2028_v42 = vpop.eup %2027  ;;  %2033 = vpow2.f32 %v798_v34  ;;  %v642_v36 = vadd.f32 %v641_v38, %v2602_v7  ;;  %v2633_v43 = vpop.f32.mrb[38].mxu1 }
 0x269   :  { %v645_v46 = vpop.f32.mrb[39].mxu1  ;;  %1863 = vmatprep.mubr.bf16.mxu0 %v942_v39  ;;  %v882_v47 = vmul.f32 %v2028_v42, %v850_v35  ;;  %v644_v32 = vadd.f32 %v2633_v43, %v2608_v29 }
 0x26a   :  { %v2030_v48 = vpop.eup %2029  ;;  %v758_v49 = vmul.f32 0.5, %v642_v36  ;;  %v646_v50 = vadd.f32 %v645_v46, %v2602_v7  ;;  %1896 = vmatpush3.bf16.msra.mxu0 %v2009_v28  ;;  %v856_v36 = vld [vmem:[#allocation8 + $0x60] sm:$0xff] }
 0x26b   :  { %v883_v52 = vmul.f32 %v2030_v48, %v851_v44  ;;  %v914_v53 = vadd.f32 %v882_v47, %v620_v45  ;;  %1897 = vmatprep.subr.bf16.mxu0 %v2010_v41  ;;  %v857_v48 = vld [vmem:[#allocation8 + $0x68] sm:$0xff] }
 0x26c   :  { %v800_v56 = vmul.f32 1.442695, %v758_v49  ;;  %v759_v57 = vmul.f32 0.5, %v646_v50 }
 0x26d   :  { %v915_v58 = vadd.f32 %v883_v52, %v624_v51 }
 0x26e   :  { %2035 = vpow2.f32 %v800_v56  ;;  %v802_v55 = vmul.f32 1.442695, %v759_v57  ;;  %v2640_v59 = vpop.f32.mrb[40].mxu1  ;;  %1898 = vmatpush3.bf16.msra.mxu0 %v2010_v41 }
 0x26f   :  { %v651_v9 = vpop.f32.mrb[41].mxu1  ;;  %v943_v61 = vpack.c.bf16 %v915_v58, %v914_v53  ;;  %1899 = vmatprep.subr.bf16.mxu0 %v2011_v54  ;;  %v650_v43 = vadd.f32 %v2640_v59, %v2608_v29 }
 0x270   :  { %v2032_v37 = vpop.eup %2031  ;;  %2037 = vpow2.f32 %v802_v55  ;;  %v652_v62 = vadd.f32 %v651_v9, %v2602_v7  ;;  %v653_v63 = vpop.f32.mrb[42].mxu1 }
 0x271   :  { %v655_v2 = vpop.f32.mrb[43].mxu1  ;;  %1864 = vmatmul.mubr.bf16.gmra.mrb[20].mxu0 %v943_v61  ;;  %v884_v3 = vmul.f32 %v2032_v37, %v852_v60 }
 0x272   :  { %v2034_v4 = vpop.eup %2033  ;;  %v760_v5 = vmul.f32 0.5, %v652_v62  ;;  %v656_v6 = vadd.f32 %v655_v2, %v2602_v7  ;;  %1900 = vmatpush3.bf16.msra.mxu0 %v2011_v54  ;;  %v654_v54 = vadd.f32 %v653_v63, %v2608_v29  ;;  %v859_v2 = vld [vmem:[#allocation8 + $0x78] sm:$0xff] }
 0x273   :  { %v885_v12 = vmul.f32 %v2034_v4, %v853_v0  ;;  %v916_v13 = vadd.f32 %v884_v3, %v630_v1  ;;  %1901 = vmatprep.subr.bf16.mxu0 %v2012_v40 }
 0x274   :  { %v804_v14 = vmul.f32 1.442695, %v760_v5  ;;  %v761_v15 = vmul.f32 0.5, %v656_v6 }
 0x275   :  { %v917_v8 = vadd.f32 %v885_v12, %v634_v10 }
 0x276   :  { %2039 = vpow2.f32 %v804_v14  ;;  %v806_v16 = vmul.f32 1.442695, %v761_v15  ;;  %v659_v11 = vpop.f32.mrb[44].mxu1  ;;  %1902 = vmatpush3.bf16.msra.mxu0 %v2012_v40  ;;  %v858_v40 = vld [vmem:[#allocation8 + $0x70] sm:$0xff] }
 0x277   :  { %v661_v19 = vpop.f32.mrb[45].mxu1  ;;  %v944_v20 = vpack.c.bf16 %v917_v8, %v916_v13  ;;  %v660_v3 = vadd.f32 %v659_v11, %v2608_v29 }
 0x278   :  { %v2036_v21 = vpop.eup %2035  ;;  %2041 = vpow2.f32 %v806_v16  ;;  %v662_v22 = vadd.f32 %v661_v19, %v2602_v7  ;;  %v663_v23 = vpop.f32.mrb[46].mxu1 }
 0x279   :  { %v665_v25 = vpop.f32.mrb[47].mxu1  ;;  %1867 = vmatprep.mubr.bf16.mxu0 %v944_v20  ;;  %v886_v26 = vmul.f32 %v2036_v21, %v854_v18  ;;  %v664_v12 = vadd.f32 %v663_v23, %v2608_v29  ;;  %v860_v20 = vld [vmem:[#allocation8 + $0x80] sm:$0xff] }
 0x27a   :  { %v2038_v27 = vpop.eup %2037  ;;  %v762_v28 = vmul.f32 0.5, %v662_v22  ;;  %v666_v30 = vadd.f32 %v665_v25, %v2602_v7  ;;  %v861_v25 = vld [vmem:[#allocation8 + $0x88] sm:$0xff] }
 0x27b   :  { %v887_v33 = vmul.f32 %v2038_v27, %v855_v24  ;;  %v918_v34 = vadd.f32 %v886_v26, %v640_v17 }
 0x27c   :  { %v808_v35 = vmul.f32 1.442695, %v762_v28  ;;  %v763_v38 = vmul.f32 0.5, %v666_v30 }
 0x27d   :  { %v919_v39 = vadd.f32 %v887_v33, %v644_v32 }
 0x27e   :  { %2043 = vpow2.f32 %v808_v35  ;;  %v810_v41 = vmul.f32 1.442695, %v763_v38  ;;  %v669_v42 = vpop.f32.mrb[48].mxu1 }
 0x27f   :  { %v671_v31 = vpop.f32.mrb[49].mxu1  ;;  %v945_v44 = vpack.c.bf16 %v919_v39, %v918_v34  ;;  %v670_v26 = vadd.f32 %v669_v42, %v2608_v29 }
 0x280   :  { %v2040_v45 = vpop.eup %2039  ;;  %2045 = vpow2.f32 %v810_v41  ;;  %v672_v46 = vadd.f32 %v671_v31, %v2602_v7  ;;  %v673_v47 = vpop.f32.mrb[50].mxu1 }
 0x281   :  { %v675_v49 = vpop.f32.mrb[51].mxu1  ;;  %1868 = vmatmul.mubr.bf16.gmra.mrb[24].mxu0 %v945_v44  ;;  %v888_v50 = vmul.f32 %v2040_v45, %v856_v36  ;;  %v674_v33 = vadd.f32 %v673_v47, %v2608_v29  ;;  %v862_v44 = vld [vmem:[#allocation8 + $0x90] sm:$0xff] }
 0x282   :  { %v2042_v51 = vpop.eup %2041  ;;  %v764_v52 = vmul.f32 0.5, %v672_v46  ;;  %v676_v53 = vadd.f32 %v675_v49, %v2602_v7  ;;  %v863_v49 = vld [vmem:[#allocation8 + $0x98] sm:$0xff] }
 0x283   :  { %v889_v56 = vmul.f32 %v2042_v51, %v857_v48  ;;  %v920_v57 = vadd.f32 %v888_v50, %v650_v43 }
 0x284   :  { %v812_v58 = vmul.f32 1.442695, %v764_v52  ;;  %v765_v55 = vmul.f32 0.5, %v676_v53 }
 0x285   :  { %v921_v60 = vadd.f32 %v889_v56, %v654_v54 }
 0x286   :  { %2047 = vpow2.f32 %v812_v58  ;;  %v814_v9 = vmul.f32 1.442695, %v765_v55  ;;  %v679_v61 = vpop.f32.mrb[52].mxu1 }
 0x287   :  { %v681_v37 = vpop.f32.mrb[53].mxu1  ;;  %v946_v59 = vpack.c.bf16 %v921_v60, %v920_v57  ;;  %v680_v50 = vadd.f32 %v679_v61, %v2608_v29 }
 0x288   :  { %v2044_v62 = vpop.eup %2043  ;;  %2049 = vpow2.f32 %v814_v9  ;;  %v682_v0 = vadd.f32 %v681_v37, %v2602_v7  ;;  %v683_v1 = vpop.f32.mrb[54].mxu1 }
 0x289   :  { %v685_v63 = vpop.f32.mrb[55].mxu1  ;;  %1871 = vmatprep.mubr.bf16.mxu0 %v946_v59  ;;  %v890_v4 = vmul.f32 %v2044_v62, %v858_v40  ;;  %v684_v56 = vadd.f32 %v683_v1, %v2608_v29  ;;  %v864_v59 = vld [vmem:[#allocation8 + $0xa0] sm:$0xff] }
 0x28a   :  { %v2046_v5 = vpop.eup %2045  ;;  %v766_v6 = vmul.f32 0.5, %v682_v0  ;;  %v686_v10 = vadd.f32 %v685_v63, %v2602_v7  ;;  %v865_v63 = vld [vmem:[#allocation8 + $0xa8] sm:$0xff] }
 0x28b   :  { %v891_v13 = vmul.f32 %v2046_v5, %v859_v2  ;;  %v922_v14 = vadd.f32 %v890_v4, %v660_v3 }
 0x28c   :  { %v816_v15 = vmul.f32 1.442695, %v766_v6  ;;  %v767_v8 = vmul.f32 0.5, %v686_v10 }
 0x28d   :  { %v923_v16 = vadd.f32 %v891_v13, %v664_v12 }
 0x28e   :  { %2051 = vpow2.f32 %v816_v15  ;;  %v818_v18 = vmul.f32 1.442695, %v767_v8  ;;  %v689_v19 = vpop.f32.mrb[56].mxu1 }
 0x28f   :  { %v691_v21 = vpop.f32.mrb[57].mxu1  ;;  %v947_v11 = vpack.c.bf16 %v923_v16, %v922_v14  ;;  %v690_v4 = vadd.f32 %v689_v19, %v2608_v29 }
 0x290   :  { %v2048_v22 = vpop.eup %2047  ;;  %2053 = vpow2.f32 %v818_v18  ;;  %v692_v24 = vadd.f32 %v691_v21, %v2602_v7  ;;  %v693_v17 = vpop.f32.mrb[58].mxu1 }
 0x291   :  { %v695_v23 = vpop.f32.mrb[59].mxu1  ;;  %1872 = vmatmul.mubr.bf16.gmra.mrb[28].mxu0 %v947_v11  ;;  %v892_v27 = vmul.f32 %v2048_v22, %v860_v20  ;;  %v694_v13 = vadd.f32 %v693_v17, %v2608_v29  ;;  %v866_v11 = vld [vmem:[#allocation8 + $0xb0] sm:$0xff] }
 0x292   :  { %v2050_v28 = vpop.eup %2049  ;;  %v768_v30 = vmul.f32 0.5, %v692_v24  ;;  %v696_v32 = vadd.f32 %v695_v23, %v2602_v7  ;;  %v867_v23 = vld [vmem:[#allocation8 + $0xb8] sm:$0xff] }
 0x293   :  { %v893_v34 = vmul.f32 %v2050_v28, %v861_v25  ;;  %v924_v35 = vadd.f32 %v892_v27, %v670_v26 }
 0x294   :  { %v820_v38 = vmul.f32 1.442695, %v768_v30  ;;  %v769_v39 = vmul.f32 0.5, %v696_v32 }
 0x295   :  { %v925_v41 = vadd.f32 %v893_v34, %v674_v33 }
 0x296   :  { %2055 = vpow2.f32 %v820_v38  ;;  %v822_v36 = vmul.f32 1.442695, %v769_v39  ;;  %v699_v31 = vpop.f32.mrb[60].mxu1 }
 0x297   :  { %v701_v45 = vpop.f32.mrb[61].mxu1  ;;  %v948_v42 = vpack.c.bf16 %v925_v41, %v924_v35  ;;  %v700_v27 = vadd.f32 %v699_v31, %v2608_v29 }
 0x298   :  { %v2052_v46 = vpop.eup %2051  ;;  %2057 = vpow2.f32 %v822_v36  ;;  %v702_v48 = vadd.f32 %v701_v45, %v2602_v7  ;;  %v703_v43 = vpop.f32.mrb[62].mxu1 }
 0x299   :  { %v705_v47 = vpop.f32.mrb[63].mxu1  ;;  %1875 = vmatprep.mubr.bf16.mxu0 %v948_v42  ;;  %v894_v51 = vmul.f32 %v2052_v46, %v862_v44  ;;  %v704_v34 = vadd.f32 %v703_v43, %v2608_v29  ;;  %v868_v42 = vld [vmem:[#allocation8 + $0xc0] sm:$0xff] }
 0x29a   :  { %v2054_v52 = vpop.eup %2053  ;;  %v770_v53 = vmul.f32 0.5, %v702_v48  ;;  %v706_v54 = vadd.f32 %v705_v47, %v2602_v7  ;;  %v869_v47 = vld [vmem:[#allocation8 + $0xc8] sm:$0xff] }
 0x29b   :  { %v895_v57 = vmul.f32 %v2054_v52, %v863_v49  ;;  %v926_v58 = vadd.f32 %v894_v51, %v680_v50 }
 0x29c   :  { %v824_v55 = vmul.f32 1.442695, %v770_v53  ;;  %v771_v60 = vmul.f32 0.5, %v706_v54 }
 0x29d   :  { %v927_v9 = vadd.f32 %v895_v57, %v684_v56 }
 0x29e   :  { %2059 = vpow2.f32 %v824_v55  ;;  %v826_v40 = vmul.f32 1.442695, %v771_v60  ;;  %v709_v37 = vpop.f32.mrb[64].mxu1 }
 0x29f   :  { %v711_v62 = vpop.f32.mrb[65].mxu1  ;;  %v949_v61 = vpack.c.bf16 %v927_v9, %v926_v58  ;;  %v710_v51 = vadd.f32 %v709_v37, %v2608_v29 }
 0x2a0   :  { %v2056_v0 = vpop.eup %2055  ;;  %2061 = vpow2.f32 %v826_v40  ;;  %v712_v2 = vadd.f32 %v711_v62, %v2602_v7  ;;  %v713_v3 = vpop.f32.mrb[66].mxu1 }
 0x2a1   :  { %v715_v1 = vpop.f32.mrb[67].mxu1  ;;  %1876 = vmatmul.mubr.bf16.gmra.mrb[32].mxu0 %v949_v61  ;;  %v896_v5 = vmul.f32 %v2056_v0, %v864_v59  ;;  %v714_v57 = vadd.f32 %v713_v3, %v2608_v29  ;;  %v2013_v59 = vld [vmem:[#allocation11 + $0x30] sm:$0xff]  }
 0x2a2   :  { %v2058_v6 = vpop.eup %2057  ;;  %v772_v10 = vmul.f32 0.5, %v712_v2  ;;  %v716_v12 = vadd.f32 %v715_v1, %v2602_v7  ;;  %v870_v0 = vld [vmem:[#allocation8 + $0xd0] sm:$0xff]  ;;  %1903 = vmatprep.subr.bf16.mxu0 %v2013_v59 }
 0x2a3   :  { %v897_v14 = vmul.f32 %v2058_v6, %v865_v63  ;;  %v928_v15 = vadd.f32 %v896_v5, %v690_v4  ;;  %v871_v5 = vld [vmem:[#allocation8 + $0xd8] sm:$0xff]  ;;  %1904 = vmatpush3.bf16.msra.mxu0 %v2013_v59 }
 0x2a4   :  { %v828_v8 = vmul.f32 1.442695, %v772_v10  ;;  %v773_v16 = vmul.f32 0.5, %v716_v12  ;;  %v2014_v12 = vld [vmem:[#allocation11 + $0x38] sm:$0xff]  }
 0x2a5   :  { %v929_v18 = vadd.f32 %v897_v14, %v694_v13  ;;  %1905 = vmatprep.subr.bf16.mxu0 %v2014_v12 }
 0x2a6   :  { %2063 = vpow2.f32 %v828_v8  ;;  %v830_v20 = vmul.f32 1.442695, %v773_v16  ;;  %v719_v21 = vpop.f32.mrb[68].mxu1 }
 0x2a7   :  { %v721_v22 = vpop.f32.mrb[69].mxu1  ;;  %v950_v19 = vpack.c.bf16 %v929_v18, %v928_v15  ;;  %v720_v3 = vadd.f32 %v719_v21, %v2608_v29  ;;  %1906 = vmatpush3.bf16.msra.mxu0 %v2014_v12  ;;  %v872_v21 = vld [vmem:[#allocation8 + $0xe0] sm:$0xff] }
 0x2a8   :  { %v2060_v24 = vpop.eup %2059  ;;  %2065 = vpow2.f32 %v830_v20  ;;  %v722_v25 = vadd.f32 %v721_v22, %v2602_v7  ;;  %v723_v26 = vpop.f32.mrb[70].mxu1 }
 0x2a9   :  { %v725_v17 = vpop.f32.mrb[71].mxu1  ;;  %1879 = vmatprep.mubr.bf16.mxu0 %v950_v19  ;;  %v898_v28 = vmul.f32 %v2060_v24, %v866_v11  ;;  %v724_v8 = vadd.f32 %v723_v26, %v2608_v29 }
 0x2aa   :  { %v2062_v30 = vpop.eup %2061  ;;  %v774_v32 = vmul.f32 0.5, %v722_v25  ;;  %v726_v33 = vadd.f32 %v725_v17, %v2602_v7 }
 0x2ab   :  { %v899_v35 = vmul.f32 %v2062_v30, %v867_v23  ;;  %v930_v38 = vadd.f32 %v898_v28, %v700_v27  ;;  %v873_v23 = vld [vmem:[#allocation8 + $0xe8] sm:$0xff] }
 0x2ac   :  { %v832_v39 = vmul.f32 1.442695, %v774_v32  ;;  %v775_v41 = vmul.f32 0.5, %v726_v33  ;;  %v874_v33 = vld [vmem:[#allocation8 + $0xf0] sm:$0xff] }
 0x2ad   :  { %v931_v36 = vadd.f32 %v899_v35, %v704_v34 }
 0x2ae   :  { %2067 = vpow2.f32 %v832_v39  ;;  %v834_v44 = vmul.f32 1.442695, %v775_v41  ;;  %v729_v45 = vpop.f32.mrb[72].mxu1 }
 0x2af   :  { %v731_v46 = vpop.f32.mrb[73].mxu1  ;;  %v951_v31 = vpack.c.bf16 %v931_v36, %v930_v38  ;;  %v730_v27 = vadd.f32 %v729_v45, %v2608_v29  ;;  %v875_v38 = vld [vmem:[#allocation8 + $0xf8] sm:$0xff] }
 0x2b0   :  { %v2064_v48 = vpop.eup %2063  ;;  %2069 = vpow2.f32 %v834_v44  ;;  %v732_v49 = vadd.f32 %v731_v46, %v2602_v7  ;;  %v733_v50 = vpop.f32.mrb[74].mxu1 }
 0x2b1   :  { %v735_v43 = vpop.f32.mrb[75].mxu1  ;;  %1880 = vmatmul.mubr.bf16.gmra.mrb[36].mxu0 %v951_v31  ;;  %v900_v52 = vmul.f32 %v2064_v48, %v868_v42  ;;  %v734_v26 = vadd.f32 %v733_v50, %v2608_v29  ;;  %v2694_v48 = vld [vmem:[%s2787_s7] ss:$0 sm:$0xff] }
 0x2b2   :  { %v2066_v53 = vpop.eup %2065  ;;  %v776_v54 = vmul.f32 0.5, %v732_v49  ;;  %v736_v56 = vadd.f32 %v735_v43, %v2602_v7 }
 0x2b3   :  { %v901_v58 = vmul.f32 %v2066_v53, %v869_v47  ;;  %v932_v55 = vadd.f32 %v900_v52, %v710_v51 }
 0x2b4   :  { %v836_v60 = vmul.f32 1.442695, %v776_v54  ;;  %v777_v9 = vmul.f32 0.5, %v736_v56 }
 0x2b5   :  { %v933_v40 = vadd.f32 %v901_v58, %v714_v57 }
 0x2b6   :  { %2071 = vpow2.f32 %v836_v60  ;;  %v838_v62 = vmul.f32 1.442695, %v777_v9  ;;  %v739_v61 = vpop.f32.mrb[76].mxu1 }
 0x2b7   :  { %v741_v37 = vpop.f32.mrb[77].mxu1  ;;  %v952_v2 = vpack.c.bf16 %v933_v40, %v932_v55  ;;  %v740_v39 = vadd.f32 %v739_v61, %v2608_v29 }
 0x2b8   :  { %v2068_v63 = vpop.eup %2067  ;;  %2073 = vpow2.f32 %v838_v62  ;;  %v742_v4 = vadd.f32 %v741_v37, %v2602_v7  ;;  %v743_v1 = vpop.f32.mrb[78].mxu1 }
 0x2b9   :  { %v745_v6 = vpop.f32.mrb[79].mxu1  ;;  %1883 = vmatprep.mubr.bf16.mxu0 %v952_v2  ;;  %v902_v10 = vmul.f32 %v2068_v63, %v870_v0  ;;  %v744_v44 = vadd.f32 %v743_v1, %v2608_v29 }
 0x2ba   :  { %v2070_v13 = vpop.eup %2069  ;;  %v778_v14 = vmul.f32 0.5, %v742_v4  ;;  %v746_v15 = vadd.f32 %v745_v6, %v2602_v7 }
 0x2bb   :  { %v903_v16 = vmul.f32 %v2070_v13, %v871_v5  ;;  %v934_v18 = vadd.f32 %v902_v10, %v720_v3 }
 0x2bc   :  { %v840_v20 = vmul.f32 1.442695, %v778_v14  ;;  %v779_v11 = vmul.f32 0.5, %v746_v15 }
 0x2bd   :  { %v935_v22 = vadd.f32 %v903_v16, %v724_v8 }
 0x2be   :  { %2075 = vpow2.f32 %v840_v20  ;;  %v842_v19 = vmul.f32 1.442695, %v779_v11 }
 0x2bf   :  { %v953_v24 = vpack.c.bf16 %v935_v22, %v934_v18 }
 0x2c0   :  { %v2072_v25 = vpop.eup %2071  ;;  %2077 = vpow2.f32 %v842_v19 }
 0x2c1   :  { %1884 = vmatmul.mubr.bf16.gmra.mrb[40].mxu0 %v953_v24  ;;  %v904_v7 = vmul.f32 %v2072_v25, %v872_v21 }
 0x2c2   :  { %v2074_v17 = vpop.eup %2073 }
 0x2c3   :  { %v905_v28 = vmul.f32 %v2074_v17, %v873_v23  ;;  %v936_v30 = vadd.f32 %v904_v7, %v730_v27 }
 0x2c5   :  { %v937_v32 = vadd.f32 %v905_v28, %v734_v26 }
 0x2c7   :  { %v954_v34 = vpack.c.bf16 %v937_v32, %v936_v30 }
 0x2c8   :  { %v2076_v35 = vpop.eup %2075 }
 0x2c9   :  { %1887 = vmatprep.mubr.bf16.mxu0 %v954_v34  ;;  %v906_v41 = vmul.f32 %v2076_v35, %v874_v33 }
 0x2ca   :  { %v2078_v36 = vpop.eup %2077 }
 0x2cb   :  { %v907_v45 = vmul.f32 %v2078_v36, %v875_v38  ;;  %v938_v42 = vadd.f32 %v906_v41, %v740_v39 }
 0x2cd   :  { %v939_v46 = vadd.f32 %v907_v45, %v744_v44 }
 0x2cf   :  { %v955_v31 = vpack.c.bf16 %v939_v46, %v938_v42 }
 0x2d1   :  { %1888 = vmatmul.mubr.bf16.gmra.mrb[44].mxu0 %v955_v31 }
 0x334   :  { %v1861_v49 = vpop.f32.mrb[16].mxu0 }
 0x335   :  { %v1070_v50 = vadd.f32 %v1861_v49, %v2694_v48  ;;  %v1061_v47 = vpop.f32.mrb[17].mxu0 }
 0x336   :  { %v1062_v51 = vadd.f32 %v2694_v48, %v1061_v47  ;;  %v1862_v43 = vpop.f32.mrb[18].mxu0 }
 0x337   :  { %v1073_v52 = vadd.f32 %v1862_v43, %v2694_v48  ;;  %v1064_v29 = vpop.f32.mrb[19].mxu0  ;;  %v1190_v54 = vmax.f32 %v1070_v50, 0.0 }
 0x338   :  { %v1065_v53 = vadd.f32 %v2694_v48, %v1064_v29  ;;  %v1188_v57 = vmax.f32 %v1062_v51, 0.0 }
 0x339   :  { %v1191_v56 = vmax.f32 %v1073_v52, 0.0 }
 0x33a   :  { %v1189_v58 = vmax.f32 %v1065_v53, 0.0 }
 0x33b   :  { %v1221_v55 = vpack.c.bf16 %v1191_v56, %v1190_v54 }
 0x33c   :  { %v1220_v60 = vpack.c.bf16 %v1189_v58, %v1188_v57 }
 0x33e   :  { %1907 = vmatprep.mubr.bf16.mxu0 %v1220_v60 }
 0x33f   :  { %1908 = vmatmul.mubr.bf16.vlgmr.msra.gmra.mrb[48].mxu0 %v1221_v55 }
 0x344   :  { %v1865_v9 = vpop.f32.mrb[20].mxu0 }
 0x345   :  { %v1086_v40 = vadd.f32 %v1865_v9, %v2694_v48  ;;  %v1077_v59 = vpop.f32.mrb[21].mxu0 }
 0x346   :  { %v1078_v62 = vadd.f32 %v2694_v48, %v1077_v59  ;;  %v1866_v61 = vpop.f32.mrb[22].mxu0 }
 0x347   :  { %v1089_v0 = vadd.f32 %v1866_v61, %v2694_v48  ;;  %v1080_v37 = vpop.f32.mrb[23].mxu0  ;;  %v1194_v63 = vmax.f32 %v1086_v40, 0.0 }
 0x348   :  { %v1081_v2 = vadd.f32 %v2694_v48, %v1080_v37  ;;  %v1192_v1 = vmax.f32 %v1078_v62, 0.0 }
 0x349   :  { %v1195_v4 = vmax.f32 %v1089_v0, 0.0 }
 0x34a   :  { %v1193_v5 = vmax.f32 %v1081_v2, 0.0 }
 0x34b   :  { %v1223_v3 = vpack.c.bf16 %v1195_v4, %v1194_v63 }
 0x34c   :  { %v1222_v6 = vpack.c.bf16 %v1193_v5, %v1192_v1 }
 0x34e   :  { %1911 = vmatprep.mubr.bf16.mxu0 %v1222_v6 }
 0x34f   :  { %1912 = vmatmul.mubr.bf16.gmra.mrb[52].mxu0 %v1223_v3 }
 0x354   :  { %v1869_v10 = vpop.f32.mrb[24].mxu0 }
 0x355   :  { %v1102_v12 = vadd.f32 %v1869_v10, %v2694_v48  ;;  %v1093_v13 = vpop.f32.mrb[25].mxu0 }
 0x356   :  { %v1094_v14 = vadd.f32 %v2694_v48, %v1093_v13  ;;  %v1870_v15 = vpop.f32.mrb[26].mxu0 }
 0x357   :  { %v1105_v8 = vadd.f32 %v1870_v15, %v2694_v48  ;;  %v1096_v16 = vpop.f32.mrb[27].mxu0  ;;  %v1198_v20 = vmax.f32 %v1102_v12, 0.0 }
 0x358   :  { %v1097_v18 = vadd.f32 %v2694_v48, %v1096_v16  ;;  %v1196_v22 = vmax.f32 %v1094_v14, 0.0 }
 0x359   :  { %v1199_v11 = vmax.f32 %v1105_v8, 0.0 }
 0x35a   :  { %v1197_v19 = vmax.f32 %v1097_v18, 0.0 }
 0x35b   :  { %v1225_v21 = vpack.c.bf16 %v1199_v11, %v1198_v20 }
 0x35c   :  { %v1224_v24 = vpack.c.bf16 %v1197_v19, %v1196_v22 }
 0x35e   :  { %1915 = vmatprep.mubr.bf16.mxu0 %v1224_v24 }
 0x35f   :  { %1916 = vmatmul.mubr.bf16.gmra.mrb[56].mxu0 %v1225_v21 }
 0x364   :  { %v1873_v25 = vpop.f32.mrb[28].mxu0 }
 0x365   :  { %v1118_v23 = vadd.f32 %v1873_v25, %v2694_v48  ;;  %v1109_v27 = vpop.f32.mrb[29].mxu0 }
 0x366   :  { %v1110_v7 = vadd.f32 %v2694_v48, %v1109_v27  ;;  %v1874_v17 = vpop.f32.mrb[30].mxu0 }
 0x367   :  { %v1121_v26 = vadd.f32 %v1874_v17, %v2694_v48  ;;  %v1112_v28 = vpop.f32.mrb[31].mxu0  ;;  %v1202_v32 = vmax.f32 %v1118_v23, 0.0 }
 0x368   :  { %v1113_v30 = vadd.f32 %v2694_v48, %v1112_v28  ;;  %v1200_v34 = vmax.f32 %v1110_v7, 0.0 }
 0x369   :  { %v1203_v33 = vmax.f32 %v1121_v26, 0.0 }
 0x36a   :  { %v1201_v35 = vmax.f32 %v1113_v30, 0.0  ;;  %v2731_v30 = vld [vmem:[%s2789_s9] ss:$0 sm:$0xff]  ;;  %s2382_s9 = smov [#allocation13]  }
 0x36b   :  { %v1227_v38 = vpack.c.bf16 %v1203_v33, %v1202_v32  ;;  %s1665_s5 = sshll.u32 %s2382_s9, 4  ;;  %s1666_s5 = int_to_ptr.vmem [resolvable:$true] %s1665_s5 }
 0x36c   :  { %v1226_v39 = vpack.c.bf16 %v1201_v35, %v1200_v34  ;;  %s2339_s28 = scalar_lea.vmem %s1666_s5, 4096  ;;  %p2344_p7 = scmp.lt.s32.totalorder %s1666_s5, %s1666_s5 }
 0x36d   :  { %p2340_p6 = scmp.ne.s32.totalorder %s1666_s5, %s2339_s28  ;;  %p2345_p8 = scmp.lt.s32.totalorder %s2339_s28, %s2339_s28 }
 0x36e   :  { %1919 = vmatprep.mubr.bf16.mxu0 %v1226_v39 }
 0x36f   :  { %1920 = vmatmul.mubr.bf16.gmra.mrb[60].mxu0 %v1227_v38  ;;  %p2346_p9 = por %p2345_p8, %p2344_p7 }
 0x371   :  { %p2347_p10 = pnand %p2346_p9, %p2340_p6 }
 0x374   :  { %v1877_v41 = vpop.f32.mrb[32].mxu0 }
 0x375   :  { %v1134_v36 = vadd.f32 %v1877_v41, %v2694_v48  ;;  %v1125_v44 = vpop.f32.mrb[33].mxu0 }
 0x376   :  { %v1126_v45 = vadd.f32 %v2694_v48, %v1125_v44  ;;  %v1878_v42 = vpop.f32.mrb[34].mxu0 }
 0x377   :  { %v1137_v46 = vadd.f32 %v1878_v42, %v2694_v48  ;;  %v1128_v31 = vpop.f32.mrb[35].mxu0  ;;  %v1206_v50 = vmax.f32 %v1134_v36, 0.0 }
 0x378   :  { %v1129_v49 = vadd.f32 %v2694_v48, %v1128_v31  ;;  %v1204_v51 = vmax.f32 %v1126_v45, 0.0 }
 0x379   :  { %v1207_v47 = vmax.f32 %v1137_v46, 0.0 }
 0x37a   :  { %v1205_v43 = vmax.f32 %v1129_v49, 0.0 }
 0x37b   :  { %v1229_v52 = vpack.c.bf16 %v1207_v47, %v1206_v50 }
 0x37c   :  { %v1228_v29 = vpack.c.bf16 %v1205_v43, %v1204_v51 }
 0x37e   :  { %1923 = vmatprep.mubr.bf16.mxu0 %v1228_v29 }
 0x37f   :  { %1924 = vmatmul.mubr.bf16.gmra.mrb[64].mxu0 %v1229_v52 }
 0x384   :  { %v1881_v53 = vpop.f32.mrb[36].mxu0 }
 0x385   :  { %v1150_v54 = vadd.f32 %v1881_v53, %v2694_v48  ;;  %v1141_v56 = vpop.f32.mrb[37].mxu0 }
 0x386   :  { %v1142_v57 = vadd.f32 %v2694_v48, %v1141_v56  ;;  %v1882_v58 = vpop.f32.mrb[38].mxu0 }
 0x387   :  { %v1153_v55 = vadd.f32 %v1882_v58, %v2694_v48  ;;  %v1144_v60 = vpop.f32.mrb[39].mxu0  ;;  %v1210_v40 = vmax.f32 %v1150_v54, 0.0 }
 0x388   :  { %v1145_v9 = vadd.f32 %v2694_v48, %v1144_v60  ;;  %v1208_v62 = vmax.f32 %v1142_v57, 0.0 }
 0x389   :  { %v1211_v59 = vmax.f32 %v1153_v55, 0.0 }
 0x38a   :  { %v1209_v61 = vmax.f32 %v1145_v9, 0.0 }
 0x38b   :  { %v1231_v0 = vpack.c.bf16 %v1211_v59, %v1210_v40 }
 0x38c   :  { %v1230_v37 = vpack.c.bf16 %v1209_v61, %v1208_v62 }
 0x38e   :  { %1927 = vmatprep.mubr.bf16.mxu0 %v1230_v37 }
 0x38f   :  { %1928 = vmatmul.mubr.bf16.gmra.mrb[68].mxu0 %v1231_v0 }
 0x394   :  { %v1885_v2 = vpop.f32.mrb[40].mxu0 }
 0x395   :  { %v1166_v63 = vadd.f32 %v1885_v2, %v2694_v48  ;;  %v1157_v4 = vpop.f32.mrb[41].mxu0 }
 0x396   :  { %v1158_v1 = vadd.f32 %v2694_v48, %v1157_v4  ;;  %v1886_v5 = vpop.f32.mrb[42].mxu0 }
 0x397   :  { %v1169_v3 = vadd.f32 %v1886_v5, %v2694_v48  ;;  %v1160_v6 = vpop.f32.mrb[43].mxu0  ;;  %v1214_v12 = vmax.f32 %v1166_v63, 0.0 }
 0x398   :  { %v1161_v10 = vadd.f32 %v2694_v48, %v1160_v6  ;;  %v1212_v14 = vmax.f32 %v1158_v1, 0.0 }
 0x399   :  { %v1215_v13 = vmax.f32 %v1169_v3, 0.0 }
 0x39a   :  { %v1213_v15 = vmax.f32 %v1161_v10, 0.0 }
 0x39b   :  { %v1233_v8 = vpack.c.bf16 %v1215_v13, %v1214_v12 }
 0x39c   :  { %v1232_v16 = vpack.c.bf16 %v1213_v15, %v1212_v14 }
 0x39e   :  { %1931 = vmatprep.mubr.bf16.mxu0 %v1232_v16 }
 0x39f   :  { %1932 = vmatmul.mubr.bf16.gmra.mrb[72].mxu0 %v1233_v8 }
 0x3a4   :  { %v1889_v18 = vpop.f32.mrb[44].mxu0 }
 0x3a5   :  { %v1182_v20 = vadd.f32 %v1889_v18, %v2694_v48  ;;  %v1173_v11 = vpop.f32.mrb[45].mxu0 }
 0x3a6   :  { %v1174_v22 = vadd.f32 %v2694_v48, %v1173_v11  ;;  %v1890_v19 = vpop.f32.mrb[46].mxu0 }
 0x3a7   :  { %v1185_v21 = vadd.f32 %v1890_v19, %v2694_v48  ;;  %v1176_v24 = vpop.f32.mrb[47].mxu0  ;;  %v1218_v23 = vmax.f32 %v1182_v20, 0.0 }
 0x3a8   :  { %v1177_v25 = vadd.f32 %v2694_v48, %v1176_v24  ;;  %v1216_v7 = vmax.f32 %v1174_v22, 0.0 }
 0x3a9   :  { %v1219_v27 = vmax.f32 %v1185_v21, 0.0 }
 0x3aa   :  { %v1217_v17 = vmax.f32 %v1177_v25, 0.0 }
 0x3ab   :  { %v1235_v26 = vpack.c.bf16 %v1219_v27, %v1218_v23 }
 0x3ac   :  { %v1234_v28 = vpack.c.bf16 %v1217_v17, %v1216_v7 }
 0x3ae   :  { %1935 = vmatprep.mubr.bf16.mxu0 %v1234_v28 }
 0x3af   :  { %1936 = vmatmul.mubr.bf16.gmra.mrb[76].mxu0 %v1235_v26 }
 0x412   :  { %v1909_v32 = vpop.f32.mrb[48].mxu0 }
 0x413   :  { %v1350_v33 = vadd.f32 %v1909_v32, %v2731_v30  ;;  %v1341_v34 = vpop.f32.mrb[49].mxu0 }
 0x414   :  { %v1342_v35 = vadd.f32 %v2731_v30, %v1341_v34  ;;  %v1910_v48 = vpop.f32.mrb[50].mxu0 }
 0x415   :  { %v1470_v38 = vsub.f32 0.0, %v1350_v33  ;;  %v1353_v39 = vadd.f32 %v1910_v48, %v2731_v30  ;;  %v1344_v41 = vpop.f32.mrb[51].mxu0 }
 0x416   :  { %v1468_v36 = vsub.f32 0.0, %v1342_v35  ;;  %v1345_v44 = vadd.f32 %v2731_v30, %v1344_v41 }
 0x417   :  { %v1504_v45 = vmul.f32 1.442695, %v1470_v38  ;;  %v1471_v42 = vsub.f32 0.0, %v1353_v39 }
 0x418   :  { %v1500_v46 = vmul.f32 1.442695, %v1468_v36  ;;  %v1469_v31 = vsub.f32 0.0, %v1345_v44 }
 0x419   :  { %2079 = vpow2.f32 %v1504_v45  ;;  %v1506_v49 = vmul.f32 1.442695, %v1471_v42 }
 0x41a   :  { %2081 = vpow2.f32 %v1500_v46  ;;  %v1502_v50 = vmul.f32 1.442695, %v1469_v31 }
 0x41b   :  { %2083 = vpow2.f32 %v1506_v49 }
 0x41c   :  { %2085 = vpow2.f32 %v1502_v50 }
 0x422   :  { %v1913_v47 = vpop.f32.mrb[52].mxu0 }
 0x423   :  { %v2080_v51 = vpop.eup %2079  ;;  %v1366_v43 = vadd.f32 %v1913_v47, %v2731_v30  ;;  %v1357_v52 = vpop.f32.mrb[53].mxu0 }
 0x424   :  { %v2082_v29 = vpop.eup %2081  ;;  %v1566_v53 = vadd.f32 1.0, %v2080_v51  ;;  %v1358_v54 = vadd.f32 %v2731_v30, %v1357_v52  ;;  %v1914_v56 = vpop.f32.mrb[54].mxu0 }
 0x425   :  { %v2084_v57 = vpop.eup %2083  ;;  %v1564_v58 = vadd.f32 1.0, %v2082_v29  ;;  %v1474_v55 = vsub.f32 0.0, %v1366_v43  ;;  %v1369_v60 = vadd.f32 %v1914_v56, %v2731_v30  ;;  %v1360_v9 = vpop.f32.mrb[55].mxu0 }
 0x426   :  { %v2086_v40 = vpop.eup %2085  ;;  %2087 = vrcp.f32 %v1566_v53  ;;  %v1567_v59 = vadd.f32 1.0, %v2084_v57  ;;  %v1472_v62 = vsub.f32 0.0, %v1358_v54  ;;  %v1361_v61 = vadd.f32 %v2731_v30, %v1360_v9 }
 0x427   :  { %2089 = vrcp.f32 %v1564_v58  ;;  %v1565_v0 = vadd.f32 1.0, %v2086_v40  ;;  %v1512_v37 = vmul.f32 1.442695, %v1474_v55  ;;  %v1475_v2 = vsub.f32 0.0, %v1369_v60 }
 0x428   :  { %2091 = vrcp.f32 %v1567_v59  ;;  %v1508_v63 = vmul.f32 1.442695, %v1472_v62  ;;  %v1473_v4 = vsub.f32 0.0, %v1361_v61 }
 0x429   :  { %2093 = vrcp.f32 %v1565_v0  ;;  %v1514_v1 = vmul.f32 1.442695, %v1475_v2 }
 0x42a   :  { %2095 = vpow2.f32 %v1512_v37  ;;  %v1510_v5 = vmul.f32 1.442695, %v1473_v4 }
 0x42b   :  { %2097 = vpow2.f32 %v1508_v63 }
 0x42c   :  { %2099 = vpow2.f32 %v1514_v1 }
 0x42d   :  { %2101 = vpow2.f32 %v1510_v5 }
 0x430   :  { %v2088_v3 = vpop.eup %2087 }
 0x431   :  { %v2090_v6 = vpop.eup %2089  ;;  %1630 = vst [vmem:[#allocation13 + $0x10] sm:$0xff] %v2088_v3 }
 0x432   :  { %v2092_v10 = vpop.eup %2091  ;;  %1628 = vst [vmem:[#allocation13] sm:$0xff] %v2090_v6  ;;  %v1917_v12 = vpop.f32.mrb[56].mxu0 }
 0x433   :  { %v2094_v13 = vpop.eup %2093  ;;  %1631 = vst [vmem:[#allocation13 + $0x18] sm:$0xff] %v2092_v10  ;;  %v1382_v14 = vadd.f32 %v1917_v12, %v2731_v30  ;;  %v1373_v15 = vpop.f32.mrb[57].mxu0 }
 0x434   :  { %v2096_v8 = vpop.eup %2095  ;;  %1629 = vst [vmem:[#allocation13 + $0x8] sm:$0xff] %v2094_v13  ;;  %v1374_v16 = vadd.f32 %v2731_v30, %v1373_v15  ;;  %v1918_v18 = vpop.f32.mrb[58].mxu0 }
 0x435   :  { %v2098_v20 = vpop.eup %2097  ;;  %v1570_v11 = vadd.f32 1.0, %v2096_v8  ;;  %v1478_v22 = vsub.f32 0.0, %v1382_v14  ;;  %v1385_v19 = vadd.f32 %v1918_v18, %v2731_v30  ;;  %v1376_v21 = vpop.f32.mrb[59].mxu0 }
 0x436   :  { %v2100_v24 = vpop.eup %2099  ;;  %v1568_v25 = vadd.f32 1.0, %v2098_v20  ;;  %v1476_v23 = vsub.f32 0.0, %v1374_v16  ;;  %v1377_v27 = vadd.f32 %v2731_v30, %v1376_v21 }
 0x437   :  { %v2102_v7 = vpop.eup %2101  ;;  %2103 = vrcp.f32 %v1570_v11  ;;  %v1571_v17 = vadd.f32 1.0, %v2100_v24  ;;  %v1520_v26 = vmul.f32 1.442695, %v1478_v22  ;;  %v1479_v28 = vsub.f32 0.0, %v1385_v19 }
 0x438   :  { %2105 = vrcp.f32 %v1568_v25  ;;  %v1569_v32 = vadd.f32 1.0, %v2102_v7  ;;  %v1516_v33 = vmul.f32 1.442695, %v1476_v23  ;;  %v1477_v34 = vsub.f32 0.0, %v1377_v27 }
 0x439   :  { %2107 = vrcp.f32 %v1571_v17  ;;  %v1522_v35 = vmul.f32 1.442695, %v1479_v28 }
 0x43a   :  { %2109 = vrcp.f32 %v1569_v32  ;;  %v1518_v48 = vmul.f32 1.442695, %v1477_v34 }
 0x43b   :  { %2111 = vpow2.f32 %v1520_v26 }
 0x43c   :  { %2113 = vpow2.f32 %v1516_v33 }
 0x43d   :  { %2115 = vpow2.f32 %v1522_v35 }
 0x43e   :  { %2117 = vpow2.f32 %v1518_v48 }
 0x441   :  { %v2104_v38 = vpop.eup %2103 }
 0x442   :  { %v2106_v39 = vpop.eup %2105  ;;  %1634 = vst [vmem:[#allocation13 + $0x30] sm:$0xff] %v2104_v38  ;;  %v1921_v41 = vpop.f32.mrb[60].mxu0 }
 0x443   :  { %v2108_v36 = vpop.eup %2107  ;;  %1632 = vst [vmem:[#allocation13 + $0x20] sm:$0xff] %v2106_v39  ;;  %v1398_v44 = vadd.f32 %v1921_v41, %v2731_v30  ;;  %v1389_v45 = vpop.f32.mrb[61].mxu0 }
 0x444   :  { %v2110_v42 = vpop.eup %2109  ;;  %1635 = vst [vmem:[#allocation13 + $0x38] sm:$0xff] %v2108_v36  ;;  %v1390_v46 = vadd.f32 %v2731_v30, %v1389_v45  ;;  %v1922_v31 = vpop.f32.mrb[62].mxu0 }
 0x445   :  { %v2112_v49 = vpop.eup %2111  ;;  %1633 = vst [vmem:[#allocation13 + $0x28] sm:$0xff] %v2110_v42  ;;  %v1482_v50 = vsub.f32 0.0, %v1398_v44  ;;  %v1401_v47 = vadd.f32 %v1922_v31, %v2731_v30  ;;  %v1392_v51 = vpop.f32.mrb[63].mxu0 }
 0x446   :  { %v2114_v43 = vpop.eup %2113  ;;  %v1574_v52 = vadd.f32 1.0, %v2112_v49  ;;  %v1480_v29 = vsub.f32 0.0, %v1390_v46  ;;  %v1393_v53 = vadd.f32 %v2731_v30, %v1392_v51 }
 0x447   :  { %v2116_v54 = vpop.eup %2115  ;;  %v1572_v56 = vadd.f32 1.0, %v2114_v43  ;;  %v1483_v57 = vsub.f32 0.0, %v1401_v47  ;;  %v1528_v60 = vmul.f32 1.442695, %v1482_v50 }
 0x448   :  { %v2118_v58 = vpop.eup %2117  ;;  %2119 = vrcp.f32 %v1574_v52  ;;  %v1575_v55 = vadd.f32 1.0, %v2116_v54  ;;  %v1481_v9 = vsub.f32 0.0, %v1393_v53  ;;  %v1524_v59 = vmul.f32 1.442695, %v1480_v29 }
 0x449   :  { %2121 = vrcp.f32 %v1572_v56  ;;  %v1573_v40 = vadd.f32 1.0, %v2118_v58  ;;  %v1530_v62 = vmul.f32 1.442695, %v1483_v57 }
 0x44a   :  { %2123 = vrcp.f32 %v1575_v55  ;;  %v1526_v61 = vmul.f32 1.442695, %v1481_v9 }
 0x44b   :  { %2125 = vrcp.f32 %v1573_v40 }
 0x44c   :  { %2127 = vpow2.f32 %v1528_v60 }
 0x44d   :  { %2129 = vpow2.f32 %v1524_v59 }
 0x44e   :  { %2131 = vpow2.f32 %v1530_v62 }
 0x44f   :  { %2133 = vpow2.f32 %v1526_v61 }
 0x452   :  { %v2120_v0 = vpop.eup %2119  ;;  %v1925_v37 = vpop.f32.mrb[64].mxu0 }
 0x453   :  { %v2122_v2 = vpop.eup %2121  ;;  %1638 = vst [vmem:[#allocation13 + $0x50] sm:$0xff] %v2120_v0  ;;  %v1414_v63 = vadd.f32 %v1925_v37, %v2731_v30  ;;  %v1405_v4 = vpop.f32.mrb[65].mxu0 }
 0x454   :  { %v2124_v1 = vpop.eup %2123  ;;  %1636 = vst [vmem:[#allocation13 + $0x40] sm:$0xff] %v2122_v2  ;;  %v1406_v5 = vadd.f32 %v2731_v30, %v1405_v4  ;;  %v1926_v3 = vpop.f32.mrb[66].mxu0 }
 0x455   :  { %v2126_v6 = vpop.eup %2125  ;;  %1639 = vst [vmem:[#allocation13 + $0x58] sm:$0xff] %v2124_v1  ;;  %v1486_v10 = vsub.f32 0.0, %v1414_v63  ;;  %v1417_v12 = vadd.f32 %v1926_v3, %v2731_v30  ;;  %v1408_v13 = vpop.f32.mrb[67].mxu0 }
 0x456   :  { %v2128_v14 = vpop.eup %2127  ;;  %1637 = vst [vmem:[#allocation13 + $0x48] sm:$0xff] %v2126_v6  ;;  %v1484_v15 = vsub.f32 0.0, %v1406_v5  ;;  %v1409_v8 = vadd.f32 %v2731_v30, %v1408_v13 }
 0x457   :  { %v2130_v16 = vpop.eup %2129  ;;  %v1578_v18 = vadd.f32 1.0, %v2128_v14  ;;  %v1487_v20 = vsub.f32 0.0, %v1417_v12  ;;  %v1536_v25 = vmul.f32 1.442695, %v1486_v10 }
 0x458   :  { %v2132_v11 = vpop.eup %2131  ;;  %v1576_v22 = vadd.f32 1.0, %v2130_v16  ;;  %v1485_v19 = vsub.f32 0.0, %v1409_v8  ;;  %v1532_v27 = vmul.f32 1.442695, %v1484_v15 }
 0x459   :  { %v2134_v21 = vpop.eup %2133  ;;  %2135 = vrcp.f32 %v1578_v18  ;;  %v1579_v24 = vadd.f32 1.0, %v2132_v11  ;;  %v1538_v7 = vmul.f32 1.442695, %v1487_v20 }
 0x45a   :  { %2137 = vrcp.f32 %v1576_v22  ;;  %v1577_v23 = vadd.f32 1.0, %v2134_v21  ;;  %v1534_v17 = vmul.f32 1.442695, %v1485_v19 }
 0x45b   :  { %2139 = vrcp.f32 %v1579_v24 }
 0x45c   :  { %2141 = vrcp.f32 %v1577_v23 }
 0x45d   :  { %2143 = vpow2.f32 %v1536_v25 }
 0x45e   :  { %2145 = vpow2.f32 %v1532_v27 }
 0x45f   :  { %2147 = vpow2.f32 %v1538_v7 }
 0x460   :  { %2149 = vpow2.f32 %v1534_v17 }
 0x462   :  { %v1929_v26 = vpop.f32.mrb[68].mxu0 }
 0x463   :  { %v2136_v28 = vpop.eup %2135  ;;  %v1430_v32 = vadd.f32 %v1929_v26, %v2731_v30  ;;  %v1421_v33 = vpop.f32.mrb[69].mxu0 }
 0x464   :  { %v2138_v34 = vpop.eup %2137  ;;  %1642 = vst [vmem:[#allocation13 + $0x70] sm:$0xff] %v2136_v28  ;;  %v1422_v35 = vadd.f32 %v2731_v30, %v1421_v33  ;;  %v1930_v48 = vpop.f32.mrb[70].mxu0 }
 0x465   :  { %v2140_v38 = vpop.eup %2139  ;;  %1640 = vst [vmem:[#allocation13 + $0x60] sm:$0xff] %v2138_v34  ;;  %v1490_v39 = vsub.f32 0.0, %v1430_v32  ;;  %v1433_v41 = vadd.f32 %v1930_v48, %v2731_v30  ;;  %v1424_v36 = vpop.f32.mrb[71].mxu0 }
 0x466   :  { %v2142_v44 = vpop.eup %2141  ;;  %1643 = vst [vmem:[#allocation13 + $0x78] sm:$0xff] %v2140_v38  ;;  %v1488_v45 = vsub.f32 0.0, %v1422_v35  ;;  %v1425_v42 = vadd.f32 %v2731_v30, %v1424_v36 }
 0x467   :  { %v2144_v46 = vpop.eup %2143  ;;  %1641 = vst [vmem:[#allocation13 + $0x68] sm:$0xff] %v2142_v44  ;;  %v1544_v31 = vmul.f32 1.442695, %v1490_v39  ;;  %v1491_v49 = vsub.f32 0.0, %v1433_v41 }
 0x468   :  { %v2146_v50 = vpop.eup %2145  ;;  %v1582_v47 = vadd.f32 1.0, %v2144_v46  ;;  %v1489_v51 = vsub.f32 0.0, %v1425_v42  ;;  %v1540_v54 = vmul.f32 1.442695, %v1488_v45 }
 0x469   :  { %v2148_v43 = vpop.eup %2147  ;;  %v1580_v52 = vadd.f32 1.0, %v2146_v50  ;;  %2151 = vpow2.f32 %v1544_v31  ;;  %v1546_v57 = vmul.f32 1.442695, %v1491_v49 }
 0x46a   :  { %v2150_v29 = vpop.eup %2149  ;;  %2153 = vrcp.f32 %v1582_v47  ;;  %v1583_v53 = vadd.f32 1.0, %v2148_v43  ;;  %v1542_v58 = vmul.f32 1.442695, %v1489_v51 }
 0x46b   :  { %2155 = vrcp.f32 %v1580_v52  ;;  %v1581_v56 = vadd.f32 1.0, %v2150_v29 }
 0x46c   :  { %2157 = vrcp.f32 %v1583_v53 }
 0x46d   :  { %2159 = vrcp.f32 %v1581_v56 }
 0x46e   :  { %2161 = vpow2.f32 %v1540_v54 }
 0x46f   :  { %2163 = vpow2.f32 %v1546_v57 }
 0x470   :  { %2165 = vpow2.f32 %v1542_v58 }
 0x472   :  { %v1933_v55 = vpop.f32.mrb[72].mxu0 }
 0x473   :  { %v2152_v60 = vpop.eup %2151  ;;  %v1446_v9 = vadd.f32 %v1933_v55, %v2731_v30  ;;  %v1437_v40 = vpop.f32.mrb[73].mxu0 }
 0x474   :  { %v2154_v59 = vpop.eup %2153  ;;  %v1586_v62 = vadd.f32 1.0, %v2152_v60  ;;  %v1438_v61 = vadd.f32 %v2731_v30, %v1437_v40  ;;  %v1934_v0 = vpop.f32.mrb[74].mxu0 }
 0x475   :  { %v2156_v37 = vpop.eup %2155  ;;  %1646 = vst [vmem:[#allocation13 + $0x90] sm:$0xff] %v2154_v59  ;;  %v1494_v2 = vsub.f32 0.0, %v1446_v9  ;;  %v1449_v63 = vadd.f32 %v1934_v0, %v2731_v30  ;;  %v1440_v4 = vpop.f32.mrb[75].mxu0 }
 0x476   :  { %v2158_v1 = vpop.eup %2157  ;;  %1644 = vst [vmem:[#allocation13 + $0x80] sm:$0xff] %v2156_v37  ;;  %2167 = vrcp.f32 %v1586_v62  ;;  %v1492_v5 = vsub.f32 0.0, %v1438_v61  ;;  %v1441_v3 = vadd.f32 %v2731_v30, %v1440_v4 }
 0x477   :  { %v2160_v6 = vpop.eup %2159  ;;  %1647 = vst [vmem:[#allocation13 + $0x98] sm:$0xff] %v2158_v1  ;;  %v1552_v10 = vmul.f32 1.442695, %v1494_v2  ;;  %v1495_v12 = vsub.f32 0.0, %v1449_v63 }
 0x478   :  { %v2162_v13 = vpop.eup %2161  ;;  %1645 = vst [vmem:[#allocation13 + $0x88] sm:$0xff] %v2160_v6  ;;  %v1548_v14 = vmul.f32 1.442695, %v1492_v5  ;;  %v1493_v15 = vsub.f32 0.0, %v1441_v3 }
 0x479   :  { %v2164_v8 = vpop.eup %2163  ;;  %v1584_v16 = vadd.f32 1.0, %v2162_v13  ;;  %2169 = vpow2.f32 %v1552_v10  ;;  %v1554_v11 = vmul.f32 1.442695, %v1495_v12 }
 0x47a   :  { %v2166_v18 = vpop.eup %2165  ;;  %v1587_v20 = vadd.f32 1.0, %v2164_v8  ;;  %2171 = vpow2.f32 %v1548_v14  ;;  %v1550_v19 = vmul.f32 1.442695, %v1493_v15 }
 0x47b   :  { %2173 = vrcp.f32 %v1584_v16  ;;  %v1585_v22 = vadd.f32 1.0, %v2166_v18 }
 0x47c   :  { %2175 = vrcp.f32 %v1587_v20 }
 0x47d   :  { %2177 = vrcp.f32 %v1585_v22 }
 0x47e   :  { %2179 = vpow2.f32 %v1554_v11 }
 0x47f   :  { %2181 = vpow2.f32 %v1550_v19 }
 0x480   :  { %v2168_v21 = vpop.eup %2167 }
 0x481   :  { %1650 = vst [vmem:[#allocation13 + $0xb0] sm:$0xff] %v2168_v21 }
 0x482   :  { %v1937_v24 = vpop.f32.mrb[76].mxu0 }
 0x483   :  { %v2170_v25 = vpop.eup %2169  ;;  %v1462_v23 = vadd.f32 %v1937_v24, %v2731_v30  ;;  %v1453_v27 = vpop.f32.mrb[77].mxu0 }
 0x484   :  { %v2172_v7 = vpop.eup %2171  ;;  %v1590_v17 = vadd.f32 1.0, %v2170_v25  ;;  %v1454_v26 = vadd.f32 %v2731_v30, %v1453_v27  ;;  %v1938_v28 = vpop.f32.mrb[78].mxu0 }
 0x485   :  { %v2174_v32 = vpop.eup %2173  ;;  %v1588_v33 = vadd.f32 1.0, %v2172_v7  ;;  %v1498_v34 = vsub.f32 0.0, %v1462_v23  ;;  %v1465_v35 = vadd.f32 %v1938_v28, %v2731_v30  ;;  %v1456_v48 = vpop.f32.mrb[79].mxu0 }
 0x486   :  { %v2176_v38 = vpop.eup %2175  ;;  %1648 = vst [vmem:[#allocation13 + $0xa0] sm:$0xff] %v2174_v32  ;;  %2183 = vrcp.f32 %v1590_v17  ;;  %v1496_v39 = vsub.f32 0.0, %v1454_v26  ;;  %v1457_v41 = vadd.f32 %v2731_v30, %v1456_v48 }
 0x487   :  { %v2178_v36 = vpop.eup %2177  ;;  %1651 = vst [vmem:[#allocation13 + $0xb8] sm:$0xff] %v2176_v38  ;;  %2185 = vrcp.f32 %v1588_v33  ;;  %v1560_v44 = vmul.f32 1.442695, %v1498_v34  ;;  %v1499_v45 = vsub.f32 0.0, %v1465_v35 }
 0x488   :  { %v2180_v42 = vpop.eup %2179  ;;  %1649 = vst [vmem:[#allocation13 + $0xa8] sm:$0xff] %v2178_v36  ;;  %v1556_v46 = vmul.f32 1.442695, %v1496_v39  ;;  %v1497_v31 = vsub.f32 0.0, %v1457_v41 }
 0x489   :  { %v2182_v49 = vpop.eup %2181  ;;  %v1591_v50 = vadd.f32 1.0, %v2180_v42  ;;  %2187 = vpow2.f32 %v1560_v44  ;;  %v1562_v47 = vmul.f32 1.442695, %v1499_v45 }
 0x48a   :  { %v1589_v51 = vadd.f32 1.0, %v2182_v49  ;;  %2189 = vpow2.f32 %v1556_v46  ;;  %v1558_v43 = vmul.f32 1.442695, %v1497_v31 }
 0x48b   :  { %2191 = vrcp.f32 %v1591_v50 }
 0x48c   :  { %2193 = vrcp.f32 %v1589_v51 }
 0x48d   :  { %2195 = vpow2.f32 %v1562_v47 }
 0x48e   :  { %2197 = vpow2.f32 %v1558_v43 }
 0x490   :  { %v2184_v30 = vpop.eup %2183 }
 0x491   :  { %v2186_v52 = vpop.eup %2185  ;;  %1654 = vst [vmem:[#allocation13 + $0xd0] sm:$0xff] %v2184_v30 }
 0x492   :  { %1652 = vst [vmem:[#allocation13 + $0xc0] sm:$0xff] %v2186_v52 }
 0x493   :  { %v2188_v29 = vpop.eup %2187 }
 0x494   :  { %v2190_v53 = vpop.eup %2189  ;;  %v1594_v54 = vadd.f32 1.0, %v2188_v29 }
 0x495   :  { %v2192_v56 = vpop.eup %2191  ;;  %v1592_v57 = vadd.f32 1.0, %v2190_v53 }
 0x496   :  { %v2194_v58 = vpop.eup %2193  ;;  %1655 = vst [vmem:[#allocation13 + $0xd8] sm:$0xff] %v2192_v56  ;;  %2199 = vrcp.f32 %v1594_v54 }
 0x497   :  { %v2196_v55 = vpop.eup %2195  ;;  %1653 = vst [vmem:[#allocation13 + $0xc8] sm:$0xff] %v2194_v58  ;;  %2201 = vrcp.f32 %v1592_v57 }
 0x498   :  { %v2198_v60 = vpop.eup %2197  ;;  %v1595_v9 = vadd.f32 1.0, %v2196_v55 }
 0x499   :  { %v1593_v40 = vadd.f32 1.0, %v2198_v60 }
 0x49a   :  { %2203 = vrcp.f32 %v1595_v9 }
 0x49b   :  { %2205 = vrcp.f32 %v1593_v40 }
 0x4a0   :  { %v2200_v59 = vpop.eup %2199 }
 0x4a1   :  { %v2202_v62 = vpop.eup %2201  ;;  %1658 = vst [vmem:[#allocation13 + $0xf0] sm:$0xff] %v2200_v59 }
 0x4a2   :  { %1656 = vst [vmem:[#allocation13 + $0xe0] sm:$0xff] %v2202_v62 }
 0x4a4   :  { %v2204_v61 = vpop.eup %2203 }
 0x4a5   :  { %v2206_v0 = vpop.eup %2205  ;;  %1659 = vst [vmem:[#allocation13 + $0xf8] sm:$0xff] %v2204_v61 }
 0x4a6   :  { %1657 = vst [vmem:[#allocation13 + $0xe8] sm:$0xff] %v2206_v0 }
 0x4a7   :  { %2350 = shalt.err (!%p2347_p10)
}
 0x4a8   :  { %s2351_s1 = scalar_lea.hbm %s2790_s10, 4096 }
 0x4a9   :  { %p2352_p11 = scmp.ne.s32.totalorder %s2790_s10, %s2351_s1  ;;  %p2355_p12 = scmp.lt.u32.totalorder %s2351_s1, %s2790_s10 }
 0x4ab   :  { %p2357_p13 = pnand %p2355_p12, %p2352_p11 }
 0x4ad   :  { %2360 = shalt.err (!%p2357_p13)
}
 0x4ae   :  { %1671 = dma.vmem_to_hbm [thread:$0]  %s1666_s5, 4096, %s2790_s10, [#allocation4], %s2376_s14, %s2376_s14, %s2377_s19  }
 0x4af   :  { %2369 = dma.done.wait [#allocation4], 4096  }
 0x4b0   :  { %2370 = vsyncadd [#allocation4], 4294963200 }
 0x4b1   :  { %1675 = vsyncpa [#allocation3], 1 }
 0x4b2   :  { %1676 = vsyncpa [#allocation6], 1 }
 0x4b3   :  { %1677 = vsyncpa [#allocation9], 1 }
 0x4b4   :  { %1678 = vsyncpa [#allocation12], 1 }
 0x4b5   :  { %1679 = vsyncpa [#allocation4], 1 }

// kernel: tpu_custom_call.1
= control target key start
LH: loop header
LB: loop body
LE: loop exit
PB: predicated region body
PF: predicated region fallthrough
CT: control target
= control target key end

     0   :  { %15 = vsyncpa [#allocation3], 0  ;;  %s2780_s0 = inlined_call_operand.hbm [shape: f32[256,128], index: 0, kind: input, shape index: {}]   ;;  %s2781_s1 = inlined_call_operand.hbm [shape: bf16[128,128], index: 1, kind: input, shape index: {}]   ;;  %s2782_s2 = inlined_call_operand.vmem [shape: f32[1,128], index: 2, kind: input, shape index: {}]   ;;  %s2783_s3 = inlined_call_operand.hbm [shape: bf16[128,256], index: 3, kind: input, shape index: {}]   ;;  %s2784_s4 = inlined_call_operand.vmem [shape: f32[1,256], index: 4, kind: input, shape index: {}]   ;;  %s2785_s5 = inlined_call_operand.hbm [shape: f32[256,128], index: 5, kind: input, shape index: {}]   ;;  %s2786_s6 = inlined_call_operand.hbm [shape: bf16[128,128], index: 6, kind: input, shape index: {}]   ;;  %s2787_s7 = inlined_call_operand.vmem [shape: f32[1,128], index: 7, kind: input, shape index: {}]   ;;  %s2788_s8 = inlined_call_operand.hbm [shape: bf16[128,128], index: 8, kind: input, shape index: {}]   ;;  %s2789_s9 = inlined_call_operand.vmem [shape: f32[1,128], index: 9, kind: input, shape index: {}]   ;;  %s2790_s10 = inlined_call_operand.hbm [shape: f32[256,128], index: 10, kind: output, shape index: {}]  }
   0x1   :  { %16 = vsyncpa [#allocation6], 0 }
   0x2   :  { %17 = vsyncpa [#allocation9], 0 }
   0x3   :  { %18 = vsyncpa [#allocation12], 0 }
   0x4   :  { %19 = vsyncpa [#allocation4], 0  ;;  %s2371_s13 = smov [#allocation5]   ;;  %s2207_s17 = scalar_lea.hbm %s2781_s1, 1024 }
   0x5   :  { %s37_s14 = sshll.u32 %s2371_s13, 4  ;;  %p2208_p0 = scmp.ne.s32.totalorder %s2781_s1, %s2207_s17  ;;  %s38_s14 = int_to_ptr.vmem [resolvable:$true] %s37_s14 }
   0x6   :  { %p2211_p1 = scmp.lt.u32.totalorder %s2207_s17, %s2781_s1 }
   0x8   :  { %p2213_p2 = pnand %p2211_p1, %p2208_p0 }
   0xa   :  { %2216 = shalt.err (!%p2213_p2)
}
   0xb   :  { %s2217_s22 = scalar_lea.vmem %s38_s14, 1024  ;;  %p2222_p4 = scmp.lt.s32.totalorder %s38_s14, %s38_s14 }
   0xc   :  { %p2218_p3 = scmp.ne.s32.totalorder %s38_s14, %s2217_s22  ;;  %p2223_p5 = scmp.lt.s32.totalorder %s2217_s22, %s2217_s22 }
   0xe   :  { %p2224_p6 = por %p2223_p5, %p2222_p4 }
  0x10   :  { %p2225_p7 = pnand %p2224_p6, %p2218_p3 }
  0x12   :  { %2228 = shalt.err (!%p2225_p7)
}
  0x13   :  { %s2372_s23 = smov 64   ;;  %s2373_s24 = smov 4  }
  0x14   :  { %43 = dma.hbm_to_vmem [thread:$0]  %s2781_s1, 1024, %s38_s14, [#allocation6], %s2372_s23, %s2372_s23, %s2373_s24  }
  0x15   :  { %s2374_s27 = smov [#allocation8]   ;;  %s2375_s29 = smov [#allocation2]  }
  0x16   :  { %s65_s28 = sshll.u32 %s2374_s27, 4  ;;  %s25_s30 = sshll.u32 %s2375_s29, 4  ;;  %s66_s28 = int_to_ptr.vmem [resolvable:$true] %s65_s28  ;;  %s26_s30 = int_to_ptr.vmem [resolvable:$true] %s25_s30 }
  0x17   :  { %s2229_s13 = scalar_lea.hbm %s2785_s5, 4096 }
  0x18   :  { %p2230_p8 = scmp.ne.s32.totalorder %s2785_s5, %s2229_s13  ;;  %p2233_p9 = scmp.lt.u32.totalorder %s2229_s13, %s2785_s5 }
  0x1a   :  { %p2235_p10 = pnand %p2233_p9, %p2230_p8 }
  0x1c   :  { %2238 = shalt.err (!%p2235_p10)
}
  0x1d   :  { %s2239_s1 = scalar_lea.vmem %s66_s28, 4096  ;;  %p2244_p12 = scmp.lt.s32.totalorder %s66_s28, %s66_s28 }
  0x1e   :  { %p2240_p11 = scmp.ne.s32.totalorder %s66_s28, %s2239_s1  ;;  %p2245_p13 = scmp.lt.s32.totalorder %s2239_s1, %s2239_s1 }
  0x20   :  { %p2246_p0 = por %p2245_p13, %p2244_p12 }
  0x22   :  { %p2247_p1 = pnand %p2246_p0, %p2240_p11 }
  0x24   :  { %2250 = shalt.err (!%p2247_p1)
}
  0x25   :  { %s2376_s14 = smov 128   ;;  %s2377_s19 = smov 8  }
  0x26   :  { %71 = dma.hbm_to_vmem [thread:$0]  %s2785_s5, 4096, %s66_s28, [#allocation9], %s2376_s14, %s2376_s14, %s2377_s19  }
  0x27   :  { %s2251_s26 = scalar_lea.hbm %s2780_s0, 4096 }
  0x28   :  { %p2252_p2 = scmp.ne.s32.totalorder %s2780_s0, %s2251_s26  ;;  %p2255_p3 = scmp.lt.u32.totalorder %s2251_s26, %s2780_s0 }
  0x2a   :  { %p2257_p4 = pnand %p2255_p3, %p2252_p2 }
  0x2c   :  { %2260 = shalt.err (!%p2257_p4)
}
  0x2d   :  { %s2261_s13 = scalar_lea.vmem %s26_s30, 4096  ;;  %p2266_p6 = scmp.lt.s32.totalorder %s26_s30, %s26_s30 }
  0x2e   :  { %p2262_p5 = scmp.ne.s32.totalorder %s26_s30, %s2261_s13  ;;  %p2267_p7 = scmp.lt.s32.totalorder %s2261_s13, %s2261_s13 }
  0x30   :  { %p2268_p8 = por %p2267_p7, %p2266_p6 }
  0x32   :  { %p2269_p9 = pnand %p2268_p8, %p2262_p5 }
  0x34   :  { %2272 = shalt.err (!%p2269_p9)
}
  0x35   :  { %31 = dma.hbm_to_vmem [thread:$0]  %s2780_s0, 4096, %s26_s30, [#allocation3], %s2376_s14, %s2376_s14, %s2377_s19  }
  0x36   :  { %s2378_s15 = smov [#allocation7]   ;;  %s2379_s17 = smov [#allocation10]  }
  0x37   :  { %s51_s16 = sshll.u32 %s2378_s15, 4  ;;  %s77_s18 = sshll.u32 %s2379_s17, 4  ;;  %s52_s16 = int_to_ptr.vmem [resolvable:$true] %s51_s16  ;;  %s78_s18 = int_to_ptr.vmem [resolvable:$true] %s77_s18 }
  0x38   :  { %s2273_s21 = scalar_lea.hbm %s2783_s3, 2048 }
  0x39   :  { %p2274_p10 = scmp.ne.s32.totalorder %s2783_s3, %s2273_s21  ;;  %p2277_p11 = scmp.lt.u32.totalorder %s2273_s21, %s2783_s3 }
  0x3b   :  { %p2279_p12 = pnand %p2277_p11, %p2274_p10 }
  0x3d   :  { %2282 = shalt.err (!%p2279_p12)
}
  0x3e   :  { %s2283_s0 = scalar_lea.vmem %s52_s16, 2048  ;;  %p2288_p0 = scmp.lt.s32.totalorder %s52_s16, %s52_s16 }
  0x3f   :  { %p2284_p13 = scmp.ne.s32.totalorder %s52_s16, %s2283_s0  ;;  %p2289_p1 = scmp.lt.s32.totalorder %s2283_s0, %s2283_s0 }
  0x41   :  { %p2290_p2 = por %p2289_p1, %p2288_p0 }
  0x43   :  { %p2291_p3 = pnand %p2290_p2, %p2284_p13 }
  0x45   :  { %2294 = shalt.err (!%p2291_p3)
}
  0x46   :  { %57 = dma.hbm_to_vmem [thread:$0]  %s2783_s3, 2048, %s52_s16, [#allocation6], %s2376_s14, %s2376_s14, %s2377_s19  }
  0x47   :  { %s2295_s13 = scalar_lea.hbm %s2786_s6, 1024 }
  0x48   :  { %p2296_p4 = scmp.ne.s32.totalorder %s2786_s6, %s2295_s13  ;;  %p2299_p5 = scmp.lt.u32.totalorder %s2295_s13, %s2786_s6 }
  0x4a   :  { %p2301_p6 = pnand %p2299_p5, %p2296_p4 }
  0x4c   :  { %2304 = shalt.err (!%p2301_p6)
}
  0x4d   :  { %s2305_s1 = scalar_lea.vmem %s78_s18, 1024  ;;  %p2310_p8 = scmp.lt.s32.totalorder %s78_s18, %s78_s18 }
  0x4e   :  { %p2306_p7 = scmp.ne.s32.totalorder %s78_s18, %s2305_s1  ;;  %p2311_p9 = scmp.lt.s32.totalorder %s2305_s1, %s2305_s1 }
  0x50   :  { %p2312_p10 = por %p2311_p9, %p2310_p8 }
  0x52   :  { %p2313_p11 = pnand %p2312_p10, %p2306_p7 }
  0x54   :  { %2316 = shalt.err (!%p2313_p11)
}
  0x55   :  { %83 = dma.hbm_to_vmem [thread:$0]  %s2786_s6, 1024, %s78_s18, [#allocation9], %s2372_s23, %s2372_s23, %s2373_s24  }
  0x56   :  { %s2380_s20 = smov [#allocation11]   ;;  %s2317_s26 = scalar_lea.hbm %s2788_s8, 1024 }
  0x57   :  { %s91_s21 = sshll.u32 %s2380_s20, 4  ;;  %p2318_p12 = scmp.ne.s32.totalorder %s2788_s8, %s2317_s26  ;;  %s92_s21 = int_to_ptr.vmem [resolvable:$true] %s91_s21 }
  0x58   :  { %p2321_p13 = scmp.lt.u32.totalorder %s2317_s26, %s2788_s8 }
  0x5a   :  { %p2323_p0 = pnand %p2321_p13, %p2318_p12 }
  0x5c   :  { %2326 = shalt.err (!%p2323_p0)
}
  0x5d   :  { %s2327_s11 = scalar_lea.vmem %s92_s21, 1024  ;;  %p2332_p2 = scmp.lt.s32.totalorder %s92_s21, %s92_s21 }
  0x5e   :  { %p2328_p1 = scmp.ne.s32.totalorder %s92_s21, %s2327_s11  ;;  %p2333_p3 = scmp.lt.s32.totalorder %s2327_s11, %s2327_s11 }
  0x60   :  { %p2334_p4 = por %p2333_p3, %p2332_p2 }
  0x62   :  { %p2335_p5 = pnand %p2334_p4, %p2328_p1 }
  0x64   :  { %2338 = shalt.err (!%p2335_p5)
}
  0x65   :  { %97 = dma.hbm_to_vmem [thread:$0]  %s2788_s8, 1024, %s92_s21, [#allocation12], %s2372_s23, %s2372_s23, %s2373_s24  }
  0x66   :  { %2361 = dma.done.wait [#allocation3], 4096  }
  0x67   :  { %2362 = vsyncadd [#allocation3], 4294963200 }
  0x68   :  { %2363 = dma.done.wait [#allocation6], 3072  }
  0x69   :  { %2364 = vsyncadd [#allocation6], 4294964224 }
  0x6a   :  { %2365 = dma.done.wait [#allocation9], 5120  }
  0x6b   :  { %2366 = vsyncadd [#allocation9], 4294962176 }
  0x6c   :  { %2367 = dma.done.wait [#allocation12], 1024  }
  0x6d   :  { %2368 = vsyncadd [#allocation12], 4294966272  ;;  %v1967_v0 = vld [vmem:[#allocation5] sm:$0xff]   ;;  %v1968_v1 = vld [vmem:[#allocation5 + $0x8] sm:$0xff]  }
  0x6e   :  { %1795 = vmatprep.subr.bf16.mxu0 %v1967_v0  ;;  %1939 = vmatprep.subr.bf16.mxu1 %v1967_v0  ;;  %v1969_v2 = vld [vmem:[#allocation5 + $0x10] sm:$0xff]   ;;  %v1970_v3 = vld [vmem:[#allocation5 + $0x18] sm:$0xff]   ;;  %v119_v4 = vld [vmem:[#allocation2] sm:$0xff] }
  0x6f   :  { %1796 = vmatpush3.bf16.msra.mxu0 %v1967_v0  ;;  %1947 = vmatpush3.bf16.msra.mxu1 %v1967_v0  ;;  %v120_v5 = vld [vmem:[#allocation2 + $0x8] sm:$0xff]  ;;  %v1971_v7 = vld [vmem:[#allocation5 + $0x20] sm:$0xff]   ;;  %v1973_v12 = vld [vmem:[#allocation5 + $0x30] sm:$0xff]  }
  0x70   :  { %1797 = vmatprep.subr.bf16.mxu0 %v1968_v1  ;;  %1940 = vmatprep.subr.bf16.mxu1 %v1968_v1  ;;  %v151_v6 = vpack.c.bf16 %v120_v5, %v119_v4  ;;  %v135_v8 = vld [vmem:[#allocation2 + $0x80] sm:$0xff]  ;;  %v136_v9 = vld [vmem:[#allocation2 + $0x88] sm:$0xff]  ;;  %v1974_v13 = vld [vmem:[#allocation5 + $0x38] sm:$0xff]  }
  0x71   :  { %v159_v10 = vpack.c.bf16 %v136_v9, %v135_v8  ;;  %v1972_v11 = vld [vmem:[#allocation5 + $0x28] sm:$0xff]   ;;  %v121_v14 = vld [vmem:[#allocation2 + $0x10] sm:$0xff]  ;;  %v122_v15 = vld [vmem:[#allocation2 + $0x18] sm:$0xff]  ;;  %v2381_v8 = vmov 0  }
  0x72   :  { %1811 = vmatprep.mubr.bf16.mxu0 %v151_v6  ;;  %v123_v16 = vld [vmem:[#allocation2 + $0x20] sm:$0xff]  ;;  %v124_v17 = vld [vmem:[#allocation2 + $0x28] sm:$0xff]  ;;  %v137_v18 = vld [vmem:[#allocation2 + $0x90] sm:$0xff]  ;;  %v152_v23 = vpack.c.bf16 %v122_v15, %v121_v14 }
  0x73   :  { %1798 = vmatpush3.bf16.msra.mxu0 %v1968_v1  ;;  %1948 = vmatpush3.bf16.msra.mxu1 %v1968_v1  ;;  %v138_v19 = vld [vmem:[#allocation2 + $0x98] sm:$0xff]  ;;  %v139_v20 = vld [vmem:[#allocation2 + $0xa0] sm:$0xff]  ;;  %v140_v21 = vld [vmem:[#allocation2 + $0xa8] sm:$0xff]  ;;  %v153_v25 = vpack.c.bf16 %v124_v17, %v123_v16 }
  0x74   :  { %1799 = vmatprep.subr.bf16.mxu0 %v1969_v2  ;;  %1941 = vmatprep.subr.bf16.mxu1 %v1969_v2  ;;  %v1977_v22 = vld [vmem:[#allocation7 + $0x4] ss:$8 sps:$4 sm:$0xff]   ;;  %v1975_v24 = vld [vmem:[#allocation7] ss:$8 sps:$4 sm:$0xff]   ;;  %v160_v26 = vpack.c.bf16 %v138_v19, %v137_v18  ;;  %v1980_v27 = vld [vmem:[#allocation7 + $0x14] ss:$8 sps:$4 sm:$0xff]   ;;  %v161_v28 = vpack.c.bf16 %v140_v21, %v139_v20 }
  0x75   :  { %1827 = vmatprep.mubr.bf16.mxu1 %v159_v10  ;;  %v125_v29 = vld [vmem:[#allocation2 + $0x30] sm:$0xff]  ;;  %v126_v30 = vld [vmem:[#allocation2 + $0x38] sm:$0xff]  ;;  %v127_v31 = vld [vmem:[#allocation2 + $0x40] sm:$0xff] }
  0x76   :  { %v128_v32 = vld [vmem:[#allocation2 + $0x48] sm:$0xff]  ;;  %v141_v33 = vld [vmem:[#allocation2 + $0xb0] sm:$0xff]  ;;  %v142_v34 = vld [vmem:[#allocation2 + $0xb8] sm:$0xff]  ;;  %v154_v39 = vpack.c.bf16 %v126_v30, %v125_v29 }
  0x77   :  { %1800 = vmatpush3.bf16.msra.mxu0 %v1969_v2  ;;  %1949 = vmatpush3.bf16.msra.mxu1 %v1969_v2  ;;  %v1978_v35 = vld [vmem:[#allocation7 + $0x10] ss:$8 sps:$4 sm:$0xff]   ;;  %v143_v36 = vld [vmem:[#allocation2 + $0xc0] sm:$0xff]  ;;  %v144_v37 = vld [vmem:[#allocation2 + $0xc8] sm:$0xff]  ;;  %v155_v40 = vpack.c.bf16 %v128_v32, %v127_v31  ;;  %v162_v41 = vpack.c.bf16 %v142_v34, %v141_v33 }
  0x78   :  { %1801 = vmatprep.subr.bf16.mxu0 %v1970_v3  ;;  %1942 = vmatprep.subr.bf16.mxu1 %v1970_v3  ;;  %v1983_v38 = vld [vmem:[#allocation7 + $0x24] ss:$8 sps:$4 sm:$0xff]   ;;  %v163_v42 = vpack.c.bf16 %v144_v37, %v143_v36  ;;  %v1981_v43 = vld [vmem:[#allocation7 + $0x20] ss:$8 sps:$4 sm:$0xff]   ;;  %v1986_v44 = vld [vmem:[#allocation7 + $0x34] ss:$8 sps:$4 sm:$0xff]  }
  0x79   :  { %v129_v45 = vld [vmem:[#allocation2 + $0x50] sm:$0xff]  ;;  %v130_v46 = vld [vmem:[#allocation2 + $0x58] sm:$0xff]  ;;  %v131_v47 = vld [vmem:[#allocation2 + $0x60] sm:$0xff] }
  0x7a   :  { %v132_v48 = vld [vmem:[#allocation2 + $0x68] sm:$0xff]  ;;  %v145_v49 = vld [vmem:[#allocation2 + $0xd0] sm:$0xff]  ;;  %v146_v50 = vld [vmem:[#allocation2 + $0xd8] sm:$0xff]  ;;  %v156_v55 = vpack.c.bf16 %v130_v46, %v129_v45 }
  0x7b   :  { %1802 = vmatpush3.bf16.msra.mxu0 %v1970_v3  ;;  %1950 = vmatpush3.bf16.msra.mxu1 %v1970_v3  ;;  %v1984_v51 = vld [vmem:[#allocation7 + $0x30] ss:$8 sps:$4 sm:$0xff]   ;;  %v147_v52 = vld [vmem:[#allocation2 + $0xe0] sm:$0xff]  ;;  %v148_v53 = vld [vmem:[#allocation2 + $0xe8] sm:$0xff]  ;;  %v157_v56 = vpack.c.bf16 %v132_v48, %v131_v47  ;;  %v164_v57 = vpack.c.bf16 %v146_v50, %v145_v49 }
  0x7c   :  { %1803 = vmatprep.subr.bf16.mxu0 %v1971_v7  ;;  %1943 = vmatprep.subr.bf16.mxu1 %v1971_v7  ;;  %v1989_v54 = vld [vmem:[#allocation7 + $0x44] ss:$8 sps:$4 sm:$0xff]   ;;  %v165_v58 = vpack.c.bf16 %v148_v53, %v147_v52  ;;  %v1987_v59 = vld [vmem:[#allocation7 + $0x40] ss:$8 sps:$4 sm:$0xff]   ;;  %v1992_v60 = vld [vmem:[#allocation7 + $0x54] ss:$8 sps:$4 sm:$0xff]  }
  0x7d   :  { %v133_v61 = vld [vmem:[#allocation2 + $0x70] sm:$0xff]  ;;  %v134_v62 = vld [vmem:[#allocation2 + $0x78] sm:$0xff]  ;;  %v1995_v4 = vld [vmem:[#allocation7 + $0x64] ss:$8 sps:$4 sm:$0xff]  }
  0x7e   :  { %v149_v63 = vld [vmem:[#allocation2 + $0xf0] sm:$0xff]  ;;  %v150_v0 = vld [vmem:[#allocation2 + $0xf8] sm:$0xff]  ;;  %v158_v2 = vpack.c.bf16 %v134_v62, %v133_v61  ;;  %v1993_v5 = vld [vmem:[#allocation7 + $0x60] ss:$8 sps:$4 sm:$0xff]  }
  0x7f   :  { %1804 = vmatpush3.bf16.msra.mxu0 %v1971_v7  ;;  %1951 = vmatpush3.bf16.msra.mxu1 %v1971_v7  ;;  %v1990_v1 = vld [vmem:[#allocation7 + $0x50] ss:$8 sps:$4 sm:$0xff]   ;;  %v166_v3 = vpack.c.bf16 %v150_v0, %v149_v63  ;;  %v1998_v6 = vld [vmem:[#allocation7 + $0x74] ss:$8 sps:$4 sm:$0xff]   ;;  %v2532_v9 = vld [vmem:[%s2782_s2] ss:$0 sm:$0xff] }
  0x80   :  { %1805 = vmatprep.subr.bf16.mxu0 %v1972_v11  ;;  %1944 = vmatprep.subr.bf16.mxu1 %v1972_v11  ;;  %v1996_v7 = vld [vmem:[#allocation7 + $0x70] ss:$8 sps:$4 sm:$0xff]  }
  0x83   :  { %1806 = vmatpush3.bf16.msra.mxu0 %v1972_v11  ;;  %1952 = vmatpush3.bf16.msra.mxu1 %v1972_v11 }
  0x84   :  { %1807 = vmatprep.subr.bf16.mxu0 %v1973_v12  ;;  %1945 = vmatprep.subr.bf16.mxu1 %v1973_v12 }
  0x87   :  { %1808 = vmatpush3.bf16.msra.mxu0 %v1973_v12  ;;  %1953 = vmatpush3.bf16.msra.mxu1 %v1973_v12 }
  0x88   :  { %1809 = vmatprep.subr.bf16.mxu0 %v1974_v13  ;;  %1946 = vmatprep.subr.bf16.mxu1 %v1974_v13 }
  0x8b   :  { %1810 = vmatpush3.bf16.msra.mxu0 %v1974_v13  ;;  %1954 = vmatpush3.bf16.msra.mxu1 %v1974_v13 }
  0x8c   :  { %555 = vmatprep.subr.bf16.mxu1 %v1977_v22 }
  0x8e   :  { %1812 = vmatmul.mubr.bf16.vlgmr.msra.gmra.mrb[0].mxu0 %v152_v23  ;;  %1828 = vmatmul.mubr.bf16.vlgmr.msra.gmra.mrb[0].mxu1 %v160_v26 }
  0x8f   :  { %1815 = vmatprep.mubr.bf16.mxu0 %v153_v25  ;;  %1831 = vmatprep.mubr.bf16.mxu1 %v161_v28 }
  0x90   :  { %556 = vmatpush1.bf16.msra.mxu1 %v1975_v24 }
  0x91   :  { %557 = vmatprep.subr.bf16.mxu1 %v1980_v27 }
  0x94   :  { %558 = vmatpush1.bf16.msra.mxu1 %v1978_v35 }
  0x95   :  { %559 = vmatprep.subr.bf16.mxu1 %v1983_v38 }
  0x96   :  { %1816 = vmatmul.mubr.bf16.gmra.mrb[4].mxu0 %v154_v39  ;;  %1832 = vmatmul.mubr.bf16.gmra.mrb[4].mxu1 %v162_v41 }
  0x97   :  { %1819 = vmatprep.mubr.bf16.mxu0 %v155_v40  ;;  %1835 = vmatprep.mubr.bf16.mxu1 %v163_v42 }
  0x98   :  { %560 = vmatpush1.bf16.msra.mxu1 %v1981_v43 }
  0x99   :  { %561 = vmatprep.subr.bf16.mxu1 %v1986_v44 }
  0x9c   :  { %562 = vmatpush1.bf16.msra.mxu1 %v1984_v51 }
  0x9d   :  { %563 = vmatprep.subr.bf16.mxu1 %v1989_v54 }
  0x9e   :  { %1820 = vmatmul.mubr.bf16.gmra.mrb[8].mxu0 %v156_v55  ;;  %1836 = vmatmul.mubr.bf16.gmra.mrb[8].mxu1 %v164_v57 }
  0x9f   :  { %1823 = vmatprep.mubr.bf16.mxu0 %v157_v56  ;;  %1839 = vmatprep.mubr.bf16.mxu1 %v165_v58 }
  0xa0   :  { %564 = vmatpush1.bf16.msra.mxu1 %v1987_v59 }
  0xa1   :  { %565 = vmatprep.subr.bf16.mxu1 %v1992_v60 }
  0xa4   :  { %566 = vmatpush1.bf16.msra.mxu1 %v1990_v1 }
  0xa5   :  { %567 = vmatprep.subr.bf16.mxu1 %v1995_v4 }
  0xa6   :  { %1824 = vmatmul.mubr.bf16.gmra.mrb[12].mxu0 %v158_v2  ;;  %1840 = vmatmul.mubr.bf16.gmra.mrb[12].mxu1 %v166_v3 }
  0xa7   :  { %587 = vmatprep.mubr.bf16.mxu1 %v2381_v8 }
  0xa8   :  { %568 = vmatpush1.bf16.msra.mxu1 %v1993_v5 }
  0xa9   :  { %569 = vmatprep.subr.bf16.mxu1 %v1998_v6 }
  0xac   :  { %570 = vmatpush1.bf16.msra.mxu1 %v1996_v7 }
 0x161   :  { %v1813_v10 = vpop.f32.mrb[0].mxu0  ;;  %v1829_v13 = vpop.f32.mrb[0].mxu1 }
 0x162   :  { %v281_v11 = vadd.f32 %v1813_v10, %v2532_v9  ;;  %v272_v12 = vpop.f32.mrb[1].mxu0  ;;  %v345_v16 = vadd.f32 %v1829_v13, %v2532_v9  ;;  %v336_v17 = vpop.f32.mrb[1].mxu1 }
 0x163   :  { %v273_v14 = vadd.f32 %v2532_v9, %v272_v12  ;;  %v1814_v15 = vpop.f32.mrb[2].mxu0  ;;  %v337_v20 = vadd.f32 %v2532_v9, %v336_v17  ;;  %v1830_v21 = vpop.f32.mrb[2].mxu1 }
 0x164   :  { %v284_v18 = vadd.f32 %v1814_v15, %v2532_v9  ;;  %v275_v19 = vpop.f32.mrb[3].mxu0  ;;  %v417_v23 = vmax.f32 %v345_v16, 0.0  ;;  %v348_v24 = vadd.f32 %v1830_v21, %v2532_v9  ;;  %v339_v25 = vpop.f32.mrb[3].mxu1  ;;  %v401_v26 = vmax.f32 %v281_v11, 0.0 }
 0x165   :  { %v276_v22 = vadd.f32 %v2532_v9, %v275_v19  ;;  %v415_v28 = vmax.f32 %v337_v20, 0.0  ;;  %v340_v29 = vadd.f32 %v2532_v9, %v339_v25  ;;  %v399_v30 = vmax.f32 %v273_v14, 0.0 }
 0x166   :  { %v402_v27 = vmax.f32 %v284_v18, 0.0  ;;  %v418_v32 = vmax.f32 %v348_v24, 0.0 }
 0x167   :  { %v400_v31 = vmax.f32 %v276_v22, 0.0  ;;  %v416_v34 = vmax.f32 %v340_v29, 0.0 }
 0x168   :  { %v432_v33 = vpack.c.bf16 %v402_v27, %v401_v26  ;;  %v2542_v37 = vpack.c.bf16 %v418_v32, %v417_v23 }
 0x169   :  { %v431_v35 = vpack.c.bf16 %v400_v31, %v399_v30  ;;  %v1817_v36 = vpop.f32.mrb[4].mxu0  ;;  %v2545_v40 = vpack.c.bf16 %v416_v34, %v415_v28  ;;  %v1833_v41 = vpop.f32.mrb[4].mxu1 }
 0x16a   :  { %v297_v38 = vadd.f32 %v1817_v36, %v2532_v9  ;;  %v288_v39 = vpop.f32.mrb[5].mxu0  ;;  %v361_v44 = vadd.f32 %v1833_v41, %v2532_v9  ;;  %v352_v45 = vpop.f32.mrb[5].mxu1 }
 0x16b   :  { %588 = vmatmul.mubr.bf16.vlgmr.msra.gmra.mrb[16].mxu1 %v431_v35  ;;  %v289_v42 = vadd.f32 %v2532_v9, %v288_v39  ;;  %v1818_v43 = vpop.f32.mrb[6].mxu0  ;;  %v353_v49 = vadd.f32 %v2532_v9, %v352_v45  ;;  %v1834_v50 = vpop.f32.mrb[6].mxu1 }
 0x16c   :  { %v405_v46 = vmax.f32 %v297_v38, 0.0  ;;  %v300_v47 = vadd.f32 %v1818_v43, %v2532_v9  ;;  %v291_v48 = vpop.f32.mrb[7].mxu0  ;;  %597 = vmatprep.mubr.bf16.mxu1 %v2381_v8  ;;  %v421_v53 = vmax.f32 %v361_v44, 0.0  ;;  %v364_v54 = vadd.f32 %v1834_v50, %v2532_v9  ;;  %v355_v55 = vpop.f32.mrb[7].mxu1 }
 0x16d   :  { %v403_v51 = vmax.f32 %v289_v42, 0.0  ;;  %v292_v52 = vadd.f32 %v2532_v9, %v291_v48  ;;  %v419_v57 = vmax.f32 %v353_v49, 0.0  ;;  %v356_v58 = vadd.f32 %v2532_v9, %v355_v55 }
 0x16e   :  { %v406_v56 = vmax.f32 %v300_v47, 0.0  ;;  %v422_v60 = vmax.f32 %v364_v54, 0.0 }
 0x16f   :  { %v404_v59 = vmax.f32 %v292_v52, 0.0  ;;  %v420_v62 = vmax.f32 %v356_v58, 0.0 }
 0x170   :  { %v2555_v61 = vpack.c.bf16 %v406_v56, %v405_v46  ;;  %v2557_v1 = vpack.c.bf16 %v422_v60, %v421_v53 }
 0x171   :  { %v433_v63 = vpack.c.bf16 %v404_v59, %v403_v51  ;;  %v1821_v0 = vpop.f32.mrb[8].mxu0  ;;  %v2560_v4 = vpack.c.bf16 %v420_v62, %v419_v57  ;;  %v1837_v5 = vpop.f32.mrb[8].mxu1 }
 0x172   :  { %v313_v2 = vadd.f32 %v1821_v0, %v2532_v9  ;;  %v304_v3 = vpop.f32.mrb[9].mxu0  ;;  %v377_v10 = vadd.f32 %v1837_v5, %v2532_v9  ;;  %v368_v11 = vpop.f32.mrb[9].mxu1  ;;  %v2004_v0 = vld [vmem:[#allocation10 + $0x28] sm:$0xff]  }
 0x173   :  { %598 = vmatmul.mubr.bf16.gmra.mrb[20].mxu1 %v432_v33  ;;  %v305_v6 = vadd.f32 %v2532_v9, %v304_v3  ;;  %v1822_v7 = vpop.f32.mrb[10].mxu0  ;;  %v369_v15 = vadd.f32 %v2532_v9, %v368_v11  ;;  %v1838_v16 = vpop.f32.mrb[10].mxu1  ;;  %v465_v3 = vlaneseq }
 0x174   :  { %607 = vmatprep.mubr.bf16.mxu1 %v2381_v8  ;;  %v409_v12 = vmax.f32 %v313_v2, 0.0  ;;  %v316_v13 = vadd.f32 %v1822_v7, %v2532_v9  ;;  %v307_v14 = vpop.f32.mrb[11].mxu0  ;;  %v425_v19 = vmax.f32 %v377_v10, 0.0  ;;  %v380_v20 = vadd.f32 %v1838_v16, %v2532_v9  ;;  %v371_v21 = vpop.f32.mrb[11].mxu1  ;;  %v2006_v2 = vld [vmem:[#allocation10 + $0x38] sm:$0xff]  }
 0x175   :  { %v407_v17 = vmax.f32 %v305_v6, 0.0  ;;  %v308_v18 = vadd.f32 %v2532_v9, %v307_v14  ;;  %v423_v23 = vmax.f32 %v369_v15, 0.0  ;;  %v372_v24 = vadd.f32 %v2532_v9, %v371_v21  ;;  %v463_v6 = vld [vmem:[%s2784_s4] sm:$0x3] }
 0x176   :  { %v410_v22 = vmax.f32 %v316_v13, 0.0  ;;  %v426_v26 = vmax.f32 %v380_v20, 0.0 }
 0x177   :  { %v408_v25 = vmax.f32 %v308_v18, 0.0  ;;  %v424_v28 = vmax.f32 %v372_v24, 0.0 }
 0x178   :  { %v436_v27 = vpack.c.bf16 %v410_v22, %v409_v12  ;;  %v2570_v31 = vpack.c.bf16 %v426_v26, %v425_v19 }
 0x179   :  { %v435_v29 = vpack.c.bf16 %v408_v25, %v407_v17  ;;  %v1825_v30 = vpop.f32.mrb[12].mxu0  ;;  %v443_v34 = vpack.c.bf16 %v424_v28, %v423_v23  ;;  %v1841_v35 = vpop.f32.mrb[12].mxu1 }
 0x17a   :  { %v329_v32 = vadd.f32 %v1825_v30, %v2532_v9  ;;  %v320_v33 = vpop.f32.mrb[13].mxu0  ;;  %v393_v39 = vadd.f32 %v1841_v35, %v2532_v9  ;;  %v384_v41 = vpop.f32.mrb[13].mxu1 }
 0x17b   :  { %608 = vmatmul.mubr.bf16.gmra.mrb[24].mxu1 %v433_v63  ;;  %v321_v36 = vadd.f32 %v2532_v9, %v320_v33  ;;  %v1826_v38 = vpop.f32.mrb[14].mxu0  ;;  %v385_v45 = vadd.f32 %v2532_v9, %v384_v41  ;;  %v1842_v46 = vpop.f32.mrb[14].mxu1  ;;  %v2003_v63 = vld [vmem:[#allocation10 + $0x20] sm:$0xff]  }
 0x17c   :  { %617 = vmatprep.mubr.bf16.mxu1 %v2381_v8  ;;  %v413_v42 = vmax.f32 %v329_v32, 0.0  ;;  %v332_v43 = vadd.f32 %v1826_v38, %v2532_v9  ;;  %v323_v44 = vpop.f32.mrb[15].mxu0  ;;  %v429_v49 = vmax.f32 %v393_v39, 0.0  ;;  %v396_v50 = vadd.f32 %v1842_v46, %v2532_v9  ;;  %v387_v51 = vpop.f32.mrb[15].mxu1  ;;  %v844_v32 = vld [vmem:[#allocation8] sm:$0xff]  ;;  %v845_v38 = vld [vmem:[#allocation8 + $0x8] sm:$0xff] }
 0x17d   :  { %v411_v47 = vmax.f32 %v321_v36, 0.0  ;;  %v324_v48 = vadd.f32 %v2532_v9, %v323_v44  ;;  %v427_v53 = vmax.f32 %v385_v45, 0.0  ;;  %v388_v54 = vadd.f32 %v2532_v9, %v387_v51  ;;  %v1999_v9 = vld [vmem:[#allocation10] sm:$0xff]  }
 0x17e   :  { %v414_v52 = vmax.f32 %v332_v43, 0.0  ;;  %v430_v56 = vmax.f32 %v396_v50, 0.0  ;;  %1843 = vmatprep.subr.bf16.mxu0 %v1999_v9  ;;  %v2007_v43 = vld [vmem:[#allocation11] sm:$0xff]  }
 0x17f   :  { %v412_v55 = vmax.f32 %v324_v48, 0.0  ;;  %v428_v58 = vmax.f32 %v388_v54, 0.0  ;;  %1844 = vmatpush3.bf16.msra.mxu0 %v1999_v9 }
 0x180   :  { %v438_v57 = vpack.c.bf16 %v414_v52, %v413_v42  ;;  %v446_v60 = vpack.c.bf16 %v430_v56, %v429_v49 }
 0x181   :  { %v437_v59 = vpack.c.bf16 %v412_v55, %v411_v47  ;;  %v445_v62 = vpack.c.bf16 %v428_v58, %v427_v53  ;;  %v846_v53 = vld [vmem:[#allocation8 + $0x10] sm:$0xff] }
 0x183   :  { %618 = vmatmul.mubr.bf16.gmra.mrb[28].mxu1 %v2555_v61  ;;  %v2000_v61 = vld [vmem:[#allocation10 + $0x8] sm:$0xff]  }
 0x184   :  { %627 = vmatprep.mubr.bf16.mxu1 %v2381_v8  ;;  %1845 = vmatprep.subr.bf16.mxu0 %v2000_v61 }
 0x185   :  { %1846 = vmatpush3.bf16.msra.mxu0 %v2000_v61 }
 0x18b   :  { %628 = vmatmul.mubr.bf16.gmra.mrb[32].mxu1 %v435_v29 }
 0x18c   :  { %637 = vmatprep.mubr.bf16.mxu1 %v2381_v8 }
 0x193   :  { %638 = vmatmul.mubr.bf16.gmra.mrb[36].mxu1 %v436_v27 }
 0x194   :  { %647 = vmatprep.mubr.bf16.mxu1 %v2381_v8 }
 0x19b   :  { %648 = vmatmul.mubr.bf16.gmra.mrb[40].mxu1 %v437_v59  ;;  %v847_v59 = vld [vmem:[#allocation8 + $0x18] sm:$0xff] }
 0x19c   :  { %657 = vmatprep.mubr.bf16.mxu1 %v2381_v8 }
 0x1a3   :  { %658 = vmatmul.mubr.bf16.gmra.mrb[44].mxu1 %v438_v57 }
 0x1a4   :  { %667 = vmatprep.mubr.bf16.mxu1 %v2381_v8 }
 0x1ab   :  { %668 = vmatmul.mubr.bf16.gmra.mrb[48].mxu1 %v2545_v40  ;;  %v2001_v40 = vld [vmem:[#allocation10 + $0x10] sm:$0xff]  }
 0x1ac   :  { %677 = vmatprep.mubr.bf16.mxu1 %v2381_v8  ;;  %1847 = vmatprep.subr.bf16.mxu0 %v2001_v40 }
 0x1ad   :  { %1848 = vmatpush3.bf16.msra.mxu0 %v2001_v40 }
 0x1b3   :  { %678 = vmatmul.mubr.bf16.gmra.mrb[52].mxu1 %v2542_v37  ;;  %v2002_v37 = vld [vmem:[#allocation10 + $0x18] sm:$0xff]  }
 0x1b4   :  { %687 = vmatprep.mubr.bf16.mxu1 %v2381_v8  ;;  %1849 = vmatprep.subr.bf16.mxu0 %v2002_v37 }
 0x1b5   :  { %1850 = vmatpush3.bf16.msra.mxu0 %v2002_v37 }
 0x1b6   :  { %1851 = vmatprep.subr.bf16.mxu0 %v2003_v63 }
 0x1b9   :  { %1852 = vmatpush3.bf16.msra.mxu0 %v2003_v63 }
 0x1ba   :  { %1853 = vmatprep.subr.bf16.mxu0 %v2004_v0 }
 0x1bb   :  { %688 = vmatmul.mubr.bf16.gmra.mrb[56].mxu1 %v2560_v4  ;;  %v466_v4 = vshrl.u32 %v465_v3, 7 }
 0x1bc   :  { %697 = vmatprep.mubr.bf16.mxu1 %v2381_v8 }
 0x1bd   :  { %1854 = vmatpush3.bf16.msra.mxu0 %v2004_v0  ;;  %v471_v5 = vsub.s32 1, %v466_v4  ;;  %v467_v23 = vsub.s32 0, %v466_v4 }
 0x1bf   :  { %v2602_v7 = vrot.slane %v463_v6, %v471_v5  ;;  %v2608_v29 = vrot.slane %v463_v6, %v467_v23 }
 0x1c3   :  { %698 = vmatmul.mubr.bf16.gmra.mrb[60].mxu1 %v2557_v1  ;;  %v2005_v1 = vld [vmem:[#allocation10 + $0x30] sm:$0xff]  }
 0x1c4   :  { %707 = vmatprep.mubr.bf16.mxu1 %v2381_v8  ;;  %1855 = vmatprep.subr.bf16.mxu0 %v2005_v1 }
 0x1c5   :  { %1856 = vmatpush3.bf16.msra.mxu0 %v2005_v1 }
 0x1c6   :  { %1857 = vmatprep.subr.bf16.mxu0 %v2006_v2 }
 0x1c9   :  { %1858 = vmatpush3.bf16.msra.mxu0 %v2006_v2 }
 0x1ca   :  { %1891 = vmatprep.subr.bf16.mxu0 %v2007_v43 }
 0x1cb   :  { %708 = vmatmul.mubr.bf16.gmra.mrb[64].mxu1 %v443_v34 }
 0x1cc   :  { %717 = vmatprep.mubr.bf16.mxu1 %v2381_v8 }
 0x1d3   :  { %718 = vmatmul.mubr.bf16.gmra.mrb[68].mxu1 %v2570_v31 }
 0x1d4   :  { %727 = vmatprep.mubr.bf16.mxu1 %v2381_v8 }
 0x1db   :  { %728 = vmatmul.mubr.bf16.gmra.mrb[72].mxu1 %v445_v62 }
 0x1dc   :  { %737 = vmatprep.mubr.bf16.mxu1 %v2381_v8 }
 0x1e3   :  { %738 = vmatmul.mubr.bf16.gmra.mrb[76].mxu1 %v446_v60 }
 0x23e   :  { %v589_v10 = vpop.f32.mrb[16].mxu1 }
 0x23f   :  { %v591_v11 = vpop.f32.mrb[17].mxu1  ;;  %v590_v39 = vadd.f32 %v589_v10, %v2608_v29 }
 0x240   :  { %v592_v12 = vadd.f32 %v591_v11, %v2602_v7  ;;  %v593_v13 = vpop.f32.mrb[18].mxu1 }
 0x241   :  { %v595_v14 = vpop.f32.mrb[19].mxu1  ;;  %v594_v47 = vadd.f32 %v593_v13, %v2608_v29 }
 0x242   :  { %v748_v15 = vmul.f32 0.5, %v592_v12  ;;  %v596_v8 = vadd.f32 %v595_v14, %v2602_v7  ;;  %v848_v12 = vld [vmem:[#allocation8 + $0x20] sm:$0xff] }
 0x244   :  { %v780_v16 = vmul.f32 1.442695, %v748_v15  ;;  %v749_v17 = vmul.f32 0.5, %v596_v8  ;;  %v2008_v15 = vld [vmem:[#allocation11 + $0x8] sm:$0xff]  }
 0x246   :  { %2015 = vpow2.f32 %v780_v16  ;;  %v782_v18 = vmul.f32 1.442695, %v749_v17  ;;  %v599_v19 = vpop.f32.mrb[20].mxu1 }
 0x247   :  { %v601_v20 = vpop.f32.mrb[21].mxu1  ;;  %v600_v9 = vadd.f32 %v599_v19, %v2608_v29 }
 0x248   :  { %2017 = vpow2.f32 %v782_v18  ;;  %v602_v21 = vadd.f32 %v601_v20, %v2602_v7  ;;  %v603_v22 = vpop.f32.mrb[22].mxu1  ;;  %v849_v18 = vld [vmem:[#allocation8 + $0x28] sm:$0xff] }
 0x249   :  { %v605_v24 = vpop.f32.mrb[23].mxu1  ;;  %v604_v1 = vadd.f32 %v603_v22, %v2608_v29 }
 0x24a   :  { %v750_v25 = vmul.f32 0.5, %v602_v21  ;;  %v606_v26 = vadd.f32 %v605_v24, %v2602_v7 }
 0x24c   :  { %v784_v27 = vmul.f32 1.442695, %v750_v25  ;;  %v751_v28 = vmul.f32 0.5, %v606_v26 }
 0x24e   :  { %2019 = vpow2.f32 %v784_v27  ;;  %v786_v30 = vmul.f32 1.442695, %v751_v28  ;;  %v609_v31 = vpop.f32.mrb[24].mxu1  ;;  %v2009_v28 = vld [vmem:[#allocation11 + $0x10] sm:$0xff]  }
 0x24f   :  { %v611_v33 = vpop.f32.mrb[25].mxu1  ;;  %v610_v19 = vadd.f32 %v609_v31, %v2608_v29 }
 0x250   :  { %v2016_v34 = vpop.eup %2015  ;;  %2021 = vpow2.f32 %v786_v30  ;;  %v612_v35 = vadd.f32 %v611_v33, %v2602_v7  ;;  %v613_v36 = vpop.f32.mrb[26].mxu1 }
 0x251   :  { %v615_v41 = vpop.f32.mrb[27].mxu1  ;;  %v876_v42 = vmul.f32 %v2016_v34, %v844_v32  ;;  %v614_v25 = vadd.f32 %v613_v36, %v2608_v29 }
 0x252   :  { %v2018_v44 = vpop.eup %2017  ;;  %v752_v45 = vmul.f32 0.5, %v612_v35  ;;  %v616_v46 = vadd.f32 %v615_v41, %v2602_v7  ;;  %v850_v35 = vld [vmem:[#allocation8 + $0x30] sm:$0xff]  ;;  %v2010_v41 = vld [vmem:[#allocation11 + $0x18] sm:$0xff]  }
 0x253   :  { %v877_v48 = vmul.f32 %v2018_v44, %v845_v38  ;;  %v908_v49 = vadd.f32 %v876_v42, %v590_v39  ;;  %v851_v44 = vld [vmem:[#allocation8 + $0x38] sm:$0xff] }
 0x254   :  { %v788_v50 = vmul.f32 1.442695, %v752_v45  ;;  %v753_v51 = vmul.f32 0.5, %v616_v46 }
 0x255   :  { %v909_v52 = vadd.f32 %v877_v48, %v594_v47 }
 0x256   :  { %2023 = vpow2.f32 %v788_v50  ;;  %v790_v54 = vmul.f32 1.442695, %v753_v51  ;;  %v2614_v55 = vpop.f32.mrb[28].mxu1 }
 0x257   :  { %v621_v56 = vpop.f32.mrb[29].mxu1  ;;  %v940_v57 = vpack.c.bf16 %v909_v52, %v908_v49  ;;  %v620_v45 = vadd.f32 %v2614_v55, %v2608_v29 }
 0x258   :  { %v2020_v58 = vpop.eup %2019  ;;  %2025 = vpow2.f32 %v790_v54  ;;  %v622_v60 = vadd.f32 %v621_v56, %v2602_v7  ;;  %v2617_v62 = vpop.f32.mrb[30].mxu1  ;;  %v2011_v54 = vld [vmem:[#allocation11 + $0x20] sm:$0xff]  }
 0x259   :  { %v878_v61 = vmul.f32 %v2020_v58, %v846_v53  ;;  %v625_v40 = vpop.f32.mrb[31].mxu1  ;;  %1859 = vmatprep.mubr.bf16.mxu0 %v940_v57  ;;  %v624_v51 = vadd.f32 %v2617_v62, %v2608_v29 }
 0x25a   :  { %v2022_v37 = vpop.eup %2021  ;;  %v754_v63 = vmul.f32 0.5, %v622_v60  ;;  %v626_v0 = vadd.f32 %v625_v40, %v2602_v7  ;;  %v852_v60 = vld [vmem:[#allocation8 + $0x40] sm:$0xff]  ;;  %v2012_v40 = vld [vmem:[#allocation11 + $0x28] sm:$0xff]  }
 0x25b   :  { %v879_v2 = vmul.f32 %v2022_v37, %v847_v59  ;;  %v910_v3 = vadd.f32 %v878_v61, %v600_v9 }
 0x25c   :  { %v792_v4 = vmul.f32 1.442695, %v754_v63  ;;  %v755_v5 = vmul.f32 0.5, %v626_v0  ;;  %v853_v0 = vld [vmem:[#allocation8 + $0x48] sm:$0xff] }
 0x25d   :  { %v911_v6 = vadd.f32 %v879_v2, %v604_v1 }
 0x25e   :  { %2027 = vpow2.f32 %v792_v4  ;;  %v794_v10 = vmul.f32 1.442695, %v755_v5  ;;  %v2622_v11 = vpop.f32.mrb[32].mxu1 }
 0x25f   :  { %v631_v13 = vpop.f32.mrb[33].mxu1  ;;  %v941_v14 = vpack.c.bf16 %v911_v6, %v910_v3  ;;  %v630_v1 = vadd.f32 %v2622_v11, %v2608_v29 }
 0x260   :  { %v2024_v8 = vpop.eup %2023  ;;  %2029 = vpow2.f32 %v794_v10  ;;  %v632_v16 = vadd.f32 %v631_v13, %v2602_v7  ;;  %v2625_v17 = vpop.f32.mrb[34].mxu1 }
 0x261   :  { %v635_v20 = vpop.f32.mrb[35].mxu1  ;;  %1860 = vmatmul.mubr.bf16.vlgmr.msra.gmra.mrb[16].mxu0 %v941_v14  ;;  %v880_v21 = vmul.f32 %v2024_v8, %v848_v12  ;;  %v634_v10 = vadd.f32 %v2625_v17, %v2608_v29 }
 0x262   :  { %v2026_v22 = vpop.eup %2025  ;;  %v756_v23 = vmul.f32 0.5, %v632_v16  ;;  %v636_v24 = vadd.f32 %v635_v20, %v2602_v7  ;;  %1892 = vmatpush3.bf16.msra.mxu0 %v2007_v43 }
 0x263   :  { %v881_v26 = vmul.f32 %v2026_v22, %v849_v18  ;;  %v912_v27 = vadd.f32 %v880_v21, %v610_v19  ;;  %1893 = vmatprep.subr.bf16.mxu0 %v2008_v15  ;;  %v854_v18 = vld [vmem:[#allocation8 + $0x50] sm:$0xff] }
 0x264   :  { %v796_v30 = vmul.f32 1.442695, %v756_v23  ;;  %v757_v32 = vmul.f32 0.5, %v636_v24  ;;  %v855_v24 = vld [vmem:[#allocation8 + $0x58] sm:$0xff] }
 0x265   :  { %v913_v33 = vadd.f32 %v881_v26, %v614_v25 }
 0x266   :  { %2031 = vpow2.f32 %v796_v30  ;;  %v798_v34 = vmul.f32 1.442695, %v757_v32  ;;  %v2630_v31 = vpop.f32.mrb[36].mxu1  ;;  %1894 = vmatpush3.bf16.msra.mxu0 %v2008_v15 }
 0x267   :  { %v641_v38 = vpop.f32.mrb[37].mxu1  ;;  %v942_v39 = vpack.c.bf16 %v913_v33, %v912_v27  ;;  %1895 = vmatprep.subr.bf16.mxu0 %v2009_v28  ;;  %v640_v17 = vadd.f32 %v2630_v31, %v2608_v29 }
 0x268   :  { %v2028_v42 = vpop.eup %2027  ;;  %2033 = vpow2.f32 %v798_v34  ;;  %v642_v36 = vadd.f32 %v641_v38, %v2602_v7  ;;  %v2633_v43 = vpop.f32.mrb[38].mxu1 }
 0x269   :  { %v645_v46 = vpop.f32.mrb[39].mxu1  ;;  %1863 = vmatprep.mubr.bf16.mxu0 %v942_v39  ;;  %v882_v47 = vmul.f32 %v2028_v42, %v850_v35  ;;  %v644_v32 = vadd.f32 %v2633_v43, %v2608_v29 }
 0x26a   :  { %v2030_v48 = vpop.eup %2029  ;;  %v758_v49 = vmul.f32 0.5, %v642_v36  ;;  %v646_v50 = vadd.f32 %v645_v46, %v2602_v7  ;;  %1896 = vmatpush3.bf16.msra.mxu0 %v2009_v28  ;;  %v856_v36 = vld [vmem:[#allocation8 + $0x60] sm:$0xff] }
 0x26b   :  { %v883_v52 = vmul.f32 %v2030_v48, %v851_v44  ;;  %v914_v53 = vadd.f32 %v882_v47, %v620_v45  ;;  %1897 = vmatprep.subr.bf16.mxu0 %v2010_v41  ;;  %v857_v48 = vld [vmem:[#allocation8 + $0x68] sm:$0xff] }
 0x26c   :  { %v800_v56 = vmul.f32 1.442695, %v758_v49  ;;  %v759_v57 = vmul.f32 0.5, %v646_v50 }
 0x26d   :  { %v915_v58 = vadd.f32 %v883_v52, %v624_v51 }
 0x26e   :  { %2035 = vpow2.f32 %v800_v56  ;;  %v802_v55 = vmul.f32 1.442695, %v759_v57  ;;  %v2640_v59 = vpop.f32.mrb[40].mxu1  ;;  %1898 = vmatpush3.bf16.msra.mxu0 %v2010_v41 }
 0x26f   :  { %v651_v9 = vpop.f32.mrb[41].mxu1  ;;  %v943_v61 = vpack.c.bf16 %v915_v58, %v914_v53  ;;  %1899 = vmatprep.subr.bf16.mxu0 %v2011_v54  ;;  %v650_v43 = vadd.f32 %v2640_v59, %v2608_v29 }
 0x270   :  { %v2032_v37 = vpop.eup %2031  ;;  %2037 = vpow2.f32 %v802_v55  ;;  %v652_v62 = vadd.f32 %v651_v9, %v2602_v7  ;;  %v653_v63 = vpop.f32.mrb[42].mxu1 }
 0x271   :  { %v655_v2 = vpop.f32.mrb[43].mxu1  ;;  %1864 = vmatmul.mubr.bf16.gmra.mrb[20].mxu0 %v943_v61  ;;  %v884_v3 = vmul.f32 %v2032_v37, %v852_v60 }
 0x272   :  { %v2034_v4 = vpop.eup %2033  ;;  %v760_v5 = vmul.f32 0.5, %v652_v62  ;;  %v656_v6 = vadd.f32 %v655_v2, %v2602_v7  ;;  %1900 = vmatpush3.bf16.msra.mxu0 %v2011_v54  ;;  %v654_v54 = vadd.f32 %v653_v63, %v2608_v29  ;;  %v859_v2 = vld [vmem:[#allocation8 + $0x78] sm:$0xff] }
 0x273   :  { %v885_v12 = vmul.f32 %v2034_v4, %v853_v0  ;;  %v916_v13 = vadd.f32 %v884_v3, %v630_v1  ;;  %1901 = vmatprep.subr.bf16.mxu0 %v2012_v40 }
 0x274   :  { %v804_v14 = vmul.f32 1.442695, %v760_v5  ;;  %v761_v15 = vmul.f32 0.5, %v656_v6 }
 0x275   :  { %v917_v8 = vadd.f32 %v885_v12, %v634_v10 }
 0x276   :  { %2039 = vpow2.f32 %v804_v14  ;;  %v806_v16 = vmul.f32 1.442695, %v761_v15  ;;  %v659_v11 = vpop.f32.mrb[44].mxu1  ;;  %1902 = vmatpush3.bf16.msra.mxu0 %v2012_v40  ;;  %v858_v40 = vld [vmem:[#allocation8 + $0x70] sm:$0xff] }
 0x277   :  { %v661_v19 = vpop.f32.mrb[45].mxu1  ;;  %v944_v20 = vpack.c.bf16 %v917_v8, %v916_v13  ;;  %v660_v3 = vadd.f32 %v659_v11, %v2608_v29 }
 0x278   :  { %v2036_v21 = vpop.eup %2035  ;;  %2041 = vpow2.f32 %v806_v16  ;;  %v662_v22 = vadd.f32 %v661_v19, %v2602_v7  ;;  %v663_v23 = vpop.f32.mrb[46].mxu1 }
 0x279   :  { %v665_v25 = vpop.f32.mrb[47].mxu1  ;;  %1867 = vmatprep.mubr.bf16.mxu0 %v944_v20  ;;  %v886_v26 = vmul.f32 %v2036_v21, %v854_v18  ;;  %v664_v12 = vadd.f32 %v663_v23, %v2608_v29  ;;  %v860_v20 = vld [vmem:[#allocation8 + $0x80] sm:$0xff] }
 0x27a   :  { %v2038_v27 = vpop.eup %2037  ;;  %v762_v28 = vmul.f32 0.5, %v662_v22  ;;  %v666_v30 = vadd.f32 %v665_v25, %v2602_v7  ;;  %v861_v25 = vld [vmem:[#allocation8 + $0x88] sm:$0xff] }
 0x27b   :  { %v887_v33 = vmul.f32 %v2038_v27, %v855_v24  ;;  %v918_v34 = vadd.f32 %v886_v26, %v640_v17 }
 0x27c   :  { %v808_v35 = vmul.f32 1.442695, %v762_v28  ;;  %v763_v38 = vmul.f32 0.5, %v666_v30 }
 0x27d   :  { %v919_v39 = vadd.f32 %v887_v33, %v644_v32 }
 0x27e   :  { %2043 = vpow2.f32 %v808_v35  ;;  %v810_v41 = vmul.f32 1.442695, %v763_v38  ;;  %v669_v42 = vpop.f32.mrb[48].mxu1 }
 0x27f   :  { %v671_v31 = vpop.f32.mrb[49].mxu1  ;;  %v945_v44 = vpack.c.bf16 %v919_v39, %v918_v34  ;;  %v670_v26 = vadd.f32 %v669_v42, %v2608_v29 }
 0x280   :  { %v2040_v45 = vpop.eup %2039  ;;  %2045 = vpow2.f32 %v810_v41  ;;  %v672_v46 = vadd.f32 %v671_v31, %v2602_v7  ;;  %v673_v47 = vpop.f32.mrb[50].mxu1 }
 0x281   :  { %v675_v49 = vpop.f32.mrb[51].mxu1  ;;  %1868 = vmatmul.mubr.bf16.gmra.mrb[24].mxu0 %v945_v44  ;;  %v888_v50 = vmul.f32 %v2040_v45, %v856_v36  ;;  %v674_v33 = vadd.f32 %v673_v47, %v2608_v29  ;;  %v862_v44 = vld [vmem:[#allocation8 + $0x90] sm:$0xff] }
 0x282   :  { %v2042_v51 = vpop.eup %2041  ;;  %v764_v52 = vmul.f32 0.5, %v672_v46  ;;  %v676_v53 = vadd.f32 %v675_v49, %v2602_v7  ;;  %v863_v49 = vld [vmem:[#allocation8 + $0x98] sm:$0xff] }
 0x283   :  { %v889_v56 = vmul.f32 %v2042_v51, %v857_v48  ;;  %v920_v57 = vadd.f32 %v888_v50, %v650_v43 }
 0x284   :  { %v812_v58 = vmul.f32 1.442695, %v764_v52  ;;  %v765_v55 = vmul.f32 0.5, %v676_v53 }
 0x285   :  { %v921_v60 = vadd.f32 %v889_v56, %v654_v54 }
 0x286   :  { %2047 = vpow2.f32 %v812_v58  ;;  %v814_v9 = vmul.f32 1.442695, %v765_v55  ;;  %v679_v61 = vpop.f32.mrb[52].mxu1 }
 0x287   :  { %v681_v37 = vpop.f32.mrb[53].mxu1  ;;  %v946_v59 = vpack.c.bf16 %v921_v60, %v920_v57  ;;  %v680_v50 = vadd.f32 %v679_v61, %v2608_v29 }
 0x288   :  { %v2044_v62 = vpop.eup %2043  ;;  %2049 = vpow2.f32 %v814_v9  ;;  %v682_v0 = vadd.f32 %v681_v37, %v2602_v7  ;;  %v683_v1 = vpop.f32.mrb[54].mxu1 }
 0x289   :  { %v685_v63 = vpop.f32.mrb[55].mxu1  ;;  %1871 = vmatprep.mubr.bf16.mxu0 %v946_v59  ;;  %v890_v4 = vmul.f32 %v2044_v62, %v858_v40  ;;  %v684_v56 = vadd.f32 %v683_v1, %v2608_v29  ;;  %v864_v59 = vld [vmem:[#allocation8 + $0xa0] sm:$0xff] }
 0x28a   :  { %v2046_v5 = vpop.eup %2045  ;;  %v766_v6 = vmul.f32 0.5, %v682_v0  ;;  %v686_v10 = vadd.f32 %v685_v63, %v2602_v7  ;;  %v865_v63 = vld [vmem:[#allocation8 + $0xa8] sm:$0xff] }
 0x28b   :  { %v891_v13 = vmul.f32 %v2046_v5, %v859_v2  ;;  %v922_v14 = vadd.f32 %v890_v4, %v660_v3 }
 0x28c   :  { %v816_v15 = vmul.f32 1.442695, %v766_v6  ;;  %v767_v8 = vmul.f32 0.5, %v686_v10 }
 0x28d   :  { %v923_v16 = vadd.f32 %v891_v13, %v664_v12 }
 0x28e   :  { %2051 = vpow2.f32 %v816_v15  ;;  %v818_v18 = vmul.f32 1.442695, %v767_v8  ;;  %v689_v19 = vpop.f32.mrb[56].mxu1 }
 0x28f   :  { %v691_v21 = vpop.f32.mrb[57].mxu1  ;;  %v947_v11 = vpack.c.bf16 %v923_v16, %v922_v14  ;;  %v690_v4 = vadd.f32 %v689_v19, %v2608_v29 }
 0x290   :  { %v2048_v22 = vpop.eup %2047  ;;  %2053 = vpow2.f32 %v818_v18  ;;  %v692_v24 = vadd.f32 %v691_v21, %v2602_v7  ;;  %v693_v17 = vpop.f32.mrb[58].mxu1 }
 0x291   :  { %v695_v23 = vpop.f32.mrb[59].mxu1  ;;  %1872 = vmatmul.mubr.bf16.gmra.mrb[28].mxu0 %v947_v11  ;;  %v892_v27 = vmul.f32 %v2048_v22, %v860_v20  ;;  %v694_v13 = vadd.f32 %v693_v17, %v2608_v29  ;;  %v866_v11 = vld [vmem:[#allocation8 + $0xb0] sm:$0xff] }
 0x292   :  { %v2050_v28 = vpop.eup %2049  ;;  %v768_v30 = vmul.f32 0.5, %v692_v24  ;;  %v696_v32 = vadd.f32 %v695_v23, %v2602_v7  ;;  %v867_v23 = vld [vmem:[#allocation8 + $0xb8] sm:$0xff] }
 0x293   :  { %v893_v34 = vmul.f32 %v2050_v28, %v861_v25  ;;  %v924_v35 = vadd.f32 %v892_v27, %v670_v26 }
 0x294   :  { %v820_v38 = vmul.f32 1.442695, %v768_v30  ;;  %v769_v39 = vmul.f32 0.5, %v696_v32 }
 0x295   :  { %v925_v41 = vadd.f32 %v893_v34, %v674_v33 }
 0x296   :  { %2055 = vpow2.f32 %v820_v38  ;;  %v822_v36 = vmul.f32 1.442695, %v769_v39  ;;  %v699_v31 = vpop.f32.mrb[60].mxu1 }
 0x297   :  { %v701_v45 = vpop.f32.mrb[61].mxu1  ;;  %v948_v42 = vpack.c.bf16 %v925_v41, %v924_v35  ;;  %v700_v27 = vadd.f32 %v699_v31, %v2608_v29 }
 0x298   :  { %v2052_v46 = vpop.eup %2051  ;;  %2057 = vpow2.f32 %v822_v36  ;;  %v702_v48 = vadd.f32 %v701_v45, %v2602_v7  ;;  %v703_v43 = vpop.f32.mrb[62].mxu1 }
 0x299   :  { %v705_v47 = vpop.f32.mrb[63].mxu1  ;;  %1875 = vmatprep.mubr.bf16.mxu0 %v948_v42  ;;  %v894_v51 = vmul.f32 %v2052_v46, %v862_v44  ;;  %v704_v34 = vadd.f32 %v703_v43, %v2608_v29  ;;  %v868_v42 = vld [vmem:[#allocation8 + $0xc0] sm:$0xff] }
 0x29a   :  { %v2054_v52 = vpop.eup %2053  ;;  %v770_v53 = vmul.f32 0.5, %v702_v48  ;;  %v706_v54 = vadd.f32 %v705_v47, %v2602_v7  ;;  %v869_v47 = vld [vmem:[#allocation8 + $0xc8] sm:$0xff] }
 0x29b   :  { %v895_v57 = vmul.f32 %v2054_v52, %v863_v49  ;;  %v926_v58 = vadd.f32 %v894_v51, %v680_v50 }
 0x29c   :  { %v824_v55 = vmul.f32 1.442695, %v770_v53  ;;  %v771_v60 = vmul.f32 0.5, %v706_v54 }
 0x29d   :  { %v927_v9 = vadd.f32 %v895_v57, %v684_v56 }
 0x29e   :  { %2059 = vpow2.f32 %v824_v55  ;;  %v826_v40 = vmul.f32 1.442695, %v771_v60  ;;  %v709_v37 = vpop.f32.mrb[64].mxu1 }
 0x29f   :  { %v711_v62 = vpop.f32.mrb[65].mxu1  ;;  %v949_v61 = vpack.c.bf16 %v927_v9, %v926_v58  ;;  %v710_v51 = vadd.f32 %v709_v37, %v2608_v29 }
 0x2a0   :  { %v2056_v0 = vpop.eup %2055  ;;  %2061 = vpow2.f32 %v826_v40  ;;  %v712_v2 = vadd.f32 %v711_v62, %v2602_v7  ;;  %v713_v3 = vpop.f32.mrb[66].mxu1 }
 0x2a1   :  { %v715_v1 = vpop.f32.mrb[67].mxu1  ;;  %1876 = vmatmul.mubr.bf16.gmra.mrb[32].mxu0 %v949_v61  ;;  %v896_v5 = vmul.f32 %v2056_v0, %v864_v59  ;;  %v714_v57 = vadd.f32 %v713_v3, %v2608_v29  ;;  %v2013_v59 = vld [vmem:[#allocation11 + $0x30] sm:$0xff]  }
 0x2a2   :  { %v2058_v6 = vpop.eup %2057  ;;  %v772_v10 = vmul.f32 0.5, %v712_v2  ;;  %v716_v12 = vadd.f32 %v715_v1, %v2602_v7  ;;  %v870_v0 = vld [vmem:[#allocation8 + $0xd0] sm:$0xff]  ;;  %1903 = vmatprep.subr.bf16.mxu0 %v2013_v59 }
 0x2a3   :  { %v897_v14 = vmul.f32 %v2058_v6, %v865_v63  ;;  %v928_v15 = vadd.f32 %v896_v5, %v690_v4  ;;  %v871_v5 = vld [vmem:[#allocation8 + $0xd8] sm:$0xff]  ;;  %1904 = vmatpush3.bf16.msra.mxu0 %v2013_v59 }
 0x2a4   :  { %v828_v8 = vmul.f32 1.442695, %v772_v10  ;;  %v773_v16 = vmul.f32 0.5, %v716_v12  ;;  %v2014_v12 = vld [vmem:[#allocation11 + $0x38] sm:$0xff]  }
 0x2a5   :  { %v929_v18 = vadd.f32 %v897_v14, %v694_v13  ;;  %1905 = vmatprep.subr.bf16.mxu0 %v2014_v12 }
 0x2a6   :  { %2063 = vpow2.f32 %v828_v8  ;;  %v830_v20 = vmul.f32 1.442695, %v773_v16  ;;  %v719_v21 = vpop.f32.mrb[68].mxu1 }
 0x2a7   :  { %v721_v22 = vpop.f32.mrb[69].mxu1  ;;  %v950_v19 = vpack.c.bf16 %v929_v18, %v928_v15  ;;  %v720_v3 = vadd.f32 %v719_v21, %v2608_v29  ;;  %1906 = vmatpush3.bf16.msra.mxu0 %v2014_v12  ;;  %v872_v21 = vld [vmem:[#allocation8 + $0xe0] sm:$0xff] }
 0x2a8   :  { %v2060_v24 = vpop.eup %2059  ;;  %2065 = vpow2.f32 %v830_v20  ;;  %v722_v25 = vadd.f32 %v721_v22, %v2602_v7  ;;  %v723_v26 = vpop.f32.mrb[70].mxu1 }
 0x2a9   :  { %v725_v17 = vpop.f32.mrb[71].mxu1  ;;  %1879 = vmatprep.mubr.bf16.mxu0 %v950_v19  ;;  %v898_v28 = vmul.f32 %v2060_v24, %v866_v11  ;;  %v724_v8 = vadd.f32 %v723_v26, %v2608_v29 }
 0x2aa   :  { %v2062_v30 = vpop.eup %2061  ;;  %v774_v32 = vmul.f32 0.5, %v722_v25  ;;  %v726_v33 = vadd.f32 %v725_v17, %v2602_v7 }
 0x2ab   :  { %v899_v35 = vmul.f32 %v2062_v30, %v867_v23  ;;  %v930_v38 = vadd.f32 %v898_v28, %v700_v27  ;;  %v873_v23 = vld [vmem:[#allocation8 + $0xe8] sm:$0xff] }
 0x2ac   :  { %v832_v39 = vmul.f32 1.442695, %v774_v32  ;;  %v775_v41 = vmul.f32 0.5, %v726_v33  ;;  %v874_v33 = vld [vmem:[#allocation8 + $0xf0] sm:$0xff] }
 0x2ad   :  { %v931_v36 = vadd.f32 %v899_v35, %v704_v34 }
 0x2ae   :  { %2067 = vpow2.f32 %v832_v39  ;;  %v834_v44 = vmul.f32 1.442695, %v775_v41  ;;  %v729_v45 = vpop.f32.mrb[72].mxu1 }
 0x2af   :  { %v731_v46 = vpop.f32.mrb[73].mxu1  ;;  %v951_v31 = vpack.c.bf16 %v931_v36, %v930_v38  ;;  %v730_v27 = vadd.f32 %v729_v45, %v2608_v29  ;;  %v875_v38 = vld [vmem:[#allocation8 + $0xf8] sm:$0xff] }
 0x2b0   :  { %v2064_v48 = vpop.eup %2063  ;;  %2069 = vpow2.f32 %v834_v44  ;;  %v732_v49 = vadd.f32 %v731_v46, %v2602_v7  ;;  %v733_v50 = vpop.f32.mrb[74].mxu1 }
 0x2b1   :  { %v735_v43 = vpop.f32.mrb[75].mxu1  ;;  %1880 = vmatmul.mubr.bf16.gmra.mrb[36].mxu0 %v951_v31  ;;  %v900_v52 = vmul.f32 %v2064_v48, %v868_v42  ;;  %v734_v26 = vadd.f32 %v733_v50, %v2608_v29  ;;  %v2694_v48 = vld [vmem:[%s2787_s7] ss:$0 sm:$0xff] }
 0x2b2   :  { %v2066_v53 = vpop.eup %2065  ;;  %v776_v54 = vmul.f32 0.5, %v732_v49  ;;  %v736_v56 = vadd.f32 %v735_v43, %v2602_v7 }
 0x2b3   :  { %v901_v58 = vmul.f32 %v2066_v53, %v869_v47  ;;  %v932_v55 = vadd.f32 %v900_v52, %v710_v51 }
 0x2b4   :  { %v836_v60 = vmul.f32 1.442695, %v776_v54  ;;  %v777_v9 = vmul.f32 0.5, %v736_v56 }
 0x2b5   :  { %v933_v40 = vadd.f32 %v901_v58, %v714_v57 }
 0x2b6   :  { %2071 = vpow2.f32 %v836_v60  ;;  %v838_v62 = vmul.f32 1.442695, %v777_v9  ;;  %v739_v61 = vpop.f32.mrb[76].mxu1 }
 0x2b7   :  { %v741_v37 = vpop.f32.mrb[77].mxu1  ;;  %v952_v2 = vpack.c.bf16 %v933_v40, %v932_v55  ;;  %v740_v39 = vadd.f32 %v739_v61, %v2608_v29 }
 0x2b8   :  { %v2068_v63 = vpop.eup %2067  ;;  %2073 = vpow2.f32 %v838_v62  ;;  %v742_v4 = vadd.f32 %v741_v37, %v2602_v7  ;;  %v743_v1 = vpop.f32.mrb[78].mxu1 }
 0x2b9   :  { %v745_v6 = vpop.f32.mrb[79].mxu1  ;;  %1883 = vmatprep.mubr.bf16.mxu0 %v952_v2  ;;  %v902_v10 = vmul.f32 %v2068_v63, %v870_v0  ;;  %v744_v44 = vadd.f32 %v743_v1, %v2608_v29 }
 0x2ba   :  { %v2070_v13 = vpop.eup %2069  ;;  %v778_v14 = vmul.f32 0.5, %v742_v4  ;;  %v746_v15 = vadd.f32 %v745_v6, %v2602_v7 }
 0x2bb   :  { %v903_v16 = vmul.f32 %v2070_v13, %v871_v5  ;;  %v934_v18 = vadd.f32 %v902_v10, %v720_v3 }
 0x2bc   :  { %v840_v20 = vmul.f32 1.442695, %v778_v14  ;;  %v779_v11 = vmul.f32 0.5, %v746_v15 }
 0x2bd   :  { %v935_v22 = vadd.f32 %v903_v16, %v724_v8 }
 0x2be   :  { %2075 = vpow2.f32 %v840_v20  ;;  %v842_v19 = vmul.f32 1.442695, %v779_v11 }
 0x2bf   :  { %v953_v24 = vpack.c.bf16 %v935_v22, %v934_v18 }
 0x2c0   :  { %v2072_v25 = vpop.eup %2071  ;;  %2077 = vpow2.f32 %v842_v19 }
 0x2c1   :  { %1884 = vmatmul.mubr.bf16.gmra.mrb[40].mxu0 %v953_v24  ;;  %v904_v7 = vmul.f32 %v2072_v25, %v872_v21 }
 0x2c2   :  { %v2074_v17 = vpop.eup %2073 }
 0x2c3   :  { %v905_v28 = vmul.f32 %v2074_v17, %v873_v23  ;;  %v936_v30 = vadd.f32 %v904_v7, %v730_v27 }
 0x2c5   :  { %v937_v32 = vadd.f32 %v905_v28, %v734_v26 }
 0x2c7   :  { %v954_v34 = vpack.c.bf16 %v937_v32, %v936_v30 }
 0x2c8   :  { %v2076_v35 = vpop.eup %2075 }
 0x2c9   :  { %1887 = vmatprep.mubr.bf16.mxu0 %v954_v34  ;;  %v906_v41 = vmul.f32 %v2076_v35, %v874_v33 }
 0x2ca   :  { %v2078_v36 = vpop.eup %2077 }
 0x2cb   :  { %v907_v45 = vmul.f32 %v2078_v36, %v875_v38  ;;  %v938_v42 = vadd.f32 %v906_v41, %v740_v39 }
 0x2cd   :  { %v939_v46 = vadd.f32 %v907_v45, %v744_v44 }
 0x2cf   :  { %v955_v31 = vpack.c.bf16 %v939_v46, %v938_v42 }
 0x2d1   :  { %1888 = vmatmul.mubr.bf16.gmra.mrb[44].mxu0 %v955_v31 }
 0x334   :  { %v1861_v49 = vpop.f32.mrb[16].mxu0 }
 0x335   :  { %v1070_v50 = vadd.f32 %v1861_v49, %v2694_v48  ;;  %v1061_v47 = vpop.f32.mrb[17].mxu0 }
 0x336   :  { %v1062_v51 = vadd.f32 %v2694_v48, %v1061_v47  ;;  %v1862_v43 = vpop.f32.mrb[18].mxu0 }
 0x337   :  { %v1073_v52 = vadd.f32 %v1862_v43, %v2694_v48  ;;  %v1064_v29 = vpop.f32.mrb[19].mxu0  ;;  %v1190_v54 = vmax.f32 %v1070_v50, 0.0 }
 0x338   :  { %v1065_v53 = vadd.f32 %v2694_v48, %v1064_v29  ;;  %v1188_v57 = vmax.f32 %v1062_v51, 0.0 }
 0x339   :  { %v1191_v56 = vmax.f32 %v1073_v52, 0.0 }
 0x33a   :  { %v1189_v58 = vmax.f32 %v1065_v53, 0.0 }
 0x33b   :  { %v1221_v55 = vpack.c.bf16 %v1191_v56, %v1190_v54 }
 0x33c   :  { %v1220_v60 = vpack.c.bf16 %v1189_v58, %v1188_v57 }
 0x33e   :  { %1907 = vmatprep.mubr.bf16.mxu0 %v1220_v60 }
 0x33f   :  { %1908 = vmatmul.mubr.bf16.vlgmr.msra.gmra.mrb[48].mxu0 %v1221_v55 }
 0x344   :  { %v1865_v9 = vpop.f32.mrb[20].mxu0 }
 0x345   :  { %v1086_v40 = vadd.f32 %v1865_v9, %v2694_v48  ;;  %v1077_v59 = vpop.f32.mrb[21].mxu0 }
 0x346   :  { %v1078_v62 = vadd.f32 %v2694_v48, %v1077_v59  ;;  %v1866_v61 = vpop.f32.mrb[22].mxu0 }
 0x347   :  { %v1089_v0 = vadd.f32 %v1866_v61, %v2694_v48  ;;  %v1080_v37 = vpop.f32.mrb[23].mxu0  ;;  %v1194_v63 = vmax.f32 %v1086_v40, 0.0 }
 0x348   :  { %v1081_v2 = vadd.f32 %v2694_v48, %v1080_v37  ;;  %v1192_v1 = vmax.f32 %v1078_v62, 0.0 }
 0x349   :  { %v1195_v4 = vmax.f32 %v1089_v0, 0.0 }
 0x34a   :  { %v1193_v5 = vmax.f32 %v1081_v2, 0.0 }
 0x34b   :  { %v1223_v3 = vpack.c.bf16 %v1195_v4, %v1194_v63 }
 0x34c   :  { %v1222_v6 = vpack.c.bf16 %v1193_v5, %v1192_v1 }
 0x34e   :  { %1911 = vmatprep.mubr.bf16.mxu0 %v1222_v6 }
 0x34f   :  { %1912 = vmatmul.mubr.bf16.gmra.mrb[52].mxu0 %v1223_v3 }
 0x354   :  { %v1869_v10 = vpop.f32.mrb[24].mxu0 }
 0x355   :  { %v1102_v12 = vadd.f32 %v1869_v10, %v2694_v48  ;;  %v1093_v13 = vpop.f32.mrb[25].mxu0 }
 0x356   :  { %v1094_v14 = vadd.f32 %v2694_v48, %v1093_v13  ;;  %v1870_v15 = vpop.f32.mrb[26].mxu0 }
 0x357   :  { %v1105_v8 = vadd.f32 %v1870_v15, %v2694_v48  ;;  %v1096_v16 = vpop.f32.mrb[27].mxu0  ;;  %v1198_v20 = vmax.f32 %v1102_v12, 0.0 }
 0x358   :  { %v1097_v18 = vadd.f32 %v2694_v48, %v1096_v16  ;;  %v1196_v22 = vmax.f32 %v1094_v14, 0.0 }
 0x359   :  { %v1199_v11 = vmax.f32 %v1105_v8, 0.0 }
 0x35a   :  { %v1197_v19 = vmax.f32 %v1097_v18, 0.0 }
 0x35b   :  { %v1225_v21 = vpack.c.bf16 %v1199_v11, %v1198_v20 }
 0x35c   :  { %v1224_v24 = vpack.c.bf16 %v1197_v19, %v1196_v22 }
 0x35e   :  { %1915 = vmatprep.mubr.bf16.mxu0 %v1224_v24 }
 0x35f   :  { %1916 = vmatmul.mubr.bf16.gmra.mrb[56].mxu0 %v1225_v21 }
 0x364   :  { %v1873_v25 = vpop.f32.mrb[28].mxu0 }
 0x365   :  { %v1118_v23 = vadd.f32 %v1873_v25, %v2694_v48  ;;  %v1109_v27 = vpop.f32.mrb[29].mxu0 }
 0x366   :  { %v1110_v7 = vadd.f32 %v2694_v48, %v1109_v27  ;;  %v1874_v17 = vpop.f32.mrb[30].mxu0 }
 0x367   :  { %v1121_v26 = vadd.f32 %v1874_v17, %v2694_v48  ;;  %v1112_v28 = vpop.f32.mrb[31].mxu0  ;;  %v1202_v32 = vmax.f32 %v1118_v23, 0.0 }
 0x368   :  { %v1113_v30 = vadd.f32 %v2694_v48, %v1112_v28  ;;  %v1200_v34 = vmax.f32 %v1110_v7, 0.0 }
 0x369   :  { %v1203_v33 = vmax.f32 %v1121_v26, 0.0 }
 0x36a   :  { %v1201_v35 = vmax.f32 %v1113_v30, 0.0  ;;  %v2731_v30 = vld [vmem:[%s2789_s9] ss:$0 sm:$0xff]  ;;  %s2382_s9 = smov [#allocation13]  }
 0x36b   :  { %v1227_v38 = vpack.c.bf16 %v1203_v33, %v1202_v32  ;;  %s1665_s5 = sshll.u32 %s2382_s9, 4  ;;  %s1666_s5 = int_to_ptr.vmem [resolvable:$true] %s1665_s5 }
 0x36c   :  { %v1226_v39 = vpack.c.bf16 %v1201_v35, %v1200_v34  ;;  %s2339_s28 = scalar_lea.vmem %s1666_s5, 4096  ;;  %p2344_p7 = scmp.lt.s32.totalorder %s1666_s5, %s1666_s5 }
 0x36d   :  { %p2340_p6 = scmp.ne.s32.totalorder %s1666_s5, %s2339_s28  ;;  %p2345_p8 = scmp.lt.s32.totalorder %s2339_s28, %s2339_s28 }
 0x36e   :  { %1919 = vmatprep.mubr.bf16.mxu0 %v1226_v39 }
 0x36f   :  { %1920 = vmatmul.mubr.bf16.gmra.mrb[60].mxu0 %v1227_v38  ;;  %p2346_p9 = por %p2345_p8, %p2344_p7 }
 0x371   :  { %p2347_p10 = pnand %p2346_p9, %p2340_p6 }
 0x374   :  { %v1877_v41 = vpop.f32.mrb[32].mxu0 }
 0x375   :  { %v1134_v36 = vadd.f32 %v1877_v41, %v2694_v48  ;;  %v1125_v44 = vpop.f32.mrb[33].mxu0 }
 0x376   :  { %v1126_v45 = vadd.f32 %v2694_v48, %v1125_v44  ;;  %v1878_v42 = vpop.f32.mrb[34].mxu0 }
 0x377   :  { %v1137_v46 = vadd.f32 %v1878_v42, %v2694_v48  ;;  %v1128_v31 = vpop.f32.mrb[35].mxu0  ;;  %v1206_v50 = vmax.f32 %v1134_v36, 0.0 }
 0x378   :  { %v1129_v49 = vadd.f32 %v2694_v48, %v1128_v31  ;;  %v1204_v51 = vmax.f32 %v1126_v45, 0.0 }
 0x379   :  { %v1207_v47 = vmax.f32 %v1137_v46, 0.0 }
 0x37a   :  { %v1205_v43 = vmax.f32 %v1129_v49, 0.0 }
 0x37b   :  { %v1229_v52 = vpack.c.bf16 %v1207_v47, %v1206_v50 }
 0x37c   :  { %v1228_v29 = vpack.c.bf16 %v1205_v43, %v1204_v51 }
 0x37e   :  { %1923 = vmatprep.mubr.bf16.mxu0 %v1228_v29 }
 0x37f   :  { %1924 = vmatmul.mubr.bf16.gmra.mrb[64].mxu0 %v1229_v52 }
 0x384   :  { %v1881_v53 = vpop.f32.mrb[36].mxu0 }
 0x385   :  { %v1150_v54 = vadd.f32 %v1881_v53, %v2694_v48  ;;  %v1141_v56 = vpop.f32.mrb[37].mxu0 }
 0x386   :  { %v1142_v57 = vadd.f32 %v2694_v48, %v1141_v56  ;;  %v1882_v58 = vpop.f32.mrb[38].mxu0 }
 0x387   :  { %v1153_v55 = vadd.f32 %v1882_v58, %v2694_v48  ;;  %v1144_v60 = vpop.f32.mrb[39].mxu0  ;;  %v1210_v40 = vmax.f32 %v1150_v54, 0.0 }
 0x388   :  { %v1145_v9 = vadd.f32 %v2694_v48, %v1144_v60  ;;  %v1208_v62 = vmax.f32 %v1142_v57, 0.0 }
 0x389   :  { %v1211_v59 = vmax.f32 %v1153_v55, 0.0 }
 0x38a   :  { %v1209_v61 = vmax.f32 %v1145_v9, 0.0 }
 0x38b   :  { %v1231_v0 = vpack.c.bf16 %v1211_v59, %v1210_v40 }
 0x38c   :  { %v1230_v37 = vpack.c.bf16 %v1209_v61, %v1208_v62 }
 0x38e   :  { %1927 = vmatprep.mubr.bf16.mxu0 %v1230_v37 }
 0x38f   :  { %1928 = vmatmul.mubr.bf16.gmra.mrb[68].mxu0 %v1231_v0 }
 0x394   :  { %v1885_v2 = vpop.f32.mrb[40].mxu0 }
 0x395   :  { %v1166_v63 = vadd.f32 %v1885_v2, %v2694_v48  ;;  %v1157_v4 = vpop.f32.mrb[41].mxu0 }
 0x396   :  { %v1158_v1 = vadd.f32 %v2694_v48, %v1157_v4  ;;  %v1886_v5 = vpop.f32.mrb[42].mxu0 }
 0x397   :  { %v1169_v3 = vadd.f32 %v1886_v5, %v2694_v48  ;;  %v1160_v6 = vpop.f32.mrb[43].mxu0  ;;  %v1214_v12 = vmax.f32 %v1166_v63, 0.0 }
 0x398   :  { %v1161_v10 = vadd.f32 %v2694_v48, %v1160_v6  ;;  %v1212_v14 = vmax.f32 %v1158_v1, 0.0 }
 0x399   :  { %v1215_v13 = vmax.f32 %v1169_v3, 0.0 }
 0x39a   :  { %v1213_v15 = vmax.f32 %v1161_v10, 0.0 }
 0x39b   :  { %v1233_v8 = vpack.c.bf16 %v1215_v13, %v1214_v12 }
 0x39c   :  { %v1232_v16 = vpack.c.bf16 %v1213_v15, %v1212_v14 }
 0x39e   :  { %1931 = vmatprep.mubr.bf16.mxu0 %v1232_v16 }
 0x39f   :  { %1932 = vmatmul.mubr.bf16.gmra.mrb[72].mxu0 %v1233_v8 }
 0x3a4   :  { %v1889_v18 = vpop.f32.mrb[44].mxu0 }
 0x3a5   :  { %v1182_v20 = vadd.f32 %v1889_v18, %v2694_v48  ;;  %v1173_v11 = vpop.f32.mrb[45].mxu0 }
 0x3a6   :  { %v1174_v22 = vadd.f32 %v2694_v48, %v1173_v11  ;;  %v1890_v19 = vpop.f32.mrb[46].mxu0 }
 0x3a7   :  { %v1185_v21 = vadd.f32 %v1890_v19, %v2694_v48  ;;  %v1176_v24 = vpop.f32.mrb[47].mxu0  ;;  %v1218_v23 = vmax.f32 %v1182_v20, 0.0 }
 0x3a8   :  { %v1177_v25 = vadd.f32 %v2694_v48, %v1176_v24  ;;  %v1216_v7 = vmax.f32 %v1174_v22, 0.0 }
 0x3a9   :  { %v1219_v27 = vmax.f32 %v1185_v21, 0.0 }
 0x3aa   :  { %v1217_v17 = vmax.f32 %v1177_v25, 0.0 }
 0x3ab   :  { %v1235_v26 = vpack.c.bf16 %v1219_v27, %v1218_v23 }
 0x3ac   :  { %v1234_v28 = vpack.c.bf16 %v1217_v17, %v1216_v7 }
 0x3ae   :  { %1935 = vmatprep.mubr.bf16.mxu0 %v1234_v28 }
 0x3af   :  { %1936 = vmatmul.mubr.bf16.gmra.mrb[76].mxu0 %v1235_v26 }
 0x412   :  { %v1909_v32 = vpop.f32.mrb[48].mxu0 }
 0x413   :  { %v1350_v33 = vadd.f32 %v1909_v32, %v2731_v30  ;;  %v1341_v34 = vpop.f32.mrb[49].mxu0 }
 0x414   :  { %v1342_v35 = vadd.f32 %v2731_v30, %v1341_v34  ;;  %v1910_v48 = vpop.f32.mrb[50].mxu0 }
 0x415   :  { %v1470_v38 = vsub.f32 0.0, %v1350_v33  ;;  %v1353_v39 = vadd.f32 %v1910_v48, %v2731_v30  ;;  %v1344_v41 = vpop.f32.mrb[51].mxu0 }
 0x416   :  { %v1468_v36 = vsub.f32 0.0, %v1342_v35  ;;  %v1345_v44 = vadd.f32 %v2731_v30, %v1344_v41 }
 0x417   :  { %v1504_v45 = vmul.f32 1.442695, %v1470_v38  ;;  %v1471_v42 = vsub.f32 0.0, %v1353_v39 }
 0x418   :  { %v1500_v46 = vmul.f32 1.442695, %v1468_v36  ;;  %v1469_v31 = vsub.f32 0.0, %v1345_v44 }
 0x419   :  { %2079 = vpow2.f32 %v1504_v45  ;;  %v1506_v49 = vmul.f32 1.442695, %v1471_v42 }
 0x41a   :  { %2081 = vpow2.f32 %v1500_v46  ;;  %v1502_v50 = vmul.f32 1.442695, %v1469_v31 }
 0x41b   :  { %2083 = vpow2.f32 %v1506_v49 }
 0x41c   :  { %2085 = vpow2.f32 %v1502_v50 }
 0x422   :  { %v1913_v47 = vpop.f32.mrb[52].mxu0 }
 0x423   :  { %v2080_v51 = vpop.eup %2079  ;;  %v1366_v43 = vadd.f32 %v1913_v47, %v2731_v30  ;;  %v1357_v52 = vpop.f32.mrb[53].mxu0 }
 0x424   :  { %v2082_v29 = vpop.eup %2081  ;;  %v1566_v53 = vadd.f32 1.0, %v2080_v51  ;;  %v1358_v54 = vadd.f32 %v2731_v30, %v1357_v52  ;;  %v1914_v56 = vpop.f32.mrb[54].mxu0 }
 0x425   :  { %v2084_v57 = vpop.eup %2083  ;;  %v1564_v58 = vadd.f32 1.0, %v2082_v29  ;;  %v1474_v55 = vsub.f32 0.0, %v1366_v43  ;;  %v1369_v60 = vadd.f32 %v1914_v56, %v2731_v30  ;;  %v1360_v9 = vpop.f32.mrb[55].mxu0 }
 0x426   :  { %v2086_v40 = vpop.eup %2085  ;;  %2087 = vrcp.f32 %v1566_v53  ;;  %v1567_v59 = vadd.f32 1.0, %v2084_v57  ;;  %v1472_v62 = vsub.f32 0.0, %v1358_v54  ;;  %v1361_v61 = vadd.f32 %v2731_v30, %v1360_v9 }
 0x427   :  { %2089 = vrcp.f32 %v1564_v58  ;;  %v1565_v0 = vadd.f32 1.0, %v2086_v40  ;;  %v1512_v37 = vmul.f32 1.442695, %v1474_v55  ;;  %v1475_v2 = vsub.f32 0.0, %v1369_v60 }
 0x428   :  { %2091 = vrcp.f32 %v1567_v59  ;;  %v1508_v63 = vmul.f32 1.442695, %v1472_v62  ;;  %v1473_v4 = vsub.f32 0.0, %v1361_v61 }
 0x429   :  { %2093 = vrcp.f32 %v1565_v0  ;;  %v1514_v1 = vmul.f32 1.442695, %v1475_v2 }
 0x42a   :  { %2095 = vpow2.f32 %v1512_v37  ;;  %v1510_v5 = vmul.f32 1.442695, %v1473_v4 }
 0x42b   :  { %2097 = vpow2.f32 %v1508_v63 }
 0x42c   :  { %2099 = vpow2.f32 %v1514_v1 }
 0x42d   :  { %2101 = vpow2.f32 %v1510_v5 }
 0x430   :  { %v2088_v3 = vpop.eup %2087 }
 0x431   :  { %v2090_v6 = vpop.eup %2089  ;;  %1630 = vst [vmem:[#allocation13 + $0x10] sm:$0xff] %v2088_v3 }
 0x432   :  { %v2092_v10 = vpop.eup %2091  ;;  %1628 = vst [vmem:[#allocation13] sm:$0xff] %v2090_v6  ;;  %v1917_v12 = vpop.f32.mrb[56].mxu0 }
 0x433   :  { %v2094_v13 = vpop.eup %2093  ;;  %1631 = vst [vmem:[#allocation13 + $0x18] sm:$0xff] %v2092_v10  ;;  %v1382_v14 = vadd.f32 %v1917_v12, %v2731_v30  ;;  %v1373_v15 = vpop.f32.mrb[57].mxu0 }
 0x434   :  { %v2096_v8 = vpop.eup %2095  ;;  %1629 = vst [vmem:[#allocation13 + $0x8] sm:$0xff] %v2094_v13  ;;  %v1374_v16 = vadd.f32 %v2731_v30, %v1373_v15  ;;  %v1918_v18 = vpop.f32.mrb[58].mxu0 }
 0x435   :  { %v2098_v20 = vpop.eup %2097  ;;  %v1570_v11 = vadd.f32 1.0, %v2096_v8  ;;  %v1478_v22 = vsub.f32 0.0, %v1382_v14  ;;  %v1385_v19 = vadd.f32 %v1918_v18, %v2731_v30  ;;  %v1376_v21 = vpop.f32.mrb[59].mxu0 }
 0x436   :  { %v2100_v24 = vpop.eup %2099  ;;  %v1568_v25 = vadd.f32 1.0, %v2098_v20  ;;  %v1476_v23 = vsub.f32 0.0, %v1374_v16  ;;  %v1377_v27 = vadd.f32 %v2731_v30, %v1376_v21 }
 0x437   :  { %v2102_v7 = vpop.eup %2101  ;;  %2103 = vrcp.f32 %v1570_v11  ;;  %v1571_v17 = vadd.f32 1.0, %v2100_v24  ;;  %v1520_v26 = vmul.f32 1.442695, %v1478_v22  ;;  %v1479_v28 = vsub.f32 0.0, %v1385_v19 }
 0x438   :  { %2105 = vrcp.f32 %v1568_v25  ;;  %v1569_v32 = vadd.f32 1.0, %v2102_v7  ;;  %v1516_v33 = vmul.f32 1.442695, %v1476_v23  ;;  %v1477_v34 = vsub.f32 0.0, %v1377_v27 }
 0x439   :  { %2107 = vrcp.f32 %v1571_v17  ;;  %v1522_v35 = vmul.f32 1.442695, %v1479_v28 }
 0x43a   :  { %2109 = vrcp.f32 %v1569_v32  ;;  %v1518_v48 = vmul.f32 1.442695, %v1477_v34 }
 0x43b   :  { %2111 = vpow2.f32 %v1520_v26 }
 0x43c   :  { %2113 = vpow2.f32 %v1516_v33 }
 0x43d   :  { %2115 = vpow2.f32 %v1522_v35 }
 0x43e   :  { %2117 = vpow2.f32 %v1518_v48 }
 0x441   :  { %v2104_v38 = vpop.eup %2103 }
 0x442   :  { %v2106_v39 = vpop.eup %2105  ;;  %1634 = vst [vmem:[#allocation13 + $0x30] sm:$0xff] %v2104_v38  ;;  %v1921_v41 = vpop.f32.mrb[60].mxu0 }
 0x443   :  { %v2108_v36 = vpop.eup %2107  ;;  %1632 = vst [vmem:[#allocation13 + $0x20] sm:$0xff] %v2106_v39  ;;  %v1398_v44 = vadd.f32 %v1921_v41, %v2731_v30  ;;  %v1389_v45 = vpop.f32.mrb[61].mxu0 }
 0x444   :  { %v2110_v42 = vpop.eup %2109  ;;  %1635 = vst [vmem:[#allocation13 + $0x38] sm:$0xff] %v2108_v36  ;;  %v1390_v46 = vadd.f32 %v2731_v30, %v1389_v45  ;;  %v1922_v31 = vpop.f32.mrb[62].mxu0 }
 0x445   :  { %v2112_v49 = vpop.eup %2111  ;;  %1633 = vst [vmem:[#allocation13 + $0x28] sm:$0xff] %v2110_v42  ;;  %v1482_v50 = vsub.f32 0.0, %v1398_v44  ;;  %v1401_v47 = vadd.f32 %v1922_v31, %v2731_v30  ;;  %v1392_v51 = vpop.f32.mrb[63].mxu0 }
 0x446   :  { %v2114_v43 = vpop.eup %2113  ;;  %v1574_v52 = vadd.f32 1.0, %v2112_v49  ;;  %v1480_v29 = vsub.f32 0.0, %v1390_v46  ;;  %v1393_v53 = vadd.f32 %v2731_v30, %v1392_v51 }
 0x447   :  { %v2116_v54 = vpop.eup %2115  ;;  %v1572_v56 = vadd.f32 1.0, %v2114_v43  ;;  %v1483_v57 = vsub.f32 0.0, %v1401_v47  ;;  %v1528_v60 = vmul.f32 1.442695, %v1482_v50 }
 0x448   :  { %v2118_v58 = vpop.eup %2117  ;;  %2119 = vrcp.f32 %v1574_v52  ;;  %v1575_v55 = vadd.f32 1.0, %v2116_v54  ;;  %v1481_v9 = vsub.f32 0.0, %v1393_v53  ;;  %v1524_v59 = vmul.f32 1.442695, %v1480_v29 }
 0x449   :  { %2121 = vrcp.f32 %v1572_v56  ;;  %v1573_v40 = vadd.f32 1.0, %v2118_v58  ;;  %v1530_v62 = vmul.f32 1.442695, %v1483_v57 }
 0x44a   :  { %2123 = vrcp.f32 %v1575_v55  ;;  %v1526_v61 = vmul.f32 1.442695, %v1481_v9 }
 0x44b   :  { %2125 = vrcp.f32 %v1573_v40 }
 0x44c   :  { %2127 = vpow2.f32 %v1528_v60 }
 0x44d   :  { %2129 = vpow2.f32 %v1524_v59 }
 0x44e   :  { %2131 = vpow2.f32 %v1530_v62 }
 0x44f   :  { %2133 = vpow2.f32 %v1526_v61 }
 0x452   :  { %v2120_v0 = vpop.eup %2119  ;;  %v1925_v37 = vpop.f32.mrb[64].mxu0 }
 0x453   :  { %v2122_v2 = vpop.eup %2121  ;;  %1638 = vst [vmem:[#allocation13 + $0x50] sm:$0xff] %v2120_v0  ;;  %v1414_v63 = vadd.f32 %v1925_v37, %v2731_v30  ;;  %v1405_v4 = vpop.f32.mrb[65].mxu0 }
 0x454   :  { %v2124_v1 = vpop.eup %2123  ;;  %1636 = vst [vmem:[#allocation13 + $0x40] sm:$0xff] %v2122_v2  ;;  %v1406_v5 = vadd.f32 %v2731_v30, %v1405_v4  ;;  %v1926_v3 = vpop.f32.mrb[66].mxu0 }
 0x455   :  { %v2126_v6 = vpop.eup %2125  ;;  %1639 = vst [vmem:[#allocation13 + $0x58] sm:$0xff] %v2124_v1  ;;  %v1486_v10 = vsub.f32 0.0, %v1414_v63  ;;  %v1417_v12 = vadd.f32 %v1926_v3, %v2731_v30  ;;  %v1408_v13 = vpop.f32.mrb[67].mxu0 }
 0x456   :  { %v2128_v14 = vpop.eup %2127  ;;  %1637 = vst [vmem:[#allocation13 + $0x48] sm:$0xff] %v2126_v6  ;;  %v1484_v15 = vsub.f32 0.0, %v1406_v5  ;;  %v1409_v8 = vadd.f32 %v2731_v30, %v1408_v13 }
 0x457   :  { %v2130_v16 = vpop.eup %2129  ;;  %v1578_v18 = vadd.f32 1.0, %v2128_v14  ;;  %v1487_v20 = vsub.f32 0.0, %v1417_v12  ;;  %v1536_v25 = vmul.f32 1.442695, %v1486_v10 }
 0x458   :  { %v2132_v11 = vpop.eup %2131  ;;  %v1576_v22 = vadd.f32 1.0, %v2130_v16  ;;  %v1485_v19 = vsub.f32 0.0, %v1409_v8  ;;  %v1532_v27 = vmul.f32 1.442695, %v1484_v15 }
 0x459   :  { %v2134_v21 = vpop.eup %2133  ;;  %2135 = vrcp.f32 %v1578_v18  ;;  %v1579_v24 = vadd.f32 1.0, %v2132_v11  ;;  %v1538_v7 = vmul.f32 1.442695, %v1487_v20 }
 0x45a   :  { %2137 = vrcp.f32 %v1576_v22  ;;  %v1577_v23 = vadd.f32 1.0, %v2134_v21  ;;  %v1534_v17 = vmul.f32 1.442695, %v1485_v19 }
 0x45b   :  { %2139 = vrcp.f32 %v1579_v24 }
 0x45c   :  { %2141 = vrcp.f32 %v1577_v23 }
 0x45d   :  { %2143 = vpow2.f32 %v1536_v25 }
 0x45e   :  { %2145 = vpow2.f32 %v1532_v27 }
 0x45f   :  { %2147 = vpow2.f32 %v1538_v7 }
 0x460   :  { %2149 = vpow2.f32 %v1534_v17 }
 0x462   :  { %v1929_v26 = vpop.f32.mrb[68].mxu0 }
 0x463   :  { %v2136_v28 = vpop.eup %2135  ;;  %v1430_v32 = vadd.f32 %v1929_v26, %v2731_v30  ;;  %v1421_v33 = vpop.f32.mrb[69].mxu0 }
 0x464   :  { %v2138_v34 = vpop.eup %2137  ;;  %1642 = vst [vmem:[#allocation13 + $0x70] sm:$0xff] %v2136_v28  ;;  %v1422_v35 = vadd.f32 %v2731_v30, %v1421_v33  ;;  %v1930_v48 = vpop.f32.mrb[70].mxu0 }
 0x465   :  { %v2140_v38 = vpop.eup %2139  ;;  %1640 = vst [vmem:[#allocation13 + $0x60] sm:$0xff] %v2138_v34  ;;  %v1490_v39 = vsub.f32 0.0, %v1430_v32  ;;  %v1433_v41 = vadd.f32 %v1930_v48, %v2731_v30  ;;  %v1424_v36 = vpop.f32.mrb[71].mxu0 }
 0x466   :  { %v2142_v44 = vpop.eup %2141  ;;  %1643 = vst [vmem:[#allocation13 + $0x78] sm:$0xff] %v2140_v38  ;;  %v1488_v45 = vsub.f32 0.0, %v1422_v35  ;;  %v1425_v42 = vadd.f32 %v2731_v30, %v1424_v36 }
 0x467   :  { %v2144_v46 = vpop.eup %2143  ;;  %1641 = vst [vmem:[#allocation13 + $0x68] sm:$0xff] %v2142_v44  ;;  %v1544_v31 = vmul.f32 1.442695, %v1490_v39  ;;  %v1491_v49 = vsub.f32 0.0, %v1433_v41 }
 0x468   :  { %v2146_v50 = vpop.eup %2145  ;;  %v1582_v47 = vadd.f32 1.0, %v2144_v46  ;;  %v1489_v51 = vsub.f32 0.0, %v1425_v42  ;;  %v1540_v54 = vmul.f32 1.442695, %v1488_v45 }
 0x469   :  { %v2148_v43 = vpop.eup %2147  ;;  %v1580_v52 = vadd.f32 1.0, %v2146_v50  ;;  %2151 = vpow2.f32 %v1544_v31  ;;  %v1546_v57 = vmul.f32 1.442695, %v1491_v49 }
 0x46a   :  { %v2150_v29 = vpop.eup %2149  ;;  %2153 = vrcp.f32 %v1582_v47  ;;  %v1583_v53 = vadd.f32 1.0, %v2148_v43  ;;  %v1542_v58 = vmul.f32 1.442695, %v1489_v51 }
 0x46b   :  { %2155 = vrcp.f32 %v1580_v52  ;;  %v1581_v56 = vadd.f32 1.0, %v2150_v29 }
 0x46c   :  { %2157 = vrcp.f32 %v1583_v53 }
 0x46d   :  { %2159 = vrcp.f32 %v1581_v56 }
 0x46e   :  { %2161 = vpow2.f32 %v1540_v54 }
 0x46f   :  { %2163 = vpow2.f32 %v1546_v57 }
 0x470   :  { %2165 = vpow2.f32 %v1542_v58 }
 0x472   :  { %v1933_v55 = vpop.f32.mrb[72].mxu0 }
 0x473   :  { %v2152_v60 = vpop.eup %2151  ;;  %v1446_v9 = vadd.f32 %v1933_v55, %v2731_v30  ;;  %v1437_v40 = vpop.f32.mrb[73].mxu0 }
 0x474   :  { %v2154_v59 = vpop.eup %2153  ;;  %v1586_v62 = vadd.f32 1.0, %v2152_v60  ;;  %v1438_v61 = vadd.f32 %v2731_v30, %v1437_v40  ;;  %v1934_v0 = vpop.f32.mrb[74].mxu0 }
 0x475   :  { %v2156_v37 = vpop.eup %2155  ;;  %1646 = vst [vmem:[#allocation13 + $0x90] sm:$0xff] %v2154_v59  ;;  %v1494_v2 = vsub.f32 0.0, %v1446_v9  ;;  %v1449_v63 = vadd.f32 %v1934_v0, %v2731_v30  ;;  %v1440_v4 = vpop.f32.mrb[75].mxu0 }
 0x476   :  { %v2158_v1 = vpop.eup %2157  ;;  %1644 = vst [vmem:[#allocation13 + $0x80] sm:$0xff] %v2156_v37  ;;  %2167 = vrcp.f32 %v1586_v62  ;;  %v1492_v5 = vsub.f32 0.0, %v1438_v61  ;;  %v1441_v3 = vadd.f32 %v2731_v30, %v1440_v4 }
 0x477   :  { %v2160_v6 = vpop.eup %2159  ;;  %1647 = vst [vmem:[#allocation13 + $0x98] sm:$0xff] %v2158_v1  ;;  %v1552_v10 = vmul.f32 1.442695, %v1494_v2  ;;  %v1495_v12 = vsub.f32 0.0, %v1449_v63 }
 0x478   :  { %v2162_v13 = vpop.eup %2161  ;;  %1645 = vst [vmem:[#allocation13 + $0x88] sm:$0xff] %v2160_v6  ;;  %v1548_v14 = vmul.f32 1.442695, %v1492_v5  ;;  %v1493_v15 = vsub.f32 0.0, %v1441_v3 }
 0x479   :  { %v2164_v8 = vpop.eup %2163  ;;  %v1584_v16 = vadd.f32 1.0, %v2162_v13  ;;  %2169 = vpow2.f32 %v1552_v10  ;;  %v1554_v11 = vmul.f32 1.442695, %v1495_v12 }
 0x47a   :  { %v2166_v18 = vpop.eup %2165  ;;  %v1587_v20 = vadd.f32 1.0, %v2164_v8  ;;  %2171 = vpow2.f32 %v1548_v14  ;;  %v1550_v19 = vmul.f32 1.442695, %v1493_v15 }
 0x47b   :  { %2173 = vrcp.f32 %v1584_v16  ;;  %v1585_v22 = vadd.f32 1.0, %v2166_v18 }
 0x47c   :  { %2175 = vrcp.f32 %v1587_v20 }
 0x47d   :  { %2177 = vrcp.f32 %v1585_v22 }
 0x47e   :  { %2179 = vpow2.f32 %v1554_v11 }
 0x47f   :  { %2181 = vpow2.f32 %v1550_v19 }
 0x480   :  { %v2168_v21 = vpop.eup %2167 }
 0x481   :  { %1650 = vst [vmem:[#allocation13 + $0xb0] sm:$0xff] %v2168_v21 }
 0x482   :  { %v1937_v24 = vpop.f32.mrb[76].mxu0 }
 0x483   :  { %v2170_v25 = vpop.eup %2169  ;;  %v1462_v23 = vadd.f32 %v1937_v24, %v2731_v30  ;;  %v1453_v27 = vpop.f32.mrb[77].mxu0 }
 0x484   :  { %v2172_v7 = vpop.eup %2171  ;;  %v1590_v17 = vadd.f32 1.0, %v2170_v25  ;;  %v1454_v26 = vadd.f32 %v2731_v30, %v1453_v27  ;;  %v1938_v28 = vpop.f32.mrb[78].mxu0 }
 0x485   :  { %v2174_v32 = vpop.eup %2173  ;;  %v1588_v33 = vadd.f32 1.0, %v2172_v7  ;;  %v1498_v34 = vsub.f32 0.0, %v1462_v23  ;;  %v1465_v35 = vadd.f32 %v1938_v28, %v2731_v30  ;;  %v1456_v48 = vpop.f32.mrb[79].mxu0 }
 0x486   :  { %v2176_v38 = vpop.eup %2175  ;;  %1648 = vst [vmem:[#allocation13 + $0xa0] sm:$0xff] %v2174_v32  ;;  %2183 = vrcp.f32 %v1590_v17  ;;  %v1496_v39 = vsub.f32 0.0, %v1454_v26  ;;  %v1457_v41 = vadd.f32 %v2731_v30, %v1456_v48 }
 0x487   :  { %v2178_v36 = vpop.eup %2177  ;;  %1651 = vst [vmem:[#allocation13 + $0xb8] sm:$0xff] %v2176_v38  ;;  %2185 = vrcp.f32 %v1588_v33  ;;  %v1560_v44 = vmul.f32 1.442695, %v1498_v34  ;;  %v1499_v45 = vsub.f32 0.0, %v1465_v35 }
 0x488   :  { %v2180_v42 = vpop.eup %2179  ;;  %1649 = vst [vmem:[#allocation13 + $0xa8] sm:$0xff] %v2178_v36  ;;  %v1556_v46 = vmul.f32 1.442695, %v1496_v39  ;;  %v1497_v31 = vsub.f32 0.0, %v1457_v41 }
 0x489   :  { %v2182_v49 = vpop.eup %2181  ;;  %v1591_v50 = vadd.f32 1.0, %v2180_v42  ;;  %2187 = vpow2.f32 %v1560_v44  ;;  %v1562_v47 = vmul.f32 1.442695, %v1499_v45 }
 0x48a   :  { %v1589_v51 = vadd.f32 1.0, %v2182_v49  ;;  %2189 = vpow2.f32 %v1556_v46  ;;  %v1558_v43 = vmul.f32 1.442695, %v1497_v31 }
 0x48b   :  { %2191 = vrcp.f32 %v1591_v50 }
 0x48c   :  { %2193 = vrcp.f32 %v1589_v51 }
 0x48d   :  { %2195 = vpow2.f32 %v1562_v47 }
 0x48e   :  { %2197 = vpow2.f32 %v1558_v43 }
 0x490   :  { %v2184_v30 = vpop.eup %2183 }
 0x491   :  { %v2186_v52 = vpop.eup %2185  ;;  %1654 = vst [vmem:[#allocation13 + $0xd0] sm:$0xff] %v2184_v30 }
 0x492   :  { %1652 = vst [vmem:[#allocation13 + $0xc0] sm:$0xff] %v2186_v52 }
 0x493   :  { %v2188_v29 = vpop.eup %2187 }
 0x494   :  { %v2190_v53 = vpop.eup %2189  ;;  %v1594_v54 = vadd.f32 1.0, %v2188_v29 }
 0x495   :  { %v2192_v56 = vpop.eup %2191  ;;  %v1592_v57 = vadd.f32 1.0, %v2190_v53 }
 0x496   :  { %v2194_v58 = vpop.eup %2193  ;;  %1655 = vst [vmem:[#allocation13 + $0xd8] sm:$0xff] %v2192_v56  ;;  %2199 = vrcp.f32 %v1594_v54 }
 0x497   :  { %v2196_v55 = vpop.eup %2195  ;;  %1653 = vst [vmem:[#allocation13 + $0xc8] sm:$0xff] %v2194_v58  ;;  %2201 = vrcp.f32 %v1592_v57 }
 0x498   :  { %v2198_v60 = vpop.eup %2197  ;;  %v1595_v9 = vadd.f32 1.0, %v2196_v55 }
 0x499   :  { %v1593_v40 = vadd.f32 1.0, %v2198_v60 }
 0x49a   :  { %2203 = vrcp.f32 %v1595_v9 }
 0x49b   :  { %2205 = vrcp.f32 %v1593_v40 }
 0x4a0   :  { %v2200_v59 = vpop.eup %2199 }
 0x4a1   :  { %v2202_v62 = vpop.eup %2201  ;;  %1658 = vst [vmem:[#allocation13 + $0xf0] sm:$0xff] %v2200_v59 }
 0x4a2   :  { %1656 = vst [vmem:[#allocation13 + $0xe0] sm:$0xff] %v2202_v62 }
 0x4a4   :  { %v2204_v61 = vpop.eup %2203 }
 0x4a5   :  { %v2206_v0 = vpop.eup %2205  ;;  %1659 = vst [vmem:[#allocation13 + $0xf8] sm:$0xff] %v2204_v61 }
 0x4a6   :  { %1657 = vst [vmem:[#allocation13 + $0xe8] sm:$0xff] %v2206_v0 }
 0x4a7   :  { %2350 = shalt.err (!%p2347_p10)
}
 0x4a8   :  { %s2351_s1 = scalar_lea.hbm %s2790_s10, 4096 }
 0x4a9   :  { %p2352_p11 = scmp.ne.s32.totalorder %s2790_s10, %s2351_s1  ;;  %p2355_p12 = scmp.lt.u32.totalorder %s2351_s1, %s2790_s10 }
 0x4ab   :  { %p2357_p13 = pnand %p2355_p12, %p2352_p11 }
 0x4ad   :  { %2360 = shalt.err (!%p2357_p13)
}
 0x4ae   :  { %1671 = dma.vmem_to_hbm [thread:$0]  %s1666_s5, 4096, %s2790_s10, [#allocation4], %s2376_s14, %s2376_s14, %s2377_s19  }
 0x4af   :  { %2369 = dma.done.wait [#allocation4], 4096  }
 0x4b0   :  { %2370 = vsyncadd [#allocation4], 4294963200 }
 0x4b1   :  { %1675 = vsyncpa [#allocation3], 1 }
 0x4b2   :  { %1676 = vsyncpa [#allocation6], 1 }
 0x4b3   :  { %1677 = vsyncpa [#allocation9], 1 }
 0x4b4   :  { %1678 = vsyncpa [#allocation12], 1 }
 0x4b5   :  { %1679 = vsyncpa [#allocation4], 1 }

</bundles_post_ra>
